<compile_context>
chip_gen: v7x
topology: tpu7x:2x2x1
jax: 0.10.0
libtpu: 0.0.40
codegen_flags: <defaults>
</compile_context>

<pallas_src>
import jax
import jax.numpy as jnp
from jax.experimental import pallas as pl
from jax.experimental.pallas import tpu as pltpu


VMEM_LIMIT = 32 * 1024 * 1024  # safe on v5e (128 MiB phys), v6e (128), v7x (64)


# ----------------------------------------------------------------------------
# Tiled matmul + bias:  (N, K) @ (K, M) + b  -> (N, M) f32.
# bf16 operands on the MXU, f32 VMEM accumulator, bias folded into finalize.
# Used for the vocab decoder (the LSTM input projection is fused below).
# ----------------------------------------------------------------------------
def matmul_bias_kernel(x_ref, w_ref, b_ref, o_ref, acc_ref):
    k = pl.program_id(2)

    @pl.when(k == 0)
    def _():
        acc_ref[...] = jnp.zeros_like(acc_ref)

    acc_ref[...] += jnp.dot(x_ref[...].astype(jnp.bfloat16),
                            w_ref[...].astype(jnp.bfloat16),
                            preferred_element_type=jnp.float32)

    @pl.when(k == pl.num_programs(2) - 1)
    def _():
        o_ref[...] = (acc_ref[...] + b_ref[...]).astype(o_ref.dtype)


def matmul_bias(x, w, b, *, tm=512, tn=512, tk=256):
    """x: (N, K), w: (K, M) [bf16 ok], b: (1, M) f32 -> (N, M) float32."""
    N, K = x.shape
    K2, M = w.shape
    assert K == K2 and b.shape == (1, M)
    tm, tn, tk = min(tm, N), min(tn, M), min(tk, K)
    assert N % tm == 0 and M % tn == 0 and K % tk == 0
    grid = (N // tm, M // tn, K // tk)

    return pl.pallas_call(
        matmul_bias_kernel,
        out_shape=jax.ShapeDtypeStruct((N, M), jnp.float32),
        grid_spec=pltpu.PrefetchScalarGridSpec(
            num_scalar_prefetch=0,
            grid=grid,
            in_specs=[
                pl.BlockSpec((tm, tk), lambda i, j, k: (i, k)),
                pl.BlockSpec((tk, tn), lambda i, j, k: (k, j)),
                pl.BlockSpec((1, tn), lambda i, j, k: (0, j)),
            ],
            out_specs=pl.BlockSpec((tm, tn), lambda i, j, k: (i, j)),
            scratch_shapes=[pltpu.VMEM((tm, tn), jnp.float32)],
        ),
        compiler_params=pltpu.CompilerParams(
            dimension_semantics=("parallel", "parallel", "arbitrary"),
            vmem_limit_bytes=VMEM_LIMIT),
    )(x, w, b)


# ----------------------------------------------------------------------------
# Fused LSTM chunk kernel: per time chunk,
#   1) input projection (B*TC, D) @ (D, 4H) + b  (one MXU matmul, bf16 operands)
#   2) TC recurrence steps: gates = xg + h @ W_hh, standard LSTM cell update,
#      packed-sequence mask (padded steps emit 0 and do not advance h/c).
#
#   len_ref : (B, 1) int32 sequence lengths (resident)
#   x_ref   : (B, TC, D) bf16 embedded chunk
#   wih/b   : (D, 4H) bf16 / (1, 4H) f32 (resident)
#   whh     : (H, 4H) bf16 (resident)
#   hN/cN   : constant-index outputs -> resident in VMEM, double as the
#             recurrent carry across grid chunks.
# ----------------------------------------------------------------------------
def lstm_kernel(len_ref, x_ref, wih_ref, b_ref, whh_ref, h0_ref, c0_ref,
                out_ref, hN_ref, cN_ref):
    chunk = pl.program_id(0)
    B, TC, _ = x_ref.shape
    H = hN_ref.shape[-1]

    @pl.when(chunk == 0)
    def _():
        hN_ref[...] = h0_ref[...]
        cN_ref[...] = c0_ref[...]

    # ---- fused input projection for the whole chunk (B*TC MXU rows) --------
    xg_all = jnp.einsum("btd,dg->btg", x_ref[...], wih_ref[...],
                        preferred_element_type=jnp.float32)        # (B, TC, 4H) f32
    xg_all = xg_all + b_ref[...]                                   # broadcast (1,4H)

    # ---- per-chunk validity mask (hoisted out of the step loop) ------------
    lens = len_ref[...]                                            # (B, 1) int32
    base = chunk * TC
    step_ids = base + jax.lax.broadcasted_iota(jnp.int32, (1, TC), 1)
    valid_all = lens > step_ids                                    # (B, TC) bool

    whh = whh_ref[...]                                             # (H, 4H) bf16
    h = hN_ref[...]                                                # (B, H) f32
    c = cN_ref[...]                                                # (B, H) f32

    # Statically unrolled inner time loop (TC small; all Ref indices static).
    # TODO(synk): for large TC switch to lax.fori_loop(unroll=4-8) to bound vregs.
    for s in range(TC):
        xg = xg_all[:, s, :]                                       # (B, 4H) f32
        gates = xg + jnp.dot(h.astype(jnp.bfloat16), whh,
                             preferred_element_type=jnp.float32)   # (B, 4H) f32

        # PyTorch LSTM gate order: input, forget, cell(g), output
        i = jax.nn.sigmoid(gates[:, 0 * H:1 * H])
        f = jax.nn.sigmoid(gates[:, 1 * H:2 * H])
        g = jnp.tanh(gates[:, 2 * H:3 * H])
        o = jax.nn.sigmoid(gates[:, 3 * H:4 * H])

        c_new = f * c + i * g
        h_new = o * jnp.tanh(c_new)

        # packed-sequence semantics: padded steps emit zeros, state not advanced.
        vm = jnp.broadcast_to(valid_all[:, s:s + 1], (B, H))       # one bcast / step
        out_ref[:, s, :] = jnp.where(vm, h_new, 0.0)
        h = jnp.where(vm, h_new, h)
        c = jnp.where(vm, c_new, c)

    hN_ref[...] = h
    cN_ref[...] = c


def lstm_encoder(len2d, embedded, w_ih, b_lstm, w_hh, h0, c0, *, time_chunk=8):
    B, T, D = embedded.shape
    H = w_hh.shape[0]
    assert w_ih.shape == (D, 4 * H) and T % time_chunk == 0
    TC = time_chunk
    G = 4 * H

    grid_spec = pltpu.PrefetchScalarGridSpec(
        num_scalar_prefetch=0,
        grid=(T // TC,),
        in_specs=[
            pl.BlockSpec((B, 1), lambda t: (0, 0)),           # lengths (resident)
            pl.BlockSpec((B, TC, D), lambda t: (0, t, 0)),    # embedded chunk
            pl.BlockSpec((D, G), lambda t: (0, 0)),           # W_ih (resident)
            pl.BlockSpec((1, G), lambda t: (0, 0)),           # b_ih+b_hh (resident)
            pl.BlockSpec((H, G), lambda t: (0, 0)),           # W_hh (resident)
            pl.BlockSpec((B, H), lambda t: (0, 0)),           # h0
            pl.BlockSpec((B, H), lambda t: (0, 0)),           # c0
        ],
        out_specs=[
            pl.BlockSpec((B, TC, H), lambda t: (0, t, 0)),    # per-step outputs
            pl.BlockSpec((B, H), lambda t: (0, 0)),           # final h (carry)
            pl.BlockSpec((B, H), lambda t: (0, 0)),           # final c (carry)
        ],
    )
    return pl.pallas_call(
        lstm_kernel,
        out_shape=(
            jax.ShapeDtypeStruct((B, T, H), jnp.float32),
            jax.ShapeDtypeStruct((B, H), jnp.float32),
            jax.ShapeDtypeStruct((B, H), jnp.float32),
        ),
        grid_spec=grid_spec,
        compiler_params=pltpu.CompilerParams(
            dimension_semantics=("arbitrary",),
            vmem_limit_bytes=VMEM_LIMIT),
    )(len2d, embedded, w_ih, b_lstm, w_hh, h0, c0)


# ----------------------------------------------------------------------------
# Full forward pass. Glue in plain JAX: embedding gather and reshapes only.
# ----------------------------------------------------------------------------
def rnn_language_model_forward(params, inputs, hidden, lengths, *, time_chunk=8):
    """inputs: (B, T) int32 token ids; hidden: (h0, c0) each (B, H); lengths: (B,)."""
    E = params["embedding"]                               # (V, D) bf16
    B, T = inputs.shape
    H = params["w_hh"].shape[0]
    V = params["w_dec"].shape[1]

    # TODO(synk): embedding gather could be fused via scalar-prefetched token ids
    # (pl.Element row gather); kept as XLA glue here.
    embedded = jnp.take(E, inputs, axis=0)                # (B, T, D) bf16

    h0, c0 = hidden
    len2d = lengths.reshape(B, 1).astype(jnp.int32)
    out, hN, cN = lstm_encoder(len2d, embedded,
                               params["w_ih"], params["b_lstm"], params["w_hh"],
                               h0, c0, time_chunk=time_chunk)      # (B, T, H) f32

    # dropout: identity (eval mode)
    decoded = matmul_bias(out.reshape(B * T, H),
                          params["w_dec"], params["b_dec"])        # (B*T, V) f32
    return decoded.reshape(B, T, V), (hN, cN)


if __name__ == "__main__":
    # Small but TPU-aligned config (H, 4H, V multiples of 128; B multiple of 8).
    B, T, D, H, V = 8, 16, 128, 128, 256
    TC = 8

    key = jax.random.PRNGKey(0)
    k_emb, k_ih, k_hh, k_b, k_wd, k_bd, k_tok, k_h, k_c = jax.random.split(key, 9)

    params = {
        # MXU-facing weights stored bf16 (halves weight DMA, bf16-native MXU).
        "embedding": (0.1 * jax.random.normal(k_emb, (V, D), jnp.float32)).astype(jnp.bfloat16),
        "w_ih": (0.1 * jax.random.normal(k_ih, (D, 4 * H), jnp.float32)).astype(jnp.bfloat16),
        "w_hh": (0.1 * jax.random.normal(k_hh, (H, 4 * H), jnp.float32)).astype(jnp.bfloat16),
        # b_lstm must equal b_ih + b_hh from a PyTorch checkpoint (kept f32).
        "b_lstm": 0.1 * jax.random.normal(k_b, (1, 4 * H), jnp.float32),
        "w_dec": (0.1 * jax.random.normal(k_wd, (H, V), jnp.float32)).astype(jnp.bfloat16),
        "b_dec": 0.1 * jax.random.normal(k_bd, (1, V), jnp.float32),
    }

    inputs = jax.random.randint(k_tok, (B, T), 0, V, dtype=jnp.int32)
    lengths = jnp.array([T, T - 3, T, 9, 5, T, 1, 12], dtype=jnp.int32)
    h0 = 0.1 * jax.random.normal(k_h, (B, H), jnp.float32)
    c0 = 0.1 * jax.random.normal(k_c, (B, H), jnp.float32)

    decoded, (hN, cN) = rnn_language_model_forward(params, inputs, (h0, c0),
                                                   lengths, time_chunk=TC)
    jax.block_until_ready((decoded, hN, cN))

    assert decoded.shape == (B, T, V)
    assert hN.shape == (B, H) and cN.shape == (B, H)
    assert bool(jnp.all(jnp.isfinite(decoded)))
    print("KERNEL_OK")
</pallas_src>

<mosaic_0001>
module attributes {stable_mosaic.version = 11 : i64} {
  func.func @lstm_kernel(%arg0: i32, %arg1: memref<8x1xi32, #tpu.memory_space<vmem>>, %arg2: memref<8x8x128xbf16, #tpu.memory_space<vmem>>, %arg3: memref<128x512xbf16, #tpu.memory_space<vmem>>, %arg4: memref<1x512xf32, #tpu.memory_space<vmem>>, %arg5: memref<128x512xbf16, #tpu.memory_space<vmem>>, %arg6: memref<8x128xf32, #tpu.memory_space<vmem>>, %arg7: memref<8x128xf32, #tpu.memory_space<vmem>>, %arg8: memref<8x8x128xf32, #tpu.memory_space<vmem>>, %arg9: memref<8x128xf32, #tpu.memory_space<vmem>>, %arg10: memref<8x128xf32, #tpu.memory_space<vmem>>) attributes {dimension_semantics = [#tpu.dimension_semantics<arbitrary>], iteration_bounds = array<i64: 2>, scalar_prefetch = 0 : i64, scratch_operands = 0 : i64, tpu.core_type = #tpu.core_type<tc>, window_params = [{pipeline_mode = #tpu.pipeline_mode<synchronous>, transform_indices = @transform_0, window_bounds = array<i64: 8, 1>}, {transform_indices = @transform_1, window_bounds = array<i64: 8, 8, 128>}, {pipeline_mode = #tpu.pipeline_mode<synchronous>, transform_indices = @transform_2, window_bounds = array<i64: 128, 512>}, {pipeline_mode = #tpu.pipeline_mode<synchronous>, transform_indices = @transform_3, window_bounds = array<i64: 1, 512>}, {pipeline_mode = #tpu.pipeline_mode<synchronous>, transform_indices = @transform_4, window_bounds = array<i64: 128, 512>}, {pipeline_mode = #tpu.pipeline_mode<synchronous>, transform_indices = @transform_5, window_bounds = array<i64: 8, 128>}, {pipeline_mode = #tpu.pipeline_mode<synchronous>, transform_indices = @transform_6, window_bounds = array<i64: 8, 128>}, {transform_indices = @transform_7, window_bounds = array<i64: 8, 8, 128>}, {pipeline_mode = #tpu.pipeline_mode<synchronous>, transform_indices = @transform_8, window_bounds = array<i64: 8, 128>}, {pipeline_mode = #tpu.pipeline_mode<synchronous>, transform_indices = @transform_9, window_bounds = array<i64: 8, 128>}]} {
    %c0_i32 = arith.constant 0 : i32
    %0 = arith.cmpi eq, %arg0, %c0_i32 : i32
    %1 = arith.extui %0 : i1 to i32
    %c0_i32_0 = arith.constant 0 : i32
    %2 = arith.cmpi ne, %1, %c0_i32_0 : i32
    scf.if %2 {
      %c0_76 = arith.constant 0 : index
      %c0_77 = arith.constant 0 : index
      %343 = vector.load %arg6[%c0_76, %c0_77] : memref<8x128xf32, #tpu.memory_space<vmem>>, vector<8x128xf32>
      %c0_78 = arith.constant 0 : index
      %c0_79 = arith.constant 0 : index
      %344 = vector.load %arg9[%c0_78, %c0_79] : memref<8x128xf32, #tpu.memory_space<vmem>>, vector<8x128xf32>
      tpu.vector_store %arg9[%c0_78, %c0_79], %343 {strides = array<i32>} : memref<8x128xf32, #tpu.memory_space<vmem>>, vector<8x128xf32>,
      %c0_80 = arith.constant 0 : index
      %c0_81 = arith.constant 0 : index
      %345 = vector.load %arg7[%c0_80, %c0_81] : memref<8x128xf32, #tpu.memory_space<vmem>>, vector<8x128xf32>
      %c0_82 = arith.constant 0 : index
      %c0_83 = arith.constant 0 : index
      %346 = vector.load %arg10[%c0_82, %c0_83] : memref<8x128xf32, #tpu.memory_space<vmem>>, vector<8x128xf32>
      tpu.vector_store %arg10[%c0_82, %c0_83], %345 {strides = array<i32>} : memref<8x128xf32, #tpu.memory_space<vmem>>, vector<8x128xf32>,
    } else {
    }
    %c0 = arith.constant 0 : index
    %c0_1 = arith.constant 0 : index
    %c0_2 = arith.constant 0 : index
    %3 = vector.load %arg2[%c0, %c0_1, %c0_2] : memref<8x8x128xbf16, #tpu.memory_space<vmem>>, vector<8x8x128xbf16>
    %c0_3 = arith.constant 0 : index
    %c0_4 = arith.constant 0 : index
    %4 = vector.load %arg3[%c0_3, %c0_4] : memref<128x512xbf16, #tpu.memory_space<vmem>>, vector<128x512xbf16>
    "tpu.trace_start"() <{level = 10 : i32, message = "btd,dg->btg"}> : () -> ()
    %cst = arith.constant dense<0.000000e+00> : vector<8x8x512xf32>
    %5 = tpu.matmul %3, %4, %cst {dimension_numbers = #tpu.dot_dimension_numbers<[2], [0], [0, 1], [1], [0, 0, 0, 1, 1, 1], [], []>} : vector<8x8x128xbf16>, vector<128x512xbf16>, vector<8x8x512xf32> -> vector<8x8x512xf32>
    "tpu.trace_stop"() : () -> ()
    %c0_5 = arith.constant 0 : index
    %c0_6 = arith.constant 0 : index
    %6 = vector.load %arg4[%c0_5, %c0_6] : memref<1x512xf32, #tpu.memory_space<vmem>>, vector<1x512xf32>
    %7 = vector.shape_cast %6 : vector<1x512xf32> to vector<1x1x512xf32>
    %8 = vector.broadcast %7 : vector<1x1x512xf32> to vector<8x8x512xf32>
    %9 = arith.addf %5, %8 : vector<8x8x512xf32>
    %c0_7 = arith.constant 0 : index
    %c0_8 = arith.constant 0 : index
    %10 = vector.load %arg1[%c0_7, %c0_8] : memref<8x1xi32, #tpu.memory_space<vmem>>, vector<8x1xi32>
    %c8_i32 = arith.constant 8 : i32
    %11 = arith.muli %arg0, %c8_i32 : i32
    %12 = tpu.iota {dimensions = array<i32: 1>} : vector<1x8xi32>
    %13 = vector.broadcast %11 : i32 to vector<1x8xi32>
    %14 = arith.addi %13, %12 : vector<1x8xi32>
    %15 = vector.broadcast %10 : vector<8x1xi32> to vector<8x8xi32>
    %16 = vector.broadcast %14 : vector<1x8xi32> to vector<8x8xi32>
    %17 = arith.cmpi sgt, %15, %16 : vector<8x8xi32>
    %c0_9 = arith.constant 0 : index
    %c0_10 = arith.constant 0 : index
    %18 = vector.load %arg5[%c0_9, %c0_10] : memref<128x512xbf16, #tpu.memory_space<vmem>>, vector<128x512xbf16>
    %c0_11 = arith.constant 0 : index
    %c0_12 = arith.constant 0 : index
    %19 = vector.load %arg9[%c0_11, %c0_12] : memref<8x128xf32, #tpu.memory_space<vmem>>, vector<8x128xf32>
    %c0_13 = arith.constant 0 : index
    %c0_14 = arith.constant 0 : index
    %20 = vector.load %arg10[%c0_13, %c0_14] : memref<8x128xf32, #tpu.memory_space<vmem>>, vector<8x128xf32>
    %21 = vector.extract_strided_slice %9 {offsets = [0, 0, 0], sizes = [8, 1, 512], strides = [1, 1, 1]} : vector<8x8x512xf32> to vector<8x1x512xf32>
    %22 = vector.shape_cast %21 : vector<8x1x512xf32> to vector<8x512xf32>
    %23 = arith.truncf %19 : vector<8x128xf32> to vector<8x128xbf16>
    %cst_15 = arith.constant dense<0.000000e+00> : vector<8x512xf32>
    %24 = tpu.matmul %23, %18, %cst_15 {dimension_numbers = #tpu.dot_dimension_numbers<[1], [0], [0], [1], [0, 0, 1, 1], [], []>} : vector<8x128xbf16>, vector<128x512xbf16>, vector<8x512xf32> -> vector<8x512xf32>
    %25 = arith.addf %22, %24 : vector<8x512xf32>
    %26 = vector.extract_strided_slice %25 {offsets = [0, 0], sizes = [8, 128], strides = [1, 1]} : vector<8x512xf32> to vector<8x128xf32>
    %27 = arith.negf %26 : vector<8x128xf32>
    %28 = math.exp %27 : vector<8x128xf32>
    %cst_16 = arith.constant 1.000000e+00 : f32
    %29 = vector.broadcast %cst_16 : f32 to vector<8x128xf32>
    %30 = arith.addf %29, %28 : vector<8x128xf32>
    %31 = arith.divf %29, %30 : vector<8x128xf32>
    %32 = vector.extract_strided_slice %25 {offsets = [0, 128], sizes = [8, 128], strides = [1, 1]} : vector<8x512xf32> to vector<8x128xf32>
    %33 = arith.negf %32 : vector<8x128xf32>
    %34 = math.exp %33 : vector<8x128xf32>
    %cst_17 = arith.constant 1.000000e+00 : f32
    %35 = vector.broadcast %cst_17 : f32 to vector<8x128xf32>
    %36 = arith.addf %35, %34 : vector<8x128xf32>
    %37 = arith.divf %35, %36 : vector<8x128xf32>
    %38 = vector.extract_strided_slice %25 {offsets = [0, 256], sizes = [8, 128], strides = [1, 1]} : vector<8x512xf32> to vector<8x128xf32>
    %39 = math.tanh %38 : vector<8x128xf32>
    %40 = vector.extract_strided_slice %25 {offsets = [0, 384], sizes = [8, 128], strides = [1, 1]} : vector<8x512xf32> to vector<8x128xf32>
    %41 = arith.negf %40 : vector<8x128xf32>
    %42 = math.exp %41 : vector<8x128xf32>
    %cst_18 = arith.constant 1.000000e+00 : f32
    %43 = vector.broadcast %cst_18 : f32 to vector<8x128xf32>
    %44 = arith.addf %43, %42 : vector<8x128xf32>
    %45 = arith.divf %43, %44 : vector<8x128xf32>
    %46 = arith.mulf %37, %20 : vector<8x128xf32>
    %47 = arith.mulf %31, %39 : vector<8x128xf32>
    %48 = arith.addf %46, %47 : vector<8x128xf32>
    %49 = math.tanh %48 : vector<8x128xf32>
    %50 = arith.mulf %45, %49 : vector<8x128xf32>
    %51 = vector.extract_strided_slice %17 {offsets = [0, 0], sizes = [8, 1], strides = [1, 1]} : vector<8x8xi1> to vector<8x1xi1>
    %52 = vector.shape_cast %51 : vector<8x1xi1> to vector<8x1xi1>
    %53 = vector.broadcast %52 : vector<8x1xi1> to vector<8x128xi1>
    %cst_19 = arith.constant 0.000000e+00 : f32
    %54 = vector.broadcast %cst_19 : f32 to vector<8x128xf32>
    %55 = arith.select %53, %50, %54 : vector<8x128xi1>, vector<8x128xf32>
    %c0_20 = arith.constant 0 : index
    %c0_21 = arith.constant 0 : index
    %c0_22 = arith.constant 0 : index
    %56 = vector.load %arg8[%c0_20, %c0_21, %c0_22] : memref<8x8x128xf32, #tpu.memory_space<vmem>>, vector<8x1x128xf32>
    %57 = vector.shape_cast %56 : vector<8x1x128xf32> to vector<8x128xf32>
    %58 = vector.shape_cast %55 : vector<8x128xf32> to vector<8x1x128xf32>
    tpu.vector_store %arg8[%c0_20, %c0_21, %c0_22], %58 {strides = array<i32>} : memref<8x8x128xf32, #tpu.memory_space<vmem>>, vector<8x1x128xf32>,
    %59 = arith.select %53, %50, %19 : vector<8x128xi1>, vector<8x128xf32>
    %60 = arith.select %53, %48, %20 : vector<8x128xi1>, vector<8x128xf32>
    %61 = vector.extract_strided_slice %9 {offsets = [0, 1, 0], sizes = [8, 1, 512], strides = [1, 1, 1]} : vector<8x8x512xf32> to vector<8x1x512xf32>
    %62 = vector.shape_cast %61 : vector<8x1x512xf32> to vector<8x512xf32>
    %63 = arith.truncf %59 : vector<8x128xf32> to vector<8x128xbf16>
    %cst_23 = arith.constant dense<0.000000e+00> : vector<8x512xf32>
    %64 = tpu.matmul %63, %18, %cst_23 {dimension_numbers = #tpu.dot_dimension_numbers<[1], [0], [0], [1], [0, 0, 1, 1], [], []>} : vector<8x128xbf16>, vector<128x512xbf16>, vector<8x512xf32> -> vector<8x512xf32>
    %65 = arith.addf %62, %64 : vector<8x512xf32>
    %66 = vector.extract_strided_slice %65 {offsets = [0, 0], sizes = [8, 128], strides = [1, 1]} : vector<8x512xf32> to vector<8x128xf32>
    %67 = arith.negf %66 : vector<8x128xf32>
    %68 = math.exp %67 : vector<8x128xf32>
    %cst_24 = arith.constant 1.000000e+00 : f32
    %69 = vector.broadcast %cst_24 : f32 to vector<8x128xf32>
    %70 = arith.addf %69, %68 : vector<8x128xf32>
    %71 = arith.divf %69, %70 : vector<8x128xf32>
    %72 = vector.extract_strided_slice %65 {offsets = [0, 128], sizes = [8, 128], strides = [1, 1]} : vector<8x512xf32> to vector<8x128xf32>
    %73 = arith.negf %72 : vector<8x128xf32>
    %74 = math.exp %73 : vector<8x128xf32>
    %cst_25 = arith.constant 1.000000e+00 : f32
    %75 = vector.broadcast %cst_25 : f32 to vector<8x128xf32>
    %76 = arith.addf %75, %74 : vector<8x128xf32>
    %77 = arith.divf %75, %76 : vector<8x128xf32>
    %78 = vector.extract_strided_slice %65 {offsets = [0, 256], sizes = [8, 128], strides = [1, 1]} : vector<8x512xf32> to vector<8x128xf32>
    %79 = math.tanh %78 : vector<8x128xf32>
    %80 = vector.extract_strided_slice %65 {offsets = [0, 384], sizes = [8, 128], strides = [1, 1]} : vector<8x512xf32> to vector<8x128xf32>
    %81 = arith.negf %80 : vector<8x128xf32>
    %82 = math.exp %81 : vector<8x128xf32>
    %cst_26 = arith.constant 1.000000e+00 : f32
    %83 = vector.broadcast %cst_26 : f32 to vector<8x128xf32>
    %84 = arith.addf %83, %82 : vector<8x128xf32>
    %85 = arith.divf %83, %84 : vector<8x128xf32>
    %86 = arith.mulf %77, %60 : vector<8x128xf32>
    %87 = arith.mulf %71, %79 : vector<8x128xf32>
    %88 = arith.addf %86, %87 : vector<8x128xf32>
    %89 = math.tanh %88 : vector<8x128xf32>
    %90 = arith.mulf %85, %89 : vector<8x128xf32>
    %91 = vector.extract_strided_slice %17 {offsets = [0, 1], sizes = [8, 1], strides = [1, 1]} : vector<8x8xi1> to vector<8x1xi1>
    %92 = vector.shape_cast %91 : vector<8x1xi1> to vector<8x1xi1>
    %93 = vector.broadcast %92 : vector<8x1xi1> to vector<8x128xi1>
    %cst_27 = arith.constant 0.000000e+00 : f32
    %94 = vector.broadcast %cst_27 : f32 to vector<8x128xf32>
    %95 = arith.select %93, %90, %94 : vector<8x128xi1>, vector<8x128xf32>
    %c0_28 = arith.constant 0 : index
    %c1 = arith.constant 1 : index
    %c0_29 = arith.constant 0 : index
    %96 = vector.load %arg8[%c0_28, %c1, %c0_29] : memref<8x8x128xf32, #tpu.memory_space<vmem>>, vector<8x1x128xf32>
    %97 = vector.shape_cast %96 : vector<8x1x128xf32> to vector<8x128xf32>
    %98 = vector.shape_cast %95 : vector<8x128xf32> to vector<8x1x128xf32>
    tpu.vector_store %arg8[%c0_28, %c1, %c0_29], %98 {strides = array<i32>} : memref<8x8x128xf32, #tpu.memory_space<vmem>>, vector<8x1x128xf32>,
    %99 = arith.select %93, %90, %59 : vector<8x128xi1>, vector<8x128xf32>
    %100 = arith.select %93, %88, %60 : vector<8x128xi1>, vector<8x128xf32>
    %101 = vector.extract_strided_slice %9 {offsets = [0, 2, 0], sizes = [8, 1, 512], strides = [1, 1, 1]} : vector<8x8x512xf32> to vector<8x1x512xf32>
    %102 = vector.shape_cast %101 : vector<8x1x512xf32> to vector<8x512xf32>
    %103 = arith.truncf %99 : vector<8x128xf32> to vector<8x128xbf16>
    %cst_30 = arith.constant dense<0.000000e+00> : vector<8x512xf32>
    %104 = tpu.matmul %103, %18, %cst_30 {dimension_numbers = #tpu.dot_dimension_numbers<[1], [0], [0], [1], [0, 0, 1, 1], [], []>} : vector<8x128xbf16>, vector<128x512xbf16>, vector<8x512xf32> -> vector<8x512xf32>
    %105 = arith.addf %102, %104 : vector<8x512xf32>
    %106 = vector.extract_strided_slice %105 {offsets = [0, 0], sizes = [8, 128], strides = [1, 1]} : vector<8x512xf32> to vector<8x128xf32>
    %107 = arith.negf %106 : vector<8x128xf32>
    %108 = math.exp %107 : vector<8x128xf32>
    %cst_31 = arith.constant 1.000000e+00 : f32
    %109 = vector.broadcast %cst_31 : f32 to vector<8x128xf32>
    %110 = arith.addf %109, %108 : vector<8x128xf32>
    %111 = arith.divf %109, %110 : vector<8x128xf32>
    %112 = vector.extract_strided_slice %105 {offsets = [0, 128], sizes = [8, 128], strides = [1, 1]} : vector<8x512xf32> to vector<8x128xf32>
    %113 = arith.negf %112 : vector<8x128xf32>
    %114 = math.exp %113 : vector<8x128xf32>
    %cst_32 = arith.constant 1.000000e+00 : f32
    %115 = vector.broadcast %cst_32 : f32 to vector<8x128xf32>
    %116 = arith.addf %115, %114 : vector<8x128xf32>
    %117 = arith.divf %115, %116 : vector<8x128xf32>
    %118 = vector.extract_strided_slice %105 {offsets = [0, 256], sizes = [8, 128], strides = [1, 1]} : vector<8x512xf32> to vector<8x128xf32>
    %119 = math.tanh %118 : vector<8x128xf32>
    %120 = vector.extract_strided_slice %105 {offsets = [0, 384], sizes = [8, 128], strides = [1, 1]} : vector<8x512xf32> to vector<8x128xf32>
    %121 = arith.negf %120 : vector<8x128xf32>
    %122 = math.exp %121 : vector<8x128xf32>
    %cst_33 = arith.constant 1.000000e+00 : f32
    %123 = vector.broadcast %cst_33 : f32 to vector<8x128xf32>
    %124 = arith.addf %123, %122 : vector<8x128xf32>
    %125 = arith.divf %123, %124 : vector<8x128xf32>
    %126 = arith.mulf %117, %100 : vector<8x128xf32>
    %127 = arith.mulf %111, %119 : vector<8x128xf32>
    %128 = arith.addf %126, %127 : vector<8x128xf32>
    %129 = math.tanh %128 : vector<8x128xf32>
    %130 = arith.mulf %125, %129 : vector<8x128xf32>
    %131 = vector.extract_strided_slice %17 {offsets = [0, 2], sizes = [8, 1], strides = [1, 1]} : vector<8x8xi1> to vector<8x1xi1>
    %132 = vector.shape_cast %131 : vector<8x1xi1> to vector<8x1xi1>
    %133 = vector.broadcast %132 : vector<8x1xi1> to vector<8x128xi1>
    %cst_34 = arith.constant 0.000000e+00 : f32
    %134 = vector.broadcast %cst_34 : f32 to vector<8x128xf32>
    %135 = arith.select %133, %130, %134 : vector<8x128xi1>, vector<8x128xf32>
    %c0_35 = arith.constant 0 : index
    %c2 = arith.constant 2 : index
    %c0_36 = arith.constant 0 : index
    %136 = vector.load %arg8[%c0_35, %c2, %c0_36] : memref<8x8x128xf32, #tpu.memory_space<vmem>>, vector<8x1x128xf32>
    %137 = vector.shape_cast %136 : vector<8x1x128xf32> to vector<8x128xf32>
    %138 = vector.shape_cast %135 : vector<8x128xf32> to vector<8x1x128xf32>
    tpu.vector_store %arg8[%c0_35, %c2, %c0_36], %138 {strides = array<i32>} : memref<8x8x128xf32, #tpu.memory_space<vmem>>, vector<8x1x128xf32>,
    %139 = arith.select %133, %130, %99 : vector<8x128xi1>, vector<8x128xf32>
    %140 = arith.select %133, %128, %100 : vector<8x128xi1>, vector<8x128xf32>
    %141 = vector.extract_strided_slice %9 {offsets = [0, 3, 0], sizes = [8, 1, 512], strides = [1, 1, 1]} : vector<8x8x512xf32> to vector<8x1x512xf32>
    %142 = vector.shape_cast %141 : vector<8x1x512xf32> to vector<8x512xf32>
    %143 = arith.truncf %139 : vector<8x128xf32> to vector<8x128xbf16>
    %cst_37 = arith.constant dense<0.000000e+00> : vector<8x512xf32>
    %144 = tpu.matmul %143, %18, %cst_37 {dimension_numbers = #tpu.dot_dimension_numbers<[1], [0], [0], [1], [0, 0, 1, 1], [], []>} : vector<8x128xbf16>, vector<128x512xbf16>, vector<8x512xf32> -> vector<8x512xf32>
    %145 = arith.addf %142, %144 : vector<8x512xf32>
    %146 = vector.extract_strided_slice %145 {offsets = [0, 0], sizes = [8, 128], strides = [1, 1]} : vector<8x512xf32> to vector<8x128xf32>
    %147 = arith.negf %146 : vector<8x128xf32>
    %148 = math.exp %147 : vector<8x128xf32>
    %cst_38 = arith.constant 1.000000e+00 : f32
    %149 = vector.broadcast %cst_38 : f32 to vector<8x128xf32>
    %150 = arith.addf %149, %148 : vector<8x128xf32>
    %151 = arith.divf %149, %150 : vector<8x128xf32>
    %152 = vector.extract_strided_slice %145 {offsets = [0, 128], sizes = [8, 128], strides = [1, 1]} : vector<8x512xf32> to vector<8x128xf32>
    %153 = arith.negf %152 : vector<8x128xf32>
    %154 = math.exp %153 : vector<8x128xf32>
    %cst_39 = arith.constant 1.000000e+00 : f32
    %155 = vector.broadcast %cst_39 : f32 to vector<8x128xf32>
    %156 = arith.addf %155, %154 : vector<8x128xf32>
    %157 = arith.divf %155, %156 : vector<8x128xf32>
    %158 = vector.extract_strided_slice %145 {offsets = [0, 256], sizes = [8, 128], strides = [1, 1]} : vector<8x512xf32> to vector<8x128xf32>
    %159 = math.tanh %158 : vector<8x128xf32>
    %160 = vector.extract_strided_slice %145 {offsets = [0, 384], sizes = [8, 128], strides = [1, 1]} : vector<8x512xf32> to vector<8x128xf32>
    %161 = arith.negf %160 : vector<8x128xf32>
    %162 = math.exp %161 : vector<8x128xf32>
    %cst_40 = arith.constant 1.000000e+00 : f32
    %163 = vector.broadcast %cst_40 : f32 to vector<8x128xf32>
    %164 = arith.addf %163, %162 : vector<8x128xf32>
    %165 = arith.divf %163, %164 : vector<8x128xf32>
    %166 = arith.mulf %157, %140 : vector<8x128xf32>
    %167 = arith.mulf %151, %159 : vector<8x128xf32>
    %168 = arith.addf %166, %167 : vector<8x128xf32>
    %169 = math.tanh %168 : vector<8x128xf32>
    %170 = arith.mulf %165, %169 : vector<8x128xf32>
    %171 = vector.extract_strided_slice %17 {offsets = [0, 3], sizes = [8, 1], strides = [1, 1]} : vector<8x8xi1> to vector<8x1xi1>
    %172 = vector.shape_cast %171 : vector<8x1xi1> to vector<8x1xi1>
    %173 = vector.broadcast %172 : vector<8x1xi1> to vector<8x128xi1>
    %cst_41 = arith.constant 0.000000e+00 : f32
    %174 = vector.broadcast %cst_41 : f32 to vector<8x128xf32>
    %175 = arith.select %173, %170, %174 : vector<8x128xi1>, vector<8x128xf32>
    %c0_42 = arith.constant 0 : index
    %c3 = arith.constant 3 : index
    %c0_43 = arith.constant 0 : index
    %176 = vector.load %arg8[%c0_42, %c3, %c0_43] : memref<8x8x128xf32, #tpu.memory_space<vmem>>, vector<8x1x128xf32>
    %177 = vector.shape_cast %176 : vector<8x1x128xf32> to vector<8x128xf32>
    %178 = vector.shape_cast %175 : vector<8x128xf32> to vector<8x1x128xf32>
    tpu.vector_store %arg8[%c0_42, %c3, %c0_43], %178 {strides = array<i32>} : memref<8x8x128xf32, #tpu.memory_space<vmem>>, vector<8x1x128xf32>,
    %179 = arith.select %173, %170, %139 : vector<8x128xi1>, vector<8x128xf32>
    %180 = arith.select %173, %168, %140 : vector<8x128xi1>, vector<8x128xf32>
    %181 = vector.extract_strided_slice %9 {offsets = [0, 4, 0], sizes = [8, 1, 512], strides = [1, 1, 1]} : vector<8x8x512xf32> to vector<8x1x512xf32>
    %182 = vector.shape_cast %181 : vector<8x1x512xf32> to vector<8x512xf32>
    %183 = arith.truncf %179 : vector<8x128xf32> to vector<8x128xbf16>
    %cst_44 = arith.constant dense<0.000000e+00> : vector<8x512xf32>
    %184 = tpu.matmul %183, %18, %cst_44 {dimension_numbers = #tpu.dot_dimension_numbers<[1], [0], [0], [1], [0, 0, 1, 1], [], []>} : vector<8x128xbf16>, vector<128x512xbf16>, vector<8x512xf32> -> vector<8x512xf32>
    %185 = arith.addf %182, %184 : vector<8x512xf32>
    %186 = vector.extract_strided_slice %185 {offsets = [0, 0], sizes = [8, 128], strides = [1, 1]} : vector<8x512xf32> to vector<8x128xf32>
    %187 = arith.negf %186 : vector<8x128xf32>
    %188 = math.exp %187 : vector<8x128xf32>
    %cst_45 = arith.constant 1.000000e+00 : f32
    %189 = vector.broadcast %cst_45 : f32 to vector<8x128xf32>
    %190 = arith.addf %189, %188 : vector<8x128xf32>
    %191 = arith.divf %189, %190 : vector<8x128xf32>
    %192 = vector.extract_strided_slice %185 {offsets = [0, 128], sizes = [8, 128], strides = [1, 1]} : vector<8x512xf32> to vector<8x128xf32>
    %193 = arith.negf %192 : vector<8x128xf32>
    %194 = math.exp %193 : vector<8x128xf32>
    %cst_46 = arith.constant 1.000000e+00 : f32
    %195 = vector.broadcast %cst_46 : f32 to vector<8x128xf32>
    %196 = arith.addf %195, %194 : vector<8x128xf32>
    %197 = arith.divf %195, %196 : vector<8x128xf32>
    %198 = vector.extract_strided_slice %185 {offsets = [0, 256], sizes = [8, 128], strides = [1, 1]} : vector<8x512xf32> to vector<8x128xf32>
    %199 = math.tanh %198 : vector<8x128xf32>
    %200 = vector.extract_strided_slice %185 {offsets = [0, 384], sizes = [8, 128], strides = [1, 1]} : vector<8x512xf32> to vector<8x128xf32>
    %201 = arith.negf %200 : vector<8x128xf32>
    %202 = math.exp %201 : vector<8x128xf32>
    %cst_47 = arith.constant 1.000000e+00 : f32
    %203 = vector.broadcast %cst_47 : f32 to vector<8x128xf32>
    %204 = arith.addf %203, %202 : vector<8x128xf32>
    %205 = arith.divf %203, %204 : vector<8x128xf32>
    %206 = arith.mulf %197, %180 : vector<8x128xf32>
    %207 = arith.mulf %191, %199 : vector<8x128xf32>
    %208 = arith.addf %206, %207 : vector<8x128xf32>
    %209 = math.tanh %208 : vector<8x128xf32>
    %210 = arith.mulf %205, %209 : vector<8x128xf32>
    %211 = vector.extract_strided_slice %17 {offsets = [0, 4], sizes = [8, 1], strides = [1, 1]} : vector<8x8xi1> to vector<8x1xi1>
    %212 = vector.shape_cast %211 : vector<8x1xi1> to vector<8x1xi1>
    %213 = vector.broadcast %212 : vector<8x1xi1> to vector<8x128xi1>
    %cst_48 = arith.constant 0.000000e+00 : f32
    %214 = vector.broadcast %cst_48 : f32 to vector<8x128xf32>
    %215 = arith.select %213, %210, %214 : vector<8x128xi1>, vector<8x128xf32>
    %c0_49 = arith.constant 0 : index
    %c4 = arith.constant 4 : index
    %c0_50 = arith.constant 0 : index
    %216 = vector.load %arg8[%c0_49, %c4, %c0_50] : memref<8x8x128xf32, #tpu.memory_space<vmem>>, vector<8x1x128xf32>
    %217 = vector.shape_cast %216 : vector<8x1x128xf32> to vector<8x128xf32>
    %218 = vector.shape_cast %215 : vector<8x128xf32> to vector<8x1x128xf32>
    tpu.vector_store %arg8[%c0_49, %c4, %c0_50], %218 {strides = array<i32>} : memref<8x8x128xf32, #tpu.memory_space<vmem>>, vector<8x1x128xf32>,
    %219 = arith.select %213, %210, %179 : vector<8x128xi1>, vector<8x128xf32>
    %220 = arith.select %213, %208, %180 : vector<8x128xi1>, vector<8x128xf32>
    %221 = vector.extract_strided_slice %9 {offsets = [0, 5, 0], sizes = [8, 1, 512], strides = [1, 1, 1]} : vector<8x8x512xf32> to vector<8x1x512xf32>
    %222 = vector.shape_cast %221 : vector<8x1x512xf32> to vector<8x512xf32>
    %223 = arith.truncf %219 : vector<8x128xf32> to vector<8x128xbf16>
    %cst_51 = arith.constant dense<0.000000e+00> : vector<8x512xf32>
    %224 = tpu.matmul %223, %18, %cst_51 {dimension_numbers = #tpu.dot_dimension_numbers<[1], [0], [0], [1], [0, 0, 1, 1], [], []>} : vector<8x128xbf16>, vector<128x512xbf16>, vector<8x512xf32> -> vector<8x512xf32>
    %225 = arith.addf %222, %224 : vector<8x512xf32>
    %226 = vector.extract_strided_slice %225 {offsets = [0, 0], sizes = [8, 128], strides = [1, 1]} : vector<8x512xf32> to vector<8x128xf32>
    %227 = arith.negf %226 : vector<8x128xf32>
    %228 = math.exp %227 : vector<8x128xf32>
    %cst_52 = arith.constant 1.000000e+00 : f32
    %229 = vector.broadcast %cst_52 : f32 to vector<8x128xf32>
    %230 = arith.addf %229, %228 : vector<8x128xf32>
    %231 = arith.divf %229, %230 : vector<8x128xf32>
    %232 = vector.extract_strided_slice %225 {offsets = [0, 128], sizes = [8, 128], strides = [1, 1]} : vector<8x512xf32> to vector<8x128xf32>
    %233 = arith.negf %232 : vector<8x128xf32>
    %234 = math.exp %233 : vector<8x128xf32>
    %cst_53 = arith.constant 1.000000e+00 : f32
    %235 = vector.broadcast %cst_53 : f32 to vector<8x128xf32>
    %236 = arith.addf %235, %234 : vector<8x128xf32>
    %237 = arith.divf %235, %236 : vector<8x128xf32>
    %238 = vector.extract_strided_slice %225 {offsets = [0, 256], sizes = [8, 128], strides = [1, 1]} : vector<8x512xf32> to vector<8x128xf32>
    %239 = math.tanh %238 : vector<8x128xf32>
    %240 = vector.extract_strided_slice %225 {offsets = [0, 384], sizes = [8, 128], strides = [1, 1]} : vector<8x512xf32> to vector<8x128xf32>
    %241 = arith.negf %240 : vector<8x128xf32>
    %242 = math.exp %241 : vector<8x128xf32>
    %cst_54 = arith.constant 1.000000e+00 : f32
    %243 = vector.broadcast %cst_54 : f32 to vector<8x128xf32>
    %244 = arith.addf %243, %242 : vector<8x128xf32>
    %245 = arith.divf %243, %244 : vector<8x128xf32>
    %246 = arith.mulf %237, %220 : vector<8x128xf32>
    %247 = arith.mulf %231, %239 : vector<8x128xf32>
    %248 = arith.addf %246, %247 : vector<8x128xf32>
    %249 = math.tanh %248 : vector<8x128xf32>
    %250 = arith.mulf %245, %249 : vector<8x128xf32>
    %251 = vector.extract_strided_slice %17 {offsets = [0, 5], sizes = [8, 1], strides = [1, 1]} : vector<8x8xi1> to vector<8x1xi1>
    %252 = vector.shape_cast %251 : vector<8x1xi1> to vector<8x1xi1>
    %253 = vector.broadcast %252 : vector<8x1xi1> to vector<8x128xi1>
    %cst_55 = arith.constant 0.000000e+00 : f32
    %254 = vector.broadcast %cst_55 : f32 to vector<8x128xf32>
    %255 = arith.select %253, %250, %254 : vector<8x128xi1>, vector<8x128xf32>
    %c0_56 = arith.constant 0 : index
    %c5 = arith.constant 5 : index
    %c0_57 = arith.constant 0 : index
    %256 = vector.load %arg8[%c0_56, %c5, %c0_57] : memref<8x8x128xf32, #tpu.memory_space<vmem>>, vector<8x1x128xf32>
    %257 = vector.shape_cast %256 : vector<8x1x128xf32> to vector<8x128xf32>
    %258 = vector.shape_cast %255 : vector<8x128xf32> to vector<8x1x128xf32>
    tpu.vector_store %arg8[%c0_56, %c5, %c0_57], %258 {strides = array<i32>} : memref<8x8x128xf32, #tpu.memory_space<vmem>>, vector<8x1x128xf32>,
    %259 = arith.select %253, %250, %219 : vector<8x128xi1>, vector<8x128xf32>
    %260 = arith.select %253, %248, %220 : vector<8x128xi1>, vector<8x128xf32>
    %261 = vector.extract_strided_slice %9 {offsets = [0, 6, 0], sizes = [8, 1, 512], strides = [1, 1, 1]} : vector<8x8x512xf32> to vector<8x1x512xf32>
    %262 = vector.shape_cast %261 : vector<8x1x512xf32> to vector<8x512xf32>
    %263 = arith.truncf %259 : vector<8x128xf32> to vector<8x128xbf16>
    %cst_58 = arith.constant dense<0.000000e+00> : vector<8x512xf32>
    %264 = tpu.matmul %263, %18, %cst_58 {dimension_numbers = #tpu.dot_dimension_numbers<[1], [0], [0], [1], [0, 0, 1, 1], [], []>} : vector<8x128xbf16>, vector<128x512xbf16>, vector<8x512xf32> -> vector<8x512xf32>
    %265 = arith.addf %262, %264 : vector<8x512xf32>
    %266 = vector.extract_strided_slice %265 {offsets = [0, 0], sizes = [8, 128], strides = [1, 1]} : vector<8x512xf32> to vector<8x128xf32>
    %267 = arith.negf %266 : vector<8x128xf32>
    %268 = math.exp %267 : vector<8x128xf32>
    %cst_59 = arith.constant 1.000000e+00 : f32
    %269 = vector.broadcast %cst_59 : f32 to vector<8x128xf32>
    %270 = arith.addf %269, %268 : vector<8x128xf32>
    %271 = arith.divf %269, %270 : vector<8x128xf32>
    %272 = vector.extract_strided_slice %265 {offsets = [0, 128], sizes = [8, 128], strides = [1, 1]} : vector<8x512xf32> to vector<8x128xf32>
    %273 = arith.negf %272 : vector<8x128xf32>
    %274 = math.exp %273 : vector<8x128xf32>
    %cst_60 = arith.constant 1.000000e+00 : f32
    %275 = vector.broadcast %cst_60 : f32 to vector<8x128xf32>
    %276 = arith.addf %275, %274 : vector<8x128xf32>
    %277 = arith.divf %275, %276 : vector<8x128xf32>
    %278 = vector.extract_strided_slice %265 {offsets = [0, 256], sizes = [8, 128], strides = [1, 1]} : vector<8x512xf32> to vector<8x128xf32>
    %279 = math.tanh %278 : vector<8x128xf32>
    %280 = vector.extract_strided_slice %265 {offsets = [0, 384], sizes = [8, 128], strides = [1, 1]} : vector<8x512xf32> to vector<8x128xf32>
    %281 = arith.negf %280 : vector<8x128xf32>
    %282 = math.exp %281 : vector<8x128xf32>
    %cst_61 = arith.constant 1.000000e+00 : f32
    %283 = vector.broadcast %cst_61 : f32 to vector<8x128xf32>
    %284 = arith.addf %283, %282 : vector<8x128xf32>
    %285 = arith.divf %283, %284 : vector<8x128xf32>
    %286 = arith.mulf %277, %260 : vector<8x128xf32>
    %287 = arith.mulf %271, %279 : vector<8x128xf32>
    %288 = arith.addf %286, %287 : vector<8x128xf32>
    %289 = math.tanh %288 : vector<8x128xf32>
    %290 = arith.mulf %285, %289 : vector<8x128xf32>
    %291 = vector.extract_strided_slice %17 {offsets = [0, 6], sizes = [8, 1], strides = [1, 1]} : vector<8x8xi1> to vector<8x1xi1>
    %292 = vector.shape_cast %291 : vector<8x1xi1> to vector<8x1xi1>
    %293 = vector.broadcast %292 : vector<8x1xi1> to vector<8x128xi1>
    %cst_62 = arith.constant 0.000000e+00 : f32
    %294 = vector.broadcast %cst_62 : f32 to vector<8x128xf32>
    %295 = arith.select %293, %290, %294 : vector<8x128xi1>, vector<8x128xf32>
    %c0_63 = arith.constant 0 : index
    %c6 = arith.constant 6 : index
    %c0_64 = arith.constant 0 : index
    %296 = vector.load %arg8[%c0_63, %c6, %c0_64] : memref<8x8x128xf32, #tpu.memory_space<vmem>>, vector<8x1x128xf32>
    %297 = vector.shape_cast %296 : vector<8x1x128xf32> to vector<8x128xf32>
    %298 = vector.shape_cast %295 : vector<8x128xf32> to vector<8x1x128xf32>
    tpu.vector_store %arg8[%c0_63, %c6, %c0_64], %298 {strides = array<i32>} : memref<8x8x128xf32, #tpu.memory_space<vmem>>, vector<8x1x128xf32>,
    %299 = arith.select %293, %290, %259 : vector<8x128xi1>, vector<8x128xf32>
    %300 = arith.select %293, %288, %260 : vector<8x128xi1>, vector<8x128xf32>
    %301 = vector.extract_strided_slice %9 {offsets = [0, 7, 0], sizes = [8, 1, 512], strides = [1, 1, 1]} : vector<8x8x512xf32> to vector<8x1x512xf32>
    %302 = vector.shape_cast %301 : vector<8x1x512xf32> to vector<8x512xf32>
    %303 = arith.truncf %299 : vector<8x128xf32> to vector<8x128xbf16>
    %cst_65 = arith.constant dense<0.000000e+00> : vector<8x512xf32>
    %304 = tpu.matmul %303, %18, %cst_65 {dimension_numbers = #tpu.dot_dimension_numbers<[1], [0], [0], [1], [0, 0, 1, 1], [], []>} : vector<8x128xbf16>, vector<128x512xbf16>, vector<8x512xf32> -> vector<8x512xf32>
    %305 = arith.addf %302, %304 : vector<8x512xf32>
    %306 = vector.extract_strided_slice %305 {offsets = [0, 0], sizes = [8, 128], strides = [1, 1]} : vector<8x512xf32> to vector<8x128xf32>
    %307 = arith.negf %306 : vector<8x128xf32>
    %308 = math.exp %307 : vector<8x128xf32>
    %cst_66 = arith.constant 1.000000e+00 : f32
    %309 = vector.broadcast %cst_66 : f32 to vector<8x128xf32>
    %310 = arith.addf %309, %308 : vector<8x128xf32>
    %311 = arith.divf %309, %310 : vector<8x128xf32>
    %312 = vector.extract_strided_slice %305 {offsets = [0, 128], sizes = [8, 128], strides = [1, 1]} : vector<8x512xf32> to vector<8x128xf32>
    %313 = arith.negf %312 : vector<8x128xf32>
    %314 = math.exp %313 : vector<8x128xf32>
    %cst_67 = arith.constant 1.000000e+00 : f32
    %315 = vector.broadcast %cst_67 : f32 to vector<8x128xf32>
    %316 = arith.addf %315, %314 : vector<8x128xf32>
    %317 = arith.divf %315, %316 : vector<8x128xf32>
    %318 = vector.extract_strided_slice %305 {offsets = [0, 256], sizes = [8, 128], strides = [1, 1]} : vector<8x512xf32> to vector<8x128xf32>
    %319 = math.tanh %318 : vector<8x128xf32>
    %320 = vector.extract_strided_slice %305 {offsets = [0, 384], sizes = [8, 128], strides = [1, 1]} : vector<8x512xf32> to vector<8x128xf32>
    %321 = arith.negf %320 : vector<8x128xf32>
    %322 = math.exp %321 : vector<8x128xf32>
    %cst_68 = arith.constant 1.000000e+00 : f32
    %323 = vector.broadcast %cst_68 : f32 to vector<8x128xf32>
    %324 = arith.addf %323, %322 : vector<8x128xf32>
    %325 = arith.divf %323, %324 : vector<8x128xf32>
    %326 = arith.mulf %317, %300 : vector<8x128xf32>
    %327 = arith.mulf %311, %319 : vector<8x128xf32>
    %328 = arith.addf %326, %327 : vector<8x128xf32>
    %329 = math.tanh %328 : vector<8x128xf32>
    %330 = arith.mulf %325, %329 : vector<8x128xf32>
    %331 = vector.extract_strided_slice %17 {offsets = [0, 7], sizes = [8, 1], strides = [1, 1]} : vector<8x8xi1> to vector<8x1xi1>
    %332 = vector.shape_cast %331 : vector<8x1xi1> to vector<8x1xi1>
    %333 = vector.broadcast %332 : vector<8x1xi1> to vector<8x128xi1>
    %cst_69 = arith.constant 0.000000e+00 : f32
    %334 = vector.broadcast %cst_69 : f32 to vector<8x128xf32>
    %335 = arith.select %333, %330, %334 : vector<8x128xi1>, vector<8x128xf32>
    %c0_70 = arith.constant 0 : index
    %c7 = arith.constant 7 : index
    %c0_71 = arith.constant 0 : index
    %336 = vector.load %arg8[%c0_70, %c7, %c0_71] : memref<8x8x128xf32, #tpu.memory_space<vmem>>, vector<8x1x128xf32>
    %337 = vector.shape_cast %336 : vector<8x1x128xf32> to vector<8x128xf32>
    %338 = vector.shape_cast %335 : vector<8x128xf32> to vector<8x1x128xf32>
    tpu.vector_store %arg8[%c0_70, %c7, %c0_71], %338 {strides = array<i32>} : memref<8x8x128xf32, #tpu.memory_space<vmem>>, vector<8x1x128xf32>,
    %339 = arith.select %333, %330, %299 : vector<8x128xi1>, vector<8x128xf32>
    %340 = arith.select %333, %328, %300 : vector<8x128xi1>, vector<8x128xf32>
    %c0_72 = arith.constant 0 : index
    %c0_73 = arith.constant 0 : index
    %341 = vector.load %arg9[%c0_72, %c0_73] : memref<8x128xf32, #tpu.memory_space<vmem>>, vector<8x128xf32>
    tpu.vector_store %arg9[%c0_72, %c0_73], %339 {strides = array<i32>} : memref<8x128xf32, #tpu.memory_space<vmem>>, vector<8x128xf32>,
    %c0_74 = arith.constant 0 : index
    %c0_75 = arith.constant 0 : index
    %342 = vector.load %arg10[%c0_74, %c0_75] : memref<8x128xf32, #tpu.memory_space<vmem>>, vector<8x128xf32>
    tpu.vector_store %arg10[%c0_74, %c0_75], %340 {strides = array<i32>} : memref<8x128xf32, #tpu.memory_space<vmem>>, vector<8x128xf32>,
    return
  }
  func.func @transform_0(%arg0: i32) -> (i32, i32) {
    %c0_i32 = arith.constant 0 : i32
    %c0_i32_0 = arith.constant 0 : i32
    %c0_i32_1 = arith.constant 0 : i32
    return %c0_i32, %c0_i32_0 : i32, i32
  }
  func.func @transform_1(%arg0: i32) -> (i32, i32, i32) {
    %c0_i32 = arith.constant 0 : i32
    %c0_i32_0 = arith.constant 0 : i32
    %c0_i32_1 = arith.constant 0 : i32
    return %c0_i32, %arg0, %c0_i32_0 : i32, i32, i32
  }
  func.func @transform_2(%arg0: i32) -> (i32, i32) {
    %c0_i32 = arith.constant 0 : i32
    %c0_i32_0 = arith.constant 0 : i32
    %c0_i32_1 = arith.constant 0 : i32
    return %c0_i32, %c0_i32_0 : i32, i32
  }
  func.func @transform_3(%arg0: i32) -> (i32, i32) {
    %c0_i32 = arith.constant 0 : i32
    %c0_i32_0 = arith.constant 0 : i32
    %c0_i32_1 = arith.constant 0 : i32
    return %c0_i32, %c0_i32_0 : i32, i32
  }
  func.func @transform_4(%arg0: i32) -> (i32, i32) {
    %c0_i32 = arith.constant 0 : i32
    %c0_i32_0 = arith.constant 0 : i32
    %c0_i32_1 = arith.constant 0 : i32
    return %c0_i32, %c0_i32_0 : i32, i32
  }
  func.func @transform_5(%arg0: i32) -> (i32, i32) {
    %c0_i32 = arith.constant 0 : i32
    %c0_i32_0 = arith.constant 0 : i32
    %c0_i32_1 = arith.constant 0 : i32
    return %c0_i32, %c0_i32_0 : i32, i32
  }
  func.func @transform_6(%arg0: i32) -> (i32, i32) {
    %c0_i32 = arith.constant 0 : i32
    %c0_i32_0 = arith.constant 0 : i32
    %c0_i32_1 = arith.constant 0 : i32
    return %c0_i32, %c0_i32_0 : i32, i32
  }
  func.func @transform_7(%arg0: i32) -> (i32, i32, i32) {
    %c0_i32 = arith.constant 0 : i32
    %c0_i32_0 = arith.constant 0 : i32
    %c0_i32_1 = arith.constant 0 : i32
    return %c0_i32, %arg0, %c0_i32_0 : i32, i32, i32
  }
  func.func @transform_8(%arg0: i32) -> (i32, i32) {
    %c0_i32 = arith.constant 0 : i32
    %c0_i32_0 = arith.constant 0 : i32
    %c0_i32_1 = arith.constant 0 : i32
    return %c0_i32, %c0_i32_0 : i32, i32
  }
  func.func @transform_9(%arg0: i32) -> (i32, i32) {
    %c0_i32 = arith.constant 0 : i32
    %c0_i32_0 = arith.constant 0 : i32
    %c0_i32_1 = arith.constant 0 : i32
    return %c0_i32, %c0_i32_0 : i32, i32
  }
}

</mosaic_0001>

<bundles_post_ra>
// kernel: tpu_custom_call.1
= control target key start
LH: loop header
LB: loop body
LE: loop exit
PB: predicated region body
PF: predicated region fallthrough
CT: control target
= control target key end

     0   :  { %15 = vsyncpa [#allocation3], 0  ;;  %s9062_s0 = inlined_call_operand.vmem [shape: s32[8,1], index: 0, kind: input, shape index: {}]   ;;  %s9063_s1 = inlined_call_operand.hbm [shape: bf16[8,16,128], index: 1, kind: input, shape index: {}]   ;;  %s9064_s2 = inlined_call_operand.hbm [shape: bf16[128,512], index: 2, kind: input, shape index: {}]   ;;  %s9065_s3 = inlined_call_operand.vmem [shape: f32[1,512], index: 3, kind: input, shape index: {}]   ;;  %s9066_s4 = inlined_call_operand.hbm [shape: bf16[128,512], index: 4, kind: input, shape index: {}]   ;;  %s9067_s5 = inlined_call_operand.vmem [shape: f32[8,128], index: 5, kind: input, shape index: {}]   ;;  %s9068_s6 = inlined_call_operand.vmem [shape: f32[8,128], index: 6, kind: input, shape index: {}]   ;;  %s9069_s7 = inlined_call_operand.hbm [shape: f32[8,16,128], index: 7, kind: output, shape index: {0}]   ;;  %s9070_s8 = inlined_call_operand.hbm [shape: f32[8,128], index: 8, kind: output, shape index: {1}]   ;;  %s9071_s9 = inlined_call_operand.hbm [shape: f32[8,128], index: 9, kind: output, shape index: {2}]  }
   0x1   :  { %17 = vsyncpa [#allocation3 + $0x1], 0 }
   0x2   :  { %18 = vsyncpa [#allocation6], 0 }
   0x3   :  { %19 = vsyncpa [#allocation4], 0 }
   0x4   :  { %21 = vsyncpa [#allocation4 + $0x1], 0 }
   0x5   :  { %22 = vsyncpa [#allocation10], 0  ;;  %s7114_s30 = smov 0   ;;  %s7116_s10 = smov 0  }
   0x6   :  { %s7118_s11 = smov 0   ;;  %s7120_s12 = smov 0  }
   0x7 LB: > { %9200 = sst [smem:[#allocation16_spill]] %s7027_s30  ;;  %s7135_s13 = sadd.s32 4294967295, %s7039_s12   ;;  %s7039_s12 = sphi %s7120_s12, %s9435_s12   ;;  %s7035_s11 = sphi %s7118_s11, %s9439_s11   ;;  %s7031_s10 = sphi %s7116_s10, %s9438_s10   ;;  %s7027_s30 = sphi %s7114_s30, %s9437_s30  }
   0x8   : > { %s5186_s14 = sadd.s32 4294967294, %s7039_s12   ;;  %s7139_s15 = sadd.s32 1, %s7039_s12  }
   0x9   : > { %9201 = sst [smem:[#allocation17_spill]] %s7139_s15  ;;  %s56_s16 = sadd.s32 1, %s7035_s11 }
   0xa   : > { %s53_s17 = ssub.s32 %s7039_s12, %s7139_s15  ;;  %p63_p0 = scmp.ne.s32.totalorder %s7035_s11, %s7031_s10 }
   0xb   : > { %p54_p1 = scmp.eq.s32.totalorder %s53_s17, 0  ;;  %p64_p2 = scmp.eq.s32.totalorder %s7039_s12, 0 }
   0xc   : > { %p69_p3 = scmp.ne.s32.totalorder %s7031_s10, %s7027_s30  ;;  %p9075_p4 = scmp.eq.s32.totalorder %s7135_s13, 0 }
   0xd   : > { %s7151_s18 = scalar_select %p54_p1, %s7035_s11, %s56_s16  }
   0xe   : > { %p7153_p5 = por %p64_p2, %p63_p0  ;;  %p7159_p6 = por %p9075_p4, %p69_p3 }
   0xf   : > { %9202 = sst [smem:[#allocation18_spill]] %s7151_s18  ;;  %p9072_p7 = scmp.eq.s32.totalorder %s7135_s13, 1 }
  0x10   : > { %s9203_s19 = scalar_select %p7153_p5, 1, 0 }
  0x11   : > { %s9204_s20 = scalar_select %p7159_p6, 1, 0 }
  0x12   : > { %p204_p8 = scmp.eq.s32.totalorder %s5186_s14, 1  ;;  %p5187_p9 = scmp.ge.s32.totalorder %s7039_s12, 1 }
  0x13   : > { %p253_p10 = scmp.lt.s32.totalorder %s7039_s12, 3  ;;  %p7168_p11 = por %p9072_p7, %p63_p0 }
  0x14   : > { %p7172_p12 = por %p204_p8, %p69_p3  ;;  %s7041_s24 = smov [#allocation5]  }
  0x15   : > { %s9205_s21 = scalar_select %p7168_p11, 1, 0 }
  0x16   : > { %s9206_s22 = scalar_select %p7172_p12, 1, 0 }
  0x17   : > { %p7176_p13 = pnand %p5187_p9, %p253_p10  ;;  %s268_s25 = sshll.u32 %s7041_s24, 4  ;;  %s269_s25 = int_to_ptr.vmem [resolvable:$true] %s268_s25 }
  0x18   : > { %9207 = sst [smem:[#allocation19_spill]] %s9206_s22  ;;  %s7042_s27 = smov [#allocation7]  }
  0x19   : > { %s9208_s23 = scalar_select %p7176_p13, 1, 0 }
  0x1a   : > { %p5520_p2 = pneg %p7176_p13  ;;  %s284_s28 = sshll.u32 %s7042_s27, 4  ;;  %s285_s28 = int_to_ptr.vmem [resolvable:$true] %s284_s28 }
  0x1b   : > { %s6827_s16 = scalar_lea.hbm %s9064_s2, 4096 }
  0x1c   : > { %p7185_p0 = pnand %p5520_p2, %p9075_p4  ;;  %p6828_p9 = scmp.ne.s32.totalorder %s9064_s2, %s6827_s16 }
  0x1d   : > { %p6834_p3 = scmp.lt.u32.totalorder %s6827_s16, %s9064_s2 }
  0x1e   : > { %p6829_p10 = pneg %p7185_p0 }
  0x20   : > { %p6830_p2 = pnand %p6829_p10, %p6828_p9 }
  0x22   : > { %p6831_p7 = pneg %p6830_p2 }
  0x24   : > { %p6836_p1 = pnand %p6834_p3, %p6831_p7 }
  0x26   : > { %6839 = shalt.err (!%p6836_p1)
}
  0x27   : > { %s6840_s27 = scalar_lea.vmem %s269_s25, 4096  ;;  %p6848_p11 = scmp.lt.s32.totalorder %s269_s25, %s269_s25 }
  0x28   : > { %p6841_p4 = scmp.ne.s32.totalorder %s269_s25, %s6840_s27  ;;  %p6849_p6 = scmp.lt.s32.totalorder %s6840_s27, %s6840_s27 }
  0x2a   : > { %p6843_p8 = pnand %p6841_p4, %p6829_p10  ;;  %p6850_p13 = por %p6849_p6, %p6848_p11 }
  0x2c   : > { %p6844_p12 = pneg %p6843_p8 }
  0x2e   : > { %p6851_p5 = pnand %p6850_p13, %p6844_p12 }
  0x30   : > { %6854 = shalt.err (!%p6851_p5)
}
  0x31   : > { %s7043_s18 = smov 256   ;;  %s7044_s15 = smov 16  }
  0x32   : > { %5523 = dma.hbm_to_vmem [thread:$0]  (!%p7185_p0), %s9064_s2, 4096, %s269_s25, [#allocation6], %s7043_s18, %s7043_s18, %s7044_s15  }
  0x33   : > { %p9210_p7 = scmp.ne.s32.totalorder %s9203_s19, 0  ;;  %p9211_p1 = scmp.lt.s32.totalorder %s7039_s12, 2 }
  0x34   : > { %s6855_s27 = scalar_lea.hbm %s9066_s4, 4096 }
  0x35   : > { %p7217_p4 = pnand %p9211_p1, %p9210_p7  ;;  %p6856_p5 = scmp.ne.s32.totalorder %s9066_s4, %s6855_s27 }
  0x36   : > { %p6862_p12 = scmp.lt.u32.totalorder %s6855_s27, %s9066_s4 }
  0x37   : > { %s9212_s16 = scalar_select %p7217_p4, 1, 0 }
  0x38   : > { %p6858_p6 = pnand %p6856_p5, %p6829_p10 }
  0x3a   : > { %p6859_p11 = pneg %p6858_p6 }
  0x3c   : > { %p6864_p13 = pnand %p6862_p12, %p6859_p11 }
  0x3e   : > { %6867 = shalt.err (!%p6864_p13)
}
  0x3f   : > { %s6868_s29 = scalar_lea.vmem %s285_s28, 4096  ;;  %p6876_p2 = scmp.lt.s32.totalorder %s285_s28, %s285_s28 }
  0x40   : > { %p6869_p3 = scmp.ne.s32.totalorder %s285_s28, %s6868_s29  ;;  %p6877_p7 = scmp.lt.s32.totalorder %s6868_s29, %s6868_s29 }
  0x42   : > { %p6871_p8 = pnand %p6869_p3, %p6829_p10  ;;  %p6878_p1 = por %p6877_p7, %p6876_p2 }
  0x44   : > { %p6872_p9 = pneg %p6871_p8 }
  0x46   : > { %p6879_p4 = pnand %p6878_p1, %p6872_p9 }
  0x48   : > { %6882 = shalt.err (!%p6879_p4)
}
  0x49   : > { %5526 = dma.hbm_to_vmem [thread:$0]  (!%p7185_p0), %s9066_s4, 4096, %s285_s28, [#allocation6], %s7043_s18, %s7043_s18, %s7044_s15  }
  0x4a   : > { %s304_s14 = sand.u32 1, %s7035_s11   ;;  %s5192_s24 = sshll.u32 %s7039_s12, 6 }
  0x4b   : > { %s5191_s17 = sshll.u32 %s304_s14, 5  ;;  %s7246_s19 = scalar_lea.hbm %s9063_s1, %s5192_s24 }
  0x4c   : > { %s308_s26 = scalar_lea.vmem [#allocation2], %s5191_s17  ;;  %s7250_s30 = scalar_lea.sflag [#allocation3], %s304_s14 }
  0x4d   : > { %s314_s29 = sshll.u32 %s308_s26, 4  ;;  %s6883_s22 = scalar_lea.hbm %s7246_s19, 512  ;;  %s7248_s29 = int_to_ptr.vmem [resolvable:$true] %s314_s29 }
  0x4e   : > { %p6884_p0 = scmp.ne.s32.totalorder %s7246_s19, %s6883_s22  ;;  %p9213_p10 = scmp.ne.s32.totalorder %s9212_s16, 0 }
  0x4f   : > { %s6888_s15 = scalar_lea.hbm %s9063_s1, 1024  ;;  %p6889_p11 = scmp.lt.u32.totalorder %s7246_s19, %s9063_s1 }
  0x50   : > { %p6885_p4 = pneg %p9213_p10  ;;  %p6890_p12 = scmp.lt.u32.totalorder %s6888_s15, %s6883_s22 }
  0x51   : > { %p6892_p3 = scmp.lt.u32.totalorder %s6883_s22, %s7246_s19 }
  0x52   : > { %p6886_p5 = pnand %p6885_p4, %p6884_p0  ;;  %p6891_p13 = por %p6890_p12, %p6889_p11 }
  0x54   : > { %p6887_p6 = pneg %p6886_p5  ;;  %p6893_p8 = por %p6892_p3, %p6891_p13 }
  0x56   : > { %p6894_p9 = pnand %p6893_p8, %p6887_p6 }
  0x58   : > { %6897 = shalt.err (!%p6894_p9)
}
  0x59   : > { %s6898_s14 = scalar_lea.vmem %s7248_s29, 512  ;;  %s7045_s17 = smov [#allocation2]  }
  0x5a   : > { %p6899_p2 = scmp.ne.s32.totalorder %s7248_s29, %s6898_s14  ;;  %s6903_s25 = sshll.u32 %s7045_s17, 4  ;;  %s6904_s25 = int_to_ptr.vmem [resolvable:$false] %s6903_s25 }
  0x5b   : > { %s6905_s26 = scalar_lea.vmem %s6904_s25, 1024  ;;  %p6906_p0 = scmp.lt.s32.totalorder %s7248_s29, %s6904_s25 }
  0x5c   : > { %p6901_p7 = pnand %p6899_p2, %p6885_p4  ;;  %p6907_p5 = scmp.lt.s32.totalorder %s6905_s26, %s6898_s14 }
  0x5e   : > { %p6902_p1 = pneg %p6901_p7  ;;  %p6908_p11 = por %p6907_p5, %p6906_p0 }
  0x60   : > { %p6909_p12 = pnand %p6908_p11, %p6902_p1 }
  0x62   : > { %6912 = shalt.err (!%p6909_p12)
}
  0x63   : > { %s7046_s22 = smov 128   ;;  %s7047_s28 = smov 64  }
  0x64   : > { %s7048_s18 = smov 4   ;;  %p9214_p4 = scmp.ne.s32.totalorder %s9208_s23, 0 }
  0x65   : > { %5530 = dma.hbm_to_vmem [thread:$0]  (!%p9213_p10), %s7246_s19, 512, %s7248_s29, %s7250_s30, %s7046_s22, %s7047_s28, %s7048_s18  }
  0x66   : > { %326 = sbr.rel (%p9214_p4) target bundleno = 2648 (0xa58), region = 48 }
  0x6d   : > { %s7281_s15 = sand.u32 1, %s7031_s10   ;;  %p9215_p6 = scmp.ne.s32.totalorder %s9204_s20, 0 }
  0x6e   : > { %s5194_s24 = sshll.u32 %s7281_s15, 5  ;;  %s329_s27 = scalar_lea.sflag [#allocation3], %s7281_s15 }
  0x6f   : > { %s7285_s14 = scalar_lea.vmem [#allocation2], %s5194_s24 }
  0x70   : > { %7010 = dma.done.wait (%p9215_p6), %s329_s27, 512  }
  0x71   : > { %7012 = vsyncadd (%p9215_p6), %s329_s27, 4294966784  ;;  %p9216_p10 = scmp.eq.s32.totalorder %s7135_s13, 0 }
  0x73   : > { %7014 = dma.done.wait (%p9216_p10), [#allocation6], 8192   ;;  %p9217_p13 = pmov %p9216_p10 }
  0x74   : > { %s5197_s23 = sshll.u32 %s7281_s15, 6  ;;  %p9218_p3 = scmp.ne.s32.totalorder %s7135_s13, 0 }
  0x75   : > { %7016 = vsyncadd (%p9217_p13), [#allocation6], 4294959104  ;;  %s7296_s16 = scalar_lea.vmem [#allocation8], %s5197_s23  ;;  %v380_v0 = vld [vmem:[%s9067_s5] sm:$0xff] (!%p9218_p3) }
  0x76   : > { %379 = sbr.rel (%p9218_p3) target bundleno = 125 (0x7d), region = 64  ;;  %v382_v1 = vld [vmem:[%s9068_s6] sm:$0xff] (!%p9218_p3)  ;;  %381 = vst [vmem:[#allocation9] sm:$0xff] (!%p9218_p3), %v380_v0 }
  0x77   : > { %383 = vst [vmem:[#allocation11] sm:$0xff] (!%p9218_p3), %v382_v1 }
  0x7d PF: > { %v776_v2 = vld [vmem:[%s9062_s0] sm:$0xff]  ;;  %v9082_v3 = vmov 0   ;;  %v5607_v4 = vld [vmem:[#allocation5 + $0x4] ss:$16 sps:$4 sm:$0xff]   ;;  %v5611_v6 = vld [vmem:[#allocation5] ss:$16 sps:$4 sm:$0xff]  }
  0x7e   : > { %5598 = vset.pattern.permute.xlu0 %v9082_v3  ;;  %662 = vmatprep.mubr.bf16.mxu0 %v9082_v3  ;;  %v5609_v5 = vld [vmem:[#allocation5 + $0xc] ss:$16 sps:$4 sm:$0xff]   ;;  %v5612_v7 = vld [vmem:[#allocation5 + $0x8] ss:$16 sps:$4 sm:$0xff]   ;;  %v5613_v8 = vld [vmem:[#allocation5 + $0x24] ss:$16 sps:$4 sm:$0xff]  }
  0x7f   : > { %783 = vperm.xlu0 %5598, %v776_v2   ;;  %735 = vmatprep.mubr.bf16.mxu1 %v9082_v3  ;;  %v5615_v9 = vld [vmem:[#allocation5 + $0x2c] ss:$16 sps:$4 sm:$0xff]   ;;  %v5617_v10 = vld [vmem:[#allocation5 + $0x20] ss:$16 sps:$4 sm:$0xff]   ;;  %v5618_v11 = vld [vmem:[#allocation5 + $0x28] ss:$16 sps:$4 sm:$0xff]  }
  0x80   : > { %630 = vmatprep.subr.bf16.mxu0 %v5607_v4  ;;  %703 = vmatprep.subr.bf16.mxu1 %v5609_v5  ;;  %v5619_v12 = vld [vmem:[#allocation5 + $0x44] ss:$16 sps:$4 sm:$0xff]   ;;  %v7050_v13 = vmov 1   ;;  %v5621_v14 = vld [vmem:[#allocation5 + $0x4c] ss:$16 sps:$4 sm:$0xff]   ;;  %s5235_s26 = sshll.u32 %s7135_s13, 3 }
  0x81   : > { %631 = vmatpush1.bf16.msra.mxu0 %v5611_v6  ;;  %704 = vmatpush1.bf16.msra.mxu1 %v5612_v7  ;;  %v5623_v15 = vld [vmem:[#allocation5 + $0x40] ss:$16 sps:$4 sm:$0xff]   ;;  %v5624_v16 = vld [vmem:[#allocation5 + $0x48] ss:$16 sps:$4 sm:$0xff]   ;;  %v5625_v17 = vld [vmem:[#allocation5 + $0x64] ss:$16 sps:$4 sm:$0xff]  }
  0x82   : > { %632 = vmatprep.subr.bf16.mxu0 %v5613_v8  ;;  %705 = vmatprep.subr.bf16.mxu1 %v5615_v9  ;;  %v5627_v18 = vld [vmem:[#allocation5 + $0x6c] ss:$16 sps:$4 sm:$0xff]   ;;  %v5629_v19 = vld [vmem:[#allocation5 + $0x60] ss:$16 sps:$4 sm:$0xff]   ;;  %v5630_v20 = vld [vmem:[#allocation5 + $0x68] ss:$16 sps:$4 sm:$0xff]  }
  0x83   : > { %5599 = vset.pattern.permute.xlu1 %v7050_v13  ;;  %v5631_v21 = vld [vmem:[#allocation5 + $0x84] ss:$16 sps:$4 sm:$0xff]   ;;  %v5633_v22 = vld [vmem:[#allocation5 + $0x8c] ss:$16 sps:$4 sm:$0xff]   ;;  %v5635_v23 = vld [vmem:[#allocation5 + $0x80] ss:$16 sps:$4 sm:$0xff]  }
  0x84   : > { %v5636_v24 = vld [vmem:[#allocation5 + $0x88] ss:$16 sps:$4 sm:$0xff]   ;;  %v5637_v25 = vld [vmem:[#allocation5 + $0xa4] ss:$16 sps:$4 sm:$0xff]   ;;  %v5639_v26 = vld [vmem:[#allocation5 + $0xac] ss:$16 sps:$4 sm:$0xff]  }
  0x85   : > { %633 = vmatpush1.bf16.msra.mxu0 %v5617_v10  ;;  %706 = vmatpush1.bf16.msra.mxu1 %v5618_v11  ;;  %v5641_v27 = vld [vmem:[#allocation5 + $0xa0] ss:$16 sps:$4 sm:$0xff]   ;;  %v5642_v28 = vld [vmem:[#allocation5 + $0xa8] ss:$16 sps:$4 sm:$0xff]   ;;  %v5643_v29 = vld [vmem:[#allocation5 + $0xc4] ss:$16 sps:$4 sm:$0xff]  }
  0x86   : > { %634 = vmatprep.subr.bf16.mxu0 %v5619_v12  ;;  %707 = vmatprep.subr.bf16.mxu1 %v5621_v14  ;;  %v5645_v30 = vld [vmem:[#allocation5 + $0xcc] ss:$16 sps:$4 sm:$0xff]   ;;  %v5647_v31 = vld [vmem:[#allocation5 + $0xc0] ss:$16 sps:$4 sm:$0xff]   ;;  %v5648_v32 = vld [vmem:[#allocation5 + $0xc8] ss:$16 sps:$4 sm:$0xff]   ;;  %v426_v12 = vlaneseq  ;;  %v780_v14 = vstv %s5235_s26 }
  0x87   : > { %v5649_v33 = vld [vmem:[#allocation5 + $0xe4] ss:$16 sps:$4 sm:$0xff]   ;;  %v5651_v34 = vld [vmem:[#allocation5 + $0xec] ss:$16 sps:$4 sm:$0xff]   ;;  %v5653_v35 = vld [vmem:[#allocation5 + $0xe0] ss:$16 sps:$4 sm:$0xff]  }
  0x88   : > { %v5654_v36 = vld [vmem:[#allocation5 + $0xe8] ss:$16 sps:$4 sm:$0xff]   ;;  %v7312_v37 = vld [vmem:[#allocation7 + $0x4] ss:$16 sps:$4 sm:$0xff]   ;;  %v7314_v38 = vld [vmem:[#allocation7 + $0xc] ss:$16 sps:$4 sm:$0xff]  }
  0x89   : > { %635 = vmatpush1.bf16.msra.mxu0 %v5623_v15  ;;  %708 = vmatpush1.bf16.msra.mxu1 %v5624_v16  ;;  %v5655_v39 = vld [vmem:[%s7285_s14] sm:$0xff]   ;;  %v7320_v41 = vld [vmem:[#allocation7 + $0x8] ss:$16 sps:$4 sm:$0xff]   ;;  %v7325_v43 = vld [vmem:[#allocation7 + $0x2c] ss:$16 sps:$4 sm:$0xff]   ;;  %v779_v13 = vand.u32 127, %v426_v12 }
  0x8a   : > { %636 = vmatprep.subr.bf16.mxu0 %v5625_v17  ;;  %709 = vmatprep.subr.bf16.mxu1 %v5627_v18  ;;  %v7317_v40 = vld [vmem:[#allocation7] ss:$16 sps:$4 sm:$0xff]   ;;  %v7322_v42 = vld [vmem:[#allocation7 + $0x24] ss:$16 sps:$4 sm:$0xff]   ;;  %v7332_v45 = vld [vmem:[#allocation7 + $0x28] ss:$16 sps:$4 sm:$0xff]  }
  0x8b   : > { %v7328_v44 = vld [vmem:[#allocation7 + $0x20] ss:$16 sps:$4 sm:$0xff]   ;;  %v7334_v46 = vld [vmem:[#allocation7 + $0x44] ss:$16 sps:$4 sm:$0xff]   ;;  %v7338_v47 = vld [vmem:[#allocation7 + $0x4c] ss:$16 sps:$4 sm:$0xff]   ;;  %v781_v15 = vadd.s32 %v780_v14, %v779_v13 }
  0x8c   : > { %v5668_v48 = vld [vmem:[%s7285_s14 + $0x8] sm:$0xff]   ;;  %v7343_v49 = vld [vmem:[#allocation7 + $0x40] ss:$16 sps:$4 sm:$0xff]   ;;  %v7349_v51 = vld [vmem:[#allocation7 + $0x64] ss:$16 sps:$4 sm:$0xff]   ;;  %v7051_v18 = vmov 2  }
  0x8d   : > { %637 = vmatpush1.bf16.msra.mxu0 %v5629_v19  ;;  %710 = vmatpush1.bf16.msra.mxu1 %v5630_v20  ;;  %v7345_v50 = vld [vmem:[#allocation7 + $0x48] ss:$16 sps:$4 sm:$0xff]   ;;  %v7352_v52 = vld [vmem:[#allocation7 + $0x6c] ss:$16 sps:$4 sm:$0xff]   ;;  %v7354_v53 = vld [vmem:[#allocation7 + $0x60] ss:$16 sps:$4 sm:$0xff]  }
  0x8e   : > { %638 = vmatprep.subr.bf16.mxu0 %v5631_v21  ;;  %711 = vmatprep.subr.bf16.mxu1 %v5633_v22  ;;  %v7357_v54 = vld [vmem:[#allocation7 + $0x68] ss:$16 sps:$4 sm:$0xff]   ;;  %v7361_v55 = vld [vmem:[#allocation7 + $0x84] ss:$16 sps:$4 sm:$0xff]   ;;  %v7365_v56 = vld [vmem:[#allocation7 + $0x8c] ss:$16 sps:$4 sm:$0xff]  }
  0x8f   : > { %v5681_v57 = vld [vmem:[%s7285_s14 + $0x10] sm:$0xff]   ;;  %v5687_v59 = vld [vmem:[#allocation7 + $0x88] ss:$16 sps:$4 sm:$0xff]   ;;  %v5690_v61 = vld [vmem:[#allocation7 + $0xac] ss:$16 sps:$4 sm:$0xff]   ;;  %v7052_v19 = vmov 3  }
  0x90   : > { %v7370_v58 = vld [vmem:[#allocation7 + $0x80] ss:$16 sps:$4 sm:$0xff]   ;;  %v5688_v60 = vld [vmem:[#allocation7 + $0xa4] ss:$16 sps:$4 sm:$0xff]   ;;  %v5693_v63 = vld [vmem:[#allocation7 + $0xa8] ss:$16 sps:$4 sm:$0xff]  }
  0x91   : > { %639 = vmatpush1.bf16.msra.mxu0 %v5635_v23  ;;  %712 = vmatpush1.bf16.msra.mxu1 %v5636_v24  ;;  %v5692_v62 = vld [vmem:[#allocation7 + $0xa0] ss:$16 sps:$4 sm:$0xff]   ;;  %v5695_v0 = vld [vmem:[#allocation7 + $0xc4] ss:$16 sps:$4 sm:$0xff]   ;;  %v5697_v1 = vld [vmem:[#allocation7 + $0xcc] ss:$16 sps:$4 sm:$0xff]  }
  0x92   : > { %640 = vmatprep.subr.bf16.mxu0 %v5637_v25  ;;  %713 = vmatprep.subr.bf16.mxu1 %v5639_v26  ;;  %v5694_v2 = vld [vmem:[%s7285_s14 + $0x18] sm:$0xff]   ;;  %v5699_v4 = vld [vmem:[#allocation7 + $0xc0] ss:$16 sps:$4 sm:$0xff]   ;;  %v5701_v6 = vld [vmem:[#allocation7 + $0xe4] ss:$16 sps:$4 sm:$0xff]   ;;  %v7053_v20 = vmov 4  }
  0x93   : > { %v5700_v5 = vld [vmem:[#allocation7 + $0xc8] ss:$16 sps:$4 sm:$0xff]   ;;  %v5703_v7 = vld [vmem:[#allocation7 + $0xec] ss:$16 sps:$4 sm:$0xff]   ;;  %v5705_v8 = vld [vmem:[#allocation7 + $0xe0] ss:$16 sps:$4 sm:$0xff]  }
  0x94   : > { %v7379_v9 = vld [vmem:[#allocation9] sm:$0xff]  ;;  %v5706_v10 = vld [vmem:[#allocation7 + $0xe8] ss:$16 sps:$4 sm:$0xff]   ;;  %v7054_v21 = vmov 6   ;;  %v7055_v22 = vmov 5   ;;  %v7056_v23 = vmov 7  }
  0x95   : > { %641 = vmatpush1.bf16.msra.mxu0 %v5641_v27  ;;  %714 = vmatpush1.bf16.msra.mxu1 %v5642_v28  ;;  %v820_v11 = vpack.c.bf16 %v7379_v9, %v7379_v9  ;;  %v7410_v24 = vshrl.u32 %v426_v12, 7  ;;  %v424_v26 = vld [vmem:[%s9065_s3] sm:$0xf]  ;;  %vm1381_vm1 = vcmask 1041409   ;;  %vm1384_vm2 = vcmask 1042434   ;;  %s7058_s18 = smov [#allocation9]  }
  0x96   : > { %642 = vmatprep.subr.bf16.mxu0 %v5643_v29  ;;  %715 = vmatprep.subr.bf16.mxu1 %v5645_v30  ;;  %vm1387_vm3 = vcmask 1043459   ;;  %vm1390_vm4 = vcmask 1044484   ;;  %vm1393_vm5 = vcmask 1045509   ;;  %vm1396_vm6 = vcmask 1046534   ;;  %s5065_s24 = sshll.u32 %s7058_s18, 4  ;;  %s7059_s27 = smov [#allocation11]   ;;  %s5066_s24 = int_to_ptr.vmem [resolvable:$true] %s5065_s24 }
  0x97   : > { %v428_v25 = vsub.s32 0, %v7410_v24  ;;  %v432_v27 = vsub.s32 1, %v7410_v24  ;;  %v436_v28 = vsub.s32 2, %v7410_v24  ;;  %v440_v29 = vsub.s32 3, %v7410_v24  ;;  %s5076_s14 = sshll.u32 %s7059_s27, 4  ;;  %s6913_s23 = scalar_lea.vmem %s5066_s24, 128  ;;  %s8950_s14 = int_to_ptr.vmem [resolvable:$true] %s5076_s14 }
  0x98   : > { %vm1399_vm7 = vcmask 1047559   ;;  %p6914_p8 = scmp.ne.s32.totalorder %s5066_s24, %s6913_s23  ;;  %p9422_p9 = scmp.eq.s32.totalorder %s7135_s13, 1 }
  0x99   : > { %643 = vmatpush1.bf16.msra.mxu0 %v5647_v31  ;;  %716 = vmatpush1.bf16.msra.mxu1 %v5648_v32  ;;  %v429_v30 = vrot.slane %v424_v26, %v428_v25  ;;  %v7419_v31 = vrot.slane %v424_v26, %v432_v27  ;;  %v7421_v32 = vrot.slane %v424_v26, %v436_v28  ;;  %p6920_p1 = scmp.lt.s32.totalorder %s5066_s24, %s5066_s24  ;;  %p6921_p0 = scmp.lt.s32.totalorder %s6913_s23, %s6913_s23 }
  0x9a   : > { %644 = vmatprep.subr.bf16.mxu0 %v5649_v33  ;;  %717 = vmatprep.subr.bf16.mxu1 %v5651_v34  ;;  %v7423_v33 = vrot.slane %v424_v26, %v440_v29  ;;  %p6915_p2 = pnand %p6914_p8, %p9422_p9 }
  0x9b   : > { %p6922_p5 = por %p6921_p0, %p6920_p1 }
  0x9c   : > { %p6916_p7 = pneg %p6915_p2 }
  0x9d   : > { %645 = vmatpush1.bf16.msra.mxu0 %v5653_v35  ;;  %718 = vmatpush1.bf16.msra.mxu1 %v5654_v36 }
  0x9e   : > { %981 = vmatprep.subr.bf16.mxu0 %v7312_v37  ;;  %1022 = vmatprep.subr.bf16.mxu1 %v7314_v38  ;;  %p6923_p11 = pnand %p6922_p5, %p6916_p7 }
  0xa0   : > { %663 = vmatmul.mubr.bf16.vlgmr.msra.gmra.mrb[0].mxu0 %v5655_v39  ;;  %736 = vmatmul.mubr.bf16.vlgmr.msra.gmra.mrb[0].mxu1 %v5655_v39 }
  0xa1   : > { %982 = vmatpush1.bf16.msra.mxu0 %v7317_v40  ;;  %1023 = vmatpush1.bf16.msra.mxu1 %v7320_v41 }
  0xa2   : > { %983 = vmatprep.subr.bf16.mxu0 %v7322_v42  ;;  %1024 = vmatprep.subr.bf16.mxu1 %v7325_v43 }
  0xa3   : > { %672 = vmatprep.mubr.bf16.mxu0 %v9082_v3  ;;  %745 = vmatprep.mubr.bf16.mxu1 %v9082_v3 }
  0xa5   : > { %984 = vmatpush1.bf16.msra.mxu0 %v7328_v44  ;;  %1025 = vmatpush1.bf16.msra.mxu1 %v7332_v45 }
  0xa6   : > { %985 = vmatprep.subr.bf16.mxu0 %v7334_v46  ;;  %1026 = vmatprep.subr.bf16.mxu1 %v7338_v47 }
  0xa8   : > { %673 = vmatmul.mubr.bf16.gmra.mrb[4].mxu0 %v5668_v48  ;;  %746 = vmatmul.mubr.bf16.gmra.mrb[4].mxu1 %v5668_v48 }
  0xa9   : > { %986 = vmatpush1.bf16.msra.mxu0 %v7343_v49  ;;  %1027 = vmatpush1.bf16.msra.mxu1 %v7345_v50 }
  0xaa   : > { %987 = vmatprep.subr.bf16.mxu0 %v7349_v51  ;;  %1028 = vmatprep.subr.bf16.mxu1 %v7352_v52 }
  0xab   : > { %682 = vmatprep.mubr.bf16.mxu0 %v9082_v3  ;;  %755 = vmatprep.mubr.bf16.mxu1 %v9082_v3 }
  0xad   : > { %988 = vmatpush1.bf16.msra.mxu0 %v7354_v53  ;;  %1029 = vmatpush1.bf16.msra.mxu1 %v7357_v54 }
  0xae   : > { %989 = vmatprep.subr.bf16.mxu0 %v7361_v55  ;;  %1030 = vmatprep.subr.bf16.mxu1 %v7365_v56 }
  0xb0   : > { %683 = vmatmul.mubr.bf16.gmra.mrb[8].mxu0 %v5681_v57  ;;  %756 = vmatmul.mubr.bf16.gmra.mrb[8].mxu1 %v5681_v57 }
  0xb1   : > { %990 = vmatpush1.bf16.msra.mxu0 %v7370_v58  ;;  %1031 = vmatpush1.bf16.msra.mxu1 %v5687_v59 }
  0xb2   : > { %991 = vmatprep.subr.bf16.mxu0 %v5688_v60  ;;  %1032 = vmatprep.subr.bf16.mxu1 %v5690_v61 }
  0xb3   : > { %692 = vmatprep.mubr.bf16.mxu0 %v9082_v3  ;;  %765 = vmatprep.mubr.bf16.mxu1 %v9082_v3 }
  0xb5   : > { %992 = vmatpush1.bf16.msra.mxu0 %v5692_v62  ;;  %1033 = vmatpush1.bf16.msra.mxu1 %v5693_v63 }
  0xb6   : > { %993 = vmatprep.subr.bf16.mxu0 %v5695_v0  ;;  %1034 = vmatprep.subr.bf16.mxu1 %v5697_v1 }
  0xb8   : > { %693 = vmatmul.mubr.bf16.gmra.mrb[12].mxu0 %v5694_v2  ;;  %766 = vmatmul.mubr.bf16.gmra.mrb[12].mxu1 %v5694_v2 }
  0xb9   : > { %994 = vmatpush1.bf16.msra.mxu0 %v5699_v4  ;;  %1035 = vmatpush1.bf16.msra.mxu1 %v5700_v5 }
  0xba   : > { %995 = vmatprep.subr.bf16.mxu0 %v5701_v6  ;;  %1036 = vmatprep.subr.bf16.mxu1 %v5703_v7 }
  0xbb   : > { %1013 = vmatprep.mubr.bf16.mxu0 %v9082_v3  ;;  %1054 = vmatprep.mubr.bf16.mxu1 %v9082_v3 }
  0xbd   : > { %996 = vmatpush1.bf16.msra.mxu0 %v5705_v8  ;;  %1037 = vmatpush1.bf16.msra.mxu1 %v5706_v10 }
  0xbe   : > { %1495 = vmatprep.subr.bf16.mxu0 %v7312_v37  ;;  %1536 = vmatprep.subr.bf16.mxu1 %v7314_v38 }
  0xc0   : > { %1014 = vmatmul.mubr.bf16.vlgmr.msra.gmra.mrb[16].mxu0 %v820_v11  ;;  %1055 = vmatmul.mubr.bf16.vlgmr.msra.gmra.mrb[16].mxu1 %v820_v11 }
  0xc1   : > { %1496 = vmatpush1.bf16.msra.mxu0 %v7317_v40  ;;  %1537 = vmatpush1.bf16.msra.mxu1 %v7320_v41 }
  0xc2   : > { %1497 = vmatprep.subr.bf16.mxu0 %v7322_v42  ;;  %1538 = vmatprep.subr.bf16.mxu1 %v7325_v43 }
  0xc3   : > { %1527 = vmatprep.mubr.bf16.mxu0 %v9082_v3  ;;  %1568 = vmatprep.mubr.bf16.mxu1 %v9082_v3 }
  0xc5   : > { %1498 = vmatpush1.bf16.msra.mxu0 %v7328_v44  ;;  %1539 = vmatpush1.bf16.msra.mxu1 %v7332_v45 }
  0xc6   : > { %1499 = vmatprep.subr.bf16.mxu0 %v7334_v46  ;;  %1540 = vmatprep.subr.bf16.mxu1 %v7338_v47 }
  0xc9   : > { %1500 = vmatpush1.bf16.msra.mxu0 %v7343_v49  ;;  %1541 = vmatpush1.bf16.msra.mxu1 %v7345_v50 }
  0xca   : > { %1501 = vmatprep.subr.bf16.mxu0 %v7349_v51  ;;  %1542 = vmatprep.subr.bf16.mxu1 %v7352_v52 }
  0xcd   : > { %1502 = vmatpush1.bf16.msra.mxu0 %v7354_v53  ;;  %1543 = vmatpush1.bf16.msra.mxu1 %v7357_v54 }
  0xce   : > { %1503 = vmatprep.subr.bf16.mxu0 %v7361_v55  ;;  %1544 = vmatprep.subr.bf16.mxu1 %v7365_v56 }
  0xd1   : > { %1504 = vmatpush1.bf16.msra.mxu0 %v7370_v58  ;;  %1545 = vmatpush1.bf16.msra.mxu1 %v5687_v59 }
  0xd2   : > { %1505 = vmatprep.subr.bf16.mxu0 %v5688_v60  ;;  %1546 = vmatprep.subr.bf16.mxu1 %v5690_v61 }
  0xd5   : > { %1506 = vmatpush1.bf16.msra.mxu0 %v5692_v62  ;;  %1547 = vmatpush1.bf16.msra.mxu1 %v5693_v63 }
  0xd6   : > { %1507 = vmatprep.subr.bf16.mxu0 %v5695_v0  ;;  %1548 = vmatprep.subr.bf16.mxu1 %v5697_v1 }
  0xd9   : > { %1508 = vmatpush1.bf16.msra.mxu0 %v5699_v4  ;;  %1549 = vmatpush1.bf16.msra.mxu1 %v5700_v5 }
  0xda   : > { %1509 = vmatprep.subr.bf16.mxu0 %v5701_v6  ;;  %1550 = vmatprep.subr.bf16.mxu1 %v5703_v7 }
  0xdd   : > { %1510 = vmatpush1.bf16.msra.mxu0 %v5705_v8  ;;  %1551 = vmatpush1.bf16.msra.mxu1 %v5706_v10 }
  0xde   : > { %2001 = vmatprep.subr.bf16.mxu0 %v7312_v37  ;;  %2042 = vmatprep.subr.bf16.mxu1 %v7314_v38 }
  0xfe   : > { %v784_v16 = vpop.permute.xlu0 %783 }
  0xff   : > { %vm785_vm0 = vcmp.gt.s32.totalorder %v784_v16, %v781_v15 }
 0x100   : > { %v1367_v17 = vsel %vm785_vm0, 1, %v9082_v3 }
 0x101   : > { %1369 = vperm.xlu0 %5598, %v1367_v17   ;;  %1882 = vperm.xlu1 %5599, %v1367_v17  }
 0x105   : > { %5600 = vset.pattern.permute.xlu1 %v7051_v18  ;;  %5601 = vset.pattern.permute.xlu0 %v7052_v19 }
 0x106   : > { %2388 = vperm.xlu1 %5600, %v1367_v17   ;;  %2894 = vperm.xlu0 %5601, %v1367_v17  }
 0x10a   : > { %5602 = vset.pattern.permute.xlu1 %v7053_v20  ;;  %5604 = vset.pattern.permute.xlu0 %v7054_v21 }
 0x10b   : > { %3400 = vperm.xlu1 %5602, %v1367_v17   ;;  %4412 = vperm.xlu0 %5604, %v1367_v17  }
 0x10f   : > { %5603 = vset.pattern.permute.xlu1 %v7055_v22  ;;  %5606 = vset.pattern.permute.xlu0 %v7056_v23 }
 0x110   : > { %3906 = vperm.xlu1 %5603, %v1367_v17  }
 0x114   : > { %5605 = vset.pattern.permute.xlu1 %v7056_v23 }
 0x115   : > { %4918 = vperm.xlu1 %5605, %v1367_v17  }
 0x173   : > { %v664_v34 = vpop.f32.mrb[0].mxu0  ;;  %v737_v37 = vpop.f32.mrb[0].mxu1 }
 0x174   : > { %v7425_v35 = vadd.f32 %v664_v34, %v429_v30  ;;  %v666_v36 = vpop.f32.mrb[1].mxu0  ;;  %v7431_v40 = vadd.f32 %v737_v37, %v7421_v32  ;;  %v739_v41 = vpop.f32.mrb[1].mxu1 }
 0x175   : > { %v7428_v38 = vadd.f32 %v666_v36, %v7419_v31  ;;  %v668_v39 = vpop.f32.mrb[2].mxu0  ;;  %v7436_v44 = vadd.f32 %v739_v41, %v7423_v33  ;;  %v741_v45 = vpop.f32.mrb[2].mxu1 }
 0x176   : > { %v7433_v42 = vadd.f32 %v668_v39, %v429_v30  ;;  %v670_v43 = vpop.f32.mrb[3].mxu0  ;;  %v7442_v47 = vadd.f32 %v741_v45, %v7421_v32  ;;  %v743_v48 = vpop.f32.mrb[3].mxu1 }
 0x177   : > { %9219 = vst [vmem:[#allocation20_spill] sm:$0xff] %v7428_v38  ;;  %9220 = vst [vmem:[#allocation21_spill] sm:$0xff] %v7436_v44  ;;  %v7439_v46 = vadd.f32 %v670_v43, %v7419_v31  ;;  %v7445_v49 = vadd.f32 %v743_v48, %v7423_v33 }
 0x179   : > { %9221 = vst [vmem:[#allocation22_spill] sm:$0xff] %v7439_v46  ;;  %9222 = vst [vmem:[#allocation23_spill] sm:$0xff] %v7445_v49 }
 0x17b   : > { %v674_v50 = vpop.f32.mrb[4].mxu0  ;;  %v747_v53 = vpop.f32.mrb[4].mxu1 }
 0x17c   : > { %v7447_v51 = vadd.f32 %v674_v50, %v429_v30  ;;  %v676_v52 = vpop.f32.mrb[5].mxu0  ;;  %v7453_v56 = vadd.f32 %v747_v53, %v7421_v32  ;;  %v749_v57 = vpop.f32.mrb[5].mxu1 }
 0x17d   : > { %v7450_v54 = vadd.f32 %v676_v52, %v7419_v31  ;;  %v678_v55 = vpop.f32.mrb[6].mxu0  ;;  %v7458_v60 = vadd.f32 %v749_v57, %v7423_v33  ;;  %v751_v61 = vpop.f32.mrb[6].mxu1 }
 0x17e   : > { %v7455_v58 = vadd.f32 %v678_v55, %v429_v30  ;;  %v680_v59 = vpop.f32.mrb[7].mxu0  ;;  %v7464_v63 = vadd.f32 %v751_v61, %v7421_v32  ;;  %v753_v0 = vpop.f32.mrb[7].mxu1 }
 0x17f   : > { %9223 = vst [vmem:[#allocation24_spill] sm:$0xff] %v7450_v54  ;;  %v7461_v62 = vadd.f32 %v680_v59, %v7419_v31  ;;  %v7467_v1 = vadd.f32 %v753_v0, %v7423_v33 }
 0x181   : > { %9224 = vst [vmem:[#allocation25_spill] sm:$0xff] %v7461_v62 }
 0x183   : > { %v684_v2 = vpop.f32.mrb[8].mxu0  ;;  %v757_v6 = vpop.f32.mrb[8].mxu1 }
 0x184   : > { %v7469_v4 = vadd.f32 %v684_v2, %v429_v30  ;;  %v686_v5 = vpop.f32.mrb[9].mxu0  ;;  %v7475_v10 = vadd.f32 %v757_v6, %v7421_v32  ;;  %v759_v11 = vpop.f32.mrb[9].mxu1 }
 0x185   : > { %v7472_v7 = vadd.f32 %v686_v5, %v7419_v31  ;;  %v688_v8 = vpop.f32.mrb[10].mxu0  ;;  %v7480_v14 = vadd.f32 %v759_v11, %v7423_v33  ;;  %v761_v15 = vpop.f32.mrb[10].mxu1 }
 0x186   : > { %v7477_v12 = vadd.f32 %v688_v8, %v429_v30  ;;  %v690_v13 = vpop.f32.mrb[11].mxu0  ;;  %v7486_v17 = vadd.f32 %v761_v15, %v7421_v32  ;;  %v763_v18 = vpop.f32.mrb[11].mxu1 }
 0x187   : > { %9225 = vst [vmem:[#allocation26_spill] sm:$0xff] %v7472_v7  ;;  %v7483_v16 = vadd.f32 %v690_v13, %v7419_v31  ;;  %v7489_v19 = vadd.f32 %v763_v18, %v7423_v33 }
 0x188   : > { %9226 = vst [vmem:[#allocation27_spill] sm:$0xff] %v7477_v12 }
 0x189   : > { %9227 = vst [vmem:[#allocation28_spill] sm:$0xff] %v7483_v16  ;;  %9228 = vst [vmem:[#allocation29_spill] sm:$0xff] %v7489_v19 }
 0x18b   : > { %v694_v20 = vpop.f32.mrb[12].mxu0  ;;  %v767_v23 = vpop.f32.mrb[12].mxu1 }
 0x18c   : > { %v7491_v21 = vadd.f32 %v694_v20, %v429_v30  ;;  %v696_v22 = vpop.f32.mrb[13].mxu0  ;;  %v7497_v27 = vadd.f32 %v767_v23, %v7421_v32  ;;  %v769_v28 = vpop.f32.mrb[13].mxu1 }
 0x18d   : > { %v7494_v25 = vadd.f32 %v696_v22, %v7419_v31  ;;  %v698_v26 = vpop.f32.mrb[14].mxu0  ;;  %v7502_v36 = vadd.f32 %v769_v28, %v7423_v33  ;;  %v771_v37 = vpop.f32.mrb[14].mxu1 }
 0x18e   : > { %9230 = vst [vmem:[#allocation31_spill] sm:$0xff] %v7497_v27  ;;  %v7499_v29 = vadd.f32 %v698_v26, %v429_v30  ;;  %v700_v34 = vpop.f32.mrb[15].mxu0  ;;  %v7508_v41 = vadd.f32 %v771_v37, %v7421_v32  ;;  %v773_v43 = vpop.f32.mrb[15].mxu1 }
 0x18f   : > { %9229 = vst [vmem:[#allocation30_spill] sm:$0xff] %v7494_v25  ;;  %9231 = vst [vmem:[#allocation32_spill] sm:$0xff] %v7502_v36  ;;  %v7505_v39 = vadd.f32 %v700_v34, %v7419_v31  ;;  %v7511_v45 = vadd.f32 %v773_v43, %v7423_v33 }
 0x190   : > { %9233 = vst [vmem:[#allocation34_spill] sm:$0xff] %v7508_v41 }
 0x191   : > { %9232 = vst [vmem:[#allocation33_spill] sm:$0xff] %v7505_v39  ;;  %9234 = vst [vmem:[#allocation35_spill] sm:$0xff] %v7511_v45 }
 0x193   : > { %v1015_v48 = vpop.f32.mrb[16].mxu0  ;;  %v7513_v55 = vpop.f32.mrb[16].mxu1 }
 0x194   : > { %v1067_v50 = vrot.slane %v1015_v48, 1  ;;  %v1071_v52 = vrot.slane %v1015_v48, 2  ;;  %v1075_v30 = vrot.slane %v1015_v48, 3  ;;  %v1079_v53 = vrot.slane %v1015_v48, 4  ;;  %v7515_v57 = vpop.f32.mrb[17].mxu0  ;;  %v7518_v32 = vpop.f32.mrb[17].mxu1 }
 0x195   : > { %v1083_v59 = vrot.slane %v1015_v48, 5  ;;  %v1087_v61 = vrot.slane %v1015_v48, 6  ;;  %v1091_v31 = vrot.slane %v1015_v48, 7  ;;  %v1127_v0 = vadd.f32 %v1015_v48, %v7425_v35  ;;  %v1019_v2 = vpop.f32.mrb[18].mxu0  ;;  %v1060_v13 = vpop.f32.mrb[18].mxu1 }
 0x196   : > { %v1131_v33 = vadd.f32 %v1067_v50, %v7433_v42  ;;  %v1135_v5 = vadd.f32 %v1071_v52, %v7447_v51  ;;  %v1139_v6 = vadd.f32 %v1075_v30, %v7455_v58  ;;  %v1143_v8 = vadd.f32 %v1079_v53, %v7469_v4  ;;  %v1020_v11 = vpop.f32.mrb[19].mxu0  ;;  %v1061_v22 = vpop.f32.mrb[19].mxu1 }
 0x197   : > { %v1147_v15 = vadd.f32 %v1083_v59, %v7477_v12  ;;  %v1151_v18 = vadd.f32 %v1087_v61, %v7491_v21  ;;  %v5268_v20 = vmul.f32 -1.442695, %v1127_v0  ;;  %v1155_v23 = vadd.f32 %v1091_v31, %v7499_v29 }
 0x198   : > { %v5269_v26 = vmul.f32 -1.442695, %v1131_v33  ;;  %v5270_v28 = vmul.f32 -1.442695, %v1135_v5  ;;  %v5271_v34 = vmul.f32 -1.442695, %v1139_v6  ;;  %v1129_v61 = vadd.f32 %v7513_v55, %v7431_v40 }
 0x199   : > { %5707 = vpow2.f32 %v5268_v20  ;;  %v5272_v37 = vmul.f32 -1.442695, %v1143_v8  ;;  %v5273_v43 = vmul.f32 -1.442695, %v1147_v15  ;;  %v1069_v48 = vrot.slane %v7513_v55, 1 }
 0x19a   : > { %5709 = vpow2.f32 %v5269_v26  ;;  %v5274_v50 = vmul.f32 -1.442695, %v1151_v18  ;;  %v1073_v52 = vrot.slane %v7513_v55, 2  ;;  %v5275_v30 = vmul.f32 -1.442695, %v1155_v23 }
 0x19b   : > { %5711 = vpow2.f32 %v5270_v28  ;;  %v1077_v53 = vrot.slane %v7513_v55, 3  ;;  %v1081_v59 = vrot.slane %v7513_v55, 4  ;;  %v1133_v31 = vadd.f32 %v1069_v48, %v7442_v47 }
 0x19c   : > { %5713 = vpow2.f32 %v5271_v34  ;;  %v1137_v0 = vadd.f32 %v1073_v52, %v7453_v56  ;;  %v1085_v5 = vrot.slane %v7513_v55, 5  ;;  %v1089_v8 = vrot.slane %v7513_v55, 6 }
 0x19d   : > { %5715 = vpow2.f32 %v5272_v37  ;;  %v1141_v2 = vadd.f32 %v1077_v53, %v7464_v63  ;;  %v1145_v33 = vadd.f32 %v1081_v59, %v7475_v10  ;;  %v1093_v20 = vrot.slane %v7513_v55, 7 }
 0x19e   : > { %5717 = vpow2.f32 %v5273_v43  ;;  %v1149_v26 = vadd.f32 %v1085_v5, %v7486_v17  ;;  %v1068_v28 = vrot.slane %v7515_v57, 1  ;;  %v1153_v43 = vadd.f32 %v1089_v8, %v7497_v27 }
 0x19f   : > { %5719 = vpow2.f32 %v5274_v50  ;;  %v1072_v48 = vrot.slane %v7515_v57, 2  ;;  %v1076_v55 = vrot.slane %v7515_v57, 3 }
 0x1a0   : > { %5721 = vpow2.f32 %v5275_v30  ;;  %v1080_v30 = vrot.slane %v7515_v57, 4  ;;  %v1132_v5 = vadd.f32 %v1068_v28, %v7439_v46 }
 0x1a1   : > { %5723 = vtanh.f32 %v1129_v61  ;;  %v1084_v61 = vrot.slane %v7515_v57, 5 }
 0x1a2   : > { %5725 = vtanh.f32 %v1133_v31  ;;  %v1128_v31 = vadd.f32 %v7515_v57, %v7428_v38 }
 0x1a3   : > { %v5708_v6 = vpop.eup %5707  ;;  %5727 = vtanh.f32 %v1137_v0 }
 0x1a4   : > { %v5710_v11 = vpop.eup %5709  ;;  %v1183_v13 = vadd.f32 1.0, %v5708_v6  ;;  %5729 = vtanh.f32 %v1141_v2  ;;  %v5276_v28 = vmul.f32 -1.442695, %v1128_v31 }
 0x1a5   : > { %v5712_v15 = vpop.eup %5711  ;;  %v1184_v18 = vadd.f32 1.0, %v5710_v11  ;;  %5731 = vtanh.f32 %v1145_v33  ;;  %v1088_v33 = vrot.slane %v7515_v57, 6  ;;  %v1092_v11 = vrot.slane %v7515_v57, 7 }
 0x1a6   : > { %v5714_v22 = vpop.eup %5713  ;;  %v1185_v23 = vadd.f32 1.0, %v5712_v15  ;;  %5733 = vrcp.f32 %v1183_v13  ;;  %v1136_v13 = vadd.f32 %v1072_v48, %v7450_v54  ;;  %v5277_v57 = vmul.f32 -1.442695, %v1132_v5 }
 0x1a7   : > { %v5716_v34 = vpop.eup %5715  ;;  %v1186_v37 = vadd.f32 1.0, %v5714_v22  ;;  %5735 = vrcp.f32 %v1184_v18  ;;  %v1157_v18 = vadd.f32 %v1093_v20, %v7508_v41  ;;  %v1140_v22 = vadd.f32 %v1076_v55, %v7461_v62 }
 0x1a8   : > { %v5718_v50 = vpop.eup %5717  ;;  %v1187_v52 = vadd.f32 1.0, %v5716_v34  ;;  %5737 = vrcp.f32 %v1185_v23  ;;  %v1144_v23 = vadd.f32 %v1080_v30, %v7472_v7  ;;  %v1070_v48 = vrot.slane %v7518_v32, 1 }
 0x1a9   : > { %v5720_v53 = vpop.eup %5719  ;;  %v1188_v59 = vadd.f32 1.0, %v5718_v50  ;;  %5739 = vrcp.f32 %v1186_v37  ;;  %v1148_v37 = vadd.f32 %v1084_v61, %v7483_v16  ;;  %v1156_v20 = vadd.f32 %v1092_v11, %v7505_v39 }
 0x1aa   : > { %v5722_v0 = vpop.eup %5721  ;;  %v1189_v2 = vadd.f32 1.0, %v5720_v53  ;;  %5741 = vrcp.f32 %v1187_v52  ;;  %v1152_v52 = vadd.f32 %v1088_v33, %v7494_v25  ;;  %v1074_v55 = vrot.slane %v7518_v32, 2 }
 0x1ab   : > { %v5724_v6 = vpop.eup %5723  ;;  %v1190_v8 = vadd.f32 1.0, %v5722_v0  ;;  %5743 = vrcp.f32 %v1188_v59  ;;  %v5278_v59 = vmul.f32 -1.442695, %v1136_v13  ;;  %v5279_v0 = vmul.f32 -1.442695, %v1140_v22 }
 0x1ac   : > { %v5726_v15 = vpop.eup %5725  ;;  %5745 = vrcp.f32 %v1189_v2  ;;  %v5280_v2 = vmul.f32 -1.442695, %v1144_v23  ;;  %v1078_v61 = vrot.slane %v7518_v32, 3  ;;  %v1082_v33 = vrot.slane %v7518_v32, 4 }
 0x1ad   : > { %v5728_v34 = vpop.eup %5727  ;;  %5747 = vrcp.f32 %v1190_v8  ;;  %v5281_v11 = vmul.f32 -1.442695, %v1148_v37  ;;  %v1134_v13 = vadd.f32 %v1070_v48, %v7445_v49  ;;  %v5282_v23 = vmul.f32 -1.442695, %v1152_v52 }
 0x1ae   : > { %v5730_v50 = vpop.eup %5729  ;;  %5749 = vtanh.f32 %v1149_v26  ;;  %v5283_v3 = vmul.f32 -1.442695, %v1156_v20  ;;  %v1146_v37 = vadd.f32 %v1082_v33, %v7480_v14 }
 0x1af   : > { %v5732_v53 = vpop.eup %5731  ;;  %5751 = vtanh.f32 %v1153_v43  ;;  %v1130_v43 = vadd.f32 %v7518_v32, %v7436_v44  ;;  %v1142_v44 = vadd.f32 %v1078_v61, %v7467_v1  ;;  %v5285_v48 = vmul.f32 -1.442695, %v1134_v13 }
 0x1b0   : > { %v5734_v30 = vpop.eup %5733  ;;  %5753 = vtanh.f32 %v1157_v18  ;;  %v5288_v61 = vmul.f32 -1.442695, %v1146_v37 }
 0x1b1   : > { %v5736_v31 = vpop.eup %5735  ;;  %v7562_v26 = vmul.f32 %v5734_v30, %v5724_v6  ;;  %5755 = vpow2.f32 %v5276_v28  ;;  %v1138_v6 = vadd.f32 %v1074_v55, %v7458_v60 }
 0x1b2   : > { %v5738_v5 = vpop.eup %5737  ;;  %v7567_v8 = vmul.f32 %v5736_v31, %v5726_v15  ;;  %5757 = vpow2.f32 %v5277_v57  ;;  %v5284_v57 = vmul.f32 -1.442695, %v1130_v43 }
 0x1b3   : > { %v5740_v18 = vpop.eup %5739  ;;  %v7570_v22 = vmul.f32 %v5738_v5, %v5728_v34  ;;  %5759 = vpow2.f32 %v5278_v59  ;;  %v5286_v59 = vmul.f32 -1.442695, %v1138_v6  ;;  %v1090_v5 = vrot.slane %v7518_v32, 6 }
 0x1b4   : > { %v5742_v28 = vpop.eup %5741  ;;  %v7573_v30 = vmul.f32 %v5740_v18, %v5730_v50  ;;  %5761 = vpow2.f32 %v5279_v0  ;;  %v5287_v50 = vmul.f32 -1.442695, %v1142_v44  ;;  %v1094_v44 = vrot.slane %v7518_v32, 7 }
 0x1b5   : > { %v5744_v15 = vpop.eup %5743  ;;  %v7576_v31 = vmul.f32 %v5742_v28, %v5732_v53  ;;  %5763 = vpow2.f32 %v5280_v2  ;;  %v1086_v2 = vrot.slane %v7518_v32, 5 }
 0x1b6   : > { %v5746_v34 = vpop.eup %5745  ;;  %5765 = vpow2.f32 %v5281_v11 }
 0x1b7   : > { %v5748_v52 = vpop.eup %5747  ;;  %5767 = vpow2.f32 %v5282_v23 }
 0x1b8   : > { %v5750_v55 = vpop.eup %5749  ;;  %5769 = vpow2.f32 %v5283_v3 }
 0x1b9   : > { %v5752_v0 = vpop.eup %5751  ;;  %v7579_v20 = vmul.f32 %v5750_v55, %v5744_v15  ;;  %5771 = vpow2.f32 %v5284_v57  ;;  %v1150_v15 = vadd.f32 %v1086_v2, %v7489_v19 }
 0x1ba   : > { %v5754_v53 = vpop.eup %5753  ;;  %5773 = vpow2.f32 %v5285_v48  ;;  %v7582_v33 = vmul.f32 %v5752_v0, %v5746_v34  ;;  %v1154_v34 = vadd.f32 %v1090_v5, %v7502_v36 }
 0x1bb   : > { %v5756_v43 = vpop.eup %5755  ;;  %5775 = vpow2.f32 %v5286_v59  ;;  %v7585_v11 = vmul.f32 %v5754_v53, %v5748_v52  ;;  %v1158_v59 = vadd.f32 %v1094_v44, %v7511_v45 }
 0x1bc   : > { %v5758_v13 = vpop.eup %5757  ;;  %v1231_v3 = vadd.f32 1.0, %v5756_v43  ;;  %5777 = vpow2.f32 %v5287_v50  ;;  %v7591_v43 = vld [vmem:[#allocation11] sm:$0xff] }
 0x1bd   : > { %v5760_v18 = vpop.eup %5759  ;;  %v1232_v23 = vadd.f32 1.0, %v5758_v13  ;;  %5779 = vpow2.f32 %v5288_v61  ;;  %v5289_v61 = vmul.f32 -1.442695, %v1150_v15  ;;  %v5290_v13 = vmul.f32 -1.442695, %v1154_v34 }
 0x1be   : > { %v5762_v6 = vpop.eup %5761  ;;  %v1233_v28 = vadd.f32 1.0, %v5760_v18  ;;  %5781 = vrcp.f32 %v1231_v3  ;;  %v5291_v5 = vmul.f32 -1.442695, %v1158_v59  ;;  %v1313_v15 = vrot.slane %v7591_v43, 2 }
 0x1bf   : > { %v5764_v37 = vpop.eup %5763  ;;  %v1234_v57 = vadd.f32 1.0, %v5762_v6  ;;  %5783 = vrcp.f32 %v1232_v23  ;;  %v1312_v6 = vrot.slane %v7591_v43, 1  ;;  %v1315_v34 = vrot.slane %v7591_v43, 4 }
 0x1c0   : > { %v5766_v48 = vpop.eup %5765  ;;  %v1235_v52 = vadd.f32 1.0, %v5764_v37  ;;  %5785 = vrcp.f32 %v1233_v28 }
 0x1c1   : > { %v5768_v32 = vpop.eup %5767  ;;  %v1236_v55 = vadd.f32 1.0, %v5766_v48  ;;  %5787 = vrcp.f32 %v1234_v57  ;;  %v1314_v57 = vrot.slane %v7591_v43, 3 }
 0x1c2   : > { %v5770_v50 = vpop.eup %5769  ;;  %v1237_v0 = vadd.f32 1.0, %v5768_v32  ;;  %5789 = vrcp.f32 %v1235_v52 }
 0x1c3   : > { %v5772_v53 = vpop.eup %5771  ;;  %v1238_v2 = vadd.f32 1.0, %v5770_v50  ;;  %5791 = vrcp.f32 %v1236_v55  ;;  %v1316_v50 = vrot.slane %v7591_v43, 5 }
 0x1c4   : > { %v5774_v3 = vpop.eup %5773  ;;  %5793 = vrcp.f32 %v1237_v0  ;;  %v1287_v23 = vadd.f32 1.0, %v5772_v53 }
 0x1c5   : > { %v5776_v18 = vpop.eup %5775  ;;  %5795 = vrcp.f32 %v1238_v2  ;;  %v1288_v28 = vadd.f32 1.0, %v5774_v3  ;;  %v1317_v2 = vrot.slane %v7591_v43, 6 }
 0x1c6   : > { %v5778_v44 = vpop.eup %5777  ;;  %5797 = vpow2.f32 %v5289_v61  ;;  %v1289_v48 = vadd.f32 1.0, %v5776_v18 }
 0x1c7   : > { %v5780_v37 = vpop.eup %5779  ;;  %5799 = vpow2.f32 %v5290_v13  ;;  %v1290_v59 = vadd.f32 1.0, %v5778_v44 }
 0x1c8   : > { %v5782_v52 = vpop.eup %5781  ;;  %5801 = vpow2.f32 %v5291_v5  ;;  %v1291_v53 = vadd.f32 1.0, %v5780_v37  ;;  %v1318_v5 = vrot.slane %v7591_v43, 7 }
 0x1c9   : > { %v5784_v32 = vpop.eup %5783  ;;  %v1327_v55 = vmul.f32 %v5782_v52, %v7591_v43  ;;  %5803 = vrcp.f32 %v1287_v23 }
 0x1ca   : > { %v5786_v0 = vpop.eup %5785  ;;  %v1328_v61 = vmul.f32 %v5784_v32, %v1312_v6  ;;  %5805 = vrcp.f32 %v1288_v28 }
 0x1cb   : > { %v5788_v13 = vpop.eup %5787  ;;  %v1329_v3 = vmul.f32 %v5786_v0, %v1313_v15  ;;  %v1343_v18 = vadd.f32 %v7562_v26, %v1327_v55  ;;  %5807 = vrcp.f32 %v1289_v48 }
 0x1cc   : > { %v5790_v44 = vpop.eup %5789  ;;  %v1330_v45 = vmul.f32 %v5788_v13, %v1314_v57  ;;  %v1344_v52 = vadd.f32 %v7567_v8, %v1328_v61  ;;  %5809 = vrcp.f32 %v1290_v59 }
 0x1cd   : > { %v5792_v23 = vpop.eup %5791  ;;  %v1331_v36 = vmul.f32 %v5790_v44, %v1315_v34  ;;  %v1345_v6 = vadd.f32 %v7570_v22, %v1329_v3  ;;  %5811 = vtanh.f32 %v1343_v18 }
 0x1ce   : > { %v5794_v28 = vpop.eup %5793  ;;  %v1478_v37 = vrot.slane %v1344_v52, 7  ;;  %5813 = vrcp.f32 %v1291_v53  ;;  %v1332_v15 = vmul.f32 %v5792_v23, %v1316_v50  ;;  %v1346_v26 = vadd.f32 %v7573_v30, %v1330_v45 }
 0x1cf   : > { %v5796_v48 = vpop.eup %5795  ;;  %v1480_v32 = vrot.slane %v1345_v6, 6  ;;  %v1333_v55 = vmul.f32 %v5794_v28, %v1317_v2  ;;  %v1347_v57 = vadd.f32 %v7576_v31, %v1331_v36  ;;  %5815 = vtanh.f32 %v1344_v52 }
 0x1d0   : > { %v5798_v8 = vpop.eup %5797  ;;  %v1479_v59 = vsel %vm1381_vm1, %v1478_v37, %v1343_v18  ;;  %v1334_v34 = vmul.f32 %v5796_v48, %v1318_v5  ;;  %v1348_v22 = vadd.f32 %v7579_v20, %v1332_v15  ;;  %5817 = vtanh.f32 %v1345_v6 }
 0x1d1   : > { %v5800_v0 = vpop.eup %5799  ;;  %v1481_v61 = vsel %vm1384_vm2, %v1480_v32, %v1479_v59  ;;  %v1292_v53 = vadd.f32 1.0, %v5798_v8  ;;  %v1349_v50 = vadd.f32 %v7582_v33, %v1333_v55  ;;  %5819 = vtanh.f32 %v1346_v26  ;;  %v1370_v33 = vpop.permute.xlu0 %1369 }
 0x1d2   : > { %v5802_v45 = vpop.eup %5801  ;;  %v1293_v30 = vadd.f32 1.0, %v5800_v0  ;;  %v1350_v2 = vadd.f32 %v7585_v11, %v1334_v34  ;;  %5821 = vtanh.f32 %v1347_v57  ;;  %v1482_v36 = vrot.slane %v1346_v26, 5 }
 0x1d3   : > { %v5804_v31 = vpop.eup %5803  ;;  %v1294_v13 = vadd.f32 1.0, %v5802_v45  ;;  %5823 = vrcp.f32 %v1292_v53  ;;  %v1484_v3 = vrot.slane %v1347_v57, 4  ;;  %v1486_v5 = vrot.slane %v1348_v22, 3 }
 0x1d4   : > { %v5806_v20 = vpop.eup %5805  ;;  %5825 = vrcp.f32 %v1293_v30  ;;  %v1483_v18 = vsel %vm1387_vm3, %v1482_v36, %v1481_v61  ;;  %v1488_v11 = vrot.slane %v1349_v50, 2  ;;  %v1490_v28 = vrot.slane %v1350_v2, 1 }
 0x1d5   : > { %v5808_v44 = vpop.eup %5807  ;;  %5827 = vrcp.f32 %v1294_v13  ;;  %v1485_v52 = vsel %vm1390_vm4, %v1484_v3, %v1483_v18  ;;  %vm1371_vm8 = vcmp.eq.s32.totalorder %v1370_v33, 1  ;;  %v7057_v36 = vmov 1966171168  }
 0x1d6   : > { %v5810_v23 = vpop.eup %5809  ;;  %5829 = vtanh.f32 %v1348_v22  ;;  %v1487_v6 = vsel %vm1393_vm5, %v1486_v5, %v1485_v52 }
 0x1d7   : > { %v5812_v37 = vpop.eup %5811  ;;  %5831 = vtanh.f32 %v1349_v50  ;;  %v1489_v15 = vsel %vm1396_vm6, %v1488_v11, %v1487_v6 }
 0x1d8   : > { %v5814_v26 = vpop.eup %5813  ;;  %5833 = vtanh.f32 %v1350_v2  ;;  %v1359_v48 = vmul.f32 %v5812_v37, %v5804_v31  ;;  %v1491_v32 = vsel %vm1399_vm7, %v1490_v28, %v1489_v15  ;;  %v1406_v2 = vunpack.c.l.s4 %v7057_v36  ;;  %v7641_v36 = vld [vmem:[#allocation7] ss:$16 sps:$4 sm:$0xff]  }
 0x1d9   : > { %v5816_v55 = vpop.eup %5815  ;;  %v7618_v57 = vsel %vm1371_vm8, %v1491_v32, %v7591_v43 }
 0x1da   : > { %v5818_v8 = vpop.eup %5817  ;;  %v1360_v59 = vmul.f32 %v5816_v55, %v5806_v20  ;;  %v1407_v6 = vunpack.c.0.s8 %v1406_v2 }
 0x1db   : > { %v5820_v34 = vpop.eup %5819  ;;  %v1361_v22 = vmul.f32 %v5818_v8, %v5808_v44 }
 0x1dc   : > { %v5822_v0 = vpop.eup %5821  ;;  %v1362_v61 = vmul.f32 %v5820_v34, %v5810_v23  ;;  %v1380_v53 = vrot.slane %v1360_v59, 7  ;;  %v7626_v8 = vsub.s32 %v1407_v6, %v7410_v24  ;;  %v7670_v6 = vld [vmem:[#allocation7 + $0x44] ss:$16 sps:$4 sm:$0xff]  }
 0x1dd   : > { %v5824_v50 = vpop.eup %5823  ;;  %v1363_v45 = vmul.f32 %v5822_v0, %v5814_v26  ;;  %v1383_v30 = vrot.slane %v1361_v22, 6 }
 0x1de   : > { %v5826_v31 = vpop.eup %5825  ;;  %v1382_v13 = vsel %vm1381_vm1, %v1380_v53, %v1359_v48  ;;  %v1386_v3 = vrot.slane %v1362_v61, 5 }
 0x1df   : > { %v5828_v18 = vpop.eup %5827  ;;  %v1385_v43 = vsel %vm1384_vm2, %v1383_v30, %v1382_v13  ;;  %v1389_v5 = vrot.slane %v1363_v45, 4 }
 0x1e0   : > { %v5830_v52 = vpop.eup %5829  ;;  %v1388_v20 = vsel %vm1387_vm3, %v1386_v3, %v1385_v43  ;;  %v7651_v3 = vld [vmem:[#allocation7 + $0x24] ss:$16 sps:$4 sm:$0xff]   ;;  %v9235_v43 = vmov 0  }
 0x1e1   : > { %v5832_v44 = vpop.eup %5831  ;;  %v1364_v11 = vmul.f32 %v5830_v52, %v5824_v50  ;;  %v1391_v23 = vsel %vm1390_vm4, %v1389_v5, %v1388_v20 }
 0x1e2   : > { %v5834_v28 = vpop.eup %5833  ;;  %v1365_v37 = vmul.f32 %v5832_v44, %v5826_v31  ;;  %v7662_v44 = vld [vmem:[#allocation7 + $0x20] ss:$16 sps:$4 sm:$0xff]  }
 0x1e3   : > { %v1366_v15 = vmul.f32 %v5834_v28, %v5828_v18  ;;  %v1392_v26 = vrot.slane %v1364_v11, 3  ;;  %v7654_v18 = vld [vmem:[#allocation7 + $0x2c] ss:$16 sps:$4 sm:$0xff]   ;;  %v7665_v11 = vld [vmem:[#allocation7 + $0x28] ss:$16 sps:$4 sm:$0xff]  }
 0x1e4   : > { %v1395_v32 = vrot.slane %v1365_v37, 2  ;;  %v7673_v28 = vld [vmem:[#allocation7 + $0x4c] ss:$16 sps:$4 sm:$0xff]   ;;  %v7677_v37 = vld [vmem:[#allocation7 + $0x40] ss:$16 sps:$4 sm:$0xff]  }
 0x1e5   : > { %v1394_v48 = vsel %vm1393_vm5, %v1392_v26, %v1391_v23  ;;  %v1398_v55 = vrot.slane %v1366_v15, 1  ;;  %9236 = vst [vmem:[#allocation36_spill] sm:$0xff] %v7673_v28  ;;  %9237 = vst [vmem:[#allocation37_spill] sm:$0xff] %v7677_v37  ;;  %v7680_v15 = vld [vmem:[#allocation7 + $0x48] ss:$16 sps:$4 sm:$0xff]  }
 0x1e6   : > { %v1397_v59 = vsel %vm1396_vm6, %v1395_v32, %v1394_v48  ;;  %9238 = vst [vmem:[#allocation38_spill] sm:$0xff] %v7680_v15  ;;  %v7683_v26 = vld [vmem:[#allocation7 + $0x64] ss:$16 sps:$4 sm:$0xff]   ;;  %v7686_v32 = vld [vmem:[#allocation7 + $0x6c] ss:$16 sps:$4 sm:$0xff]  }
 0x1e7   : > { %v1400_v34 = vsel %vm1399_vm7, %v1398_v55, %v1397_v59  ;;  %9239 = vst [vmem:[#allocation39_spill] sm:$0xff] %v7683_v26  ;;  %9240 = vst [vmem:[#allocation40_spill] sm:$0xff] %v7686_v32  ;;  %v7689_v48 = vld [vmem:[#allocation7 + $0x60] ss:$16 sps:$4 sm:$0xff]   ;;  %v7692_v55 = vld [vmem:[#allocation7 + $0x68] ss:$16 sps:$4 sm:$0xff]  }
 0x1e8   : > { %v1402_v22 = vsel %vm1371_vm8, %v1400_v34, 0.0  ;;  %v7633_v0 = vsel %vm1371_vm8, %v1400_v34, %v7379_v9  ;;  %v7644_v9 = vld [vmem:[#allocation7 + $0x8] ss:$16 sps:$4 sm:$0xff]   ;;  %9241 = vst [vmem:[#allocation41_spill] sm:$0xff] %v7689_v48  ;;  %9242 = vst [vmem:[#allocation42_spill] sm:$0xff] %v7692_v55 }
 0x1e9   : > { %v1404_v61 = vcombine.high %v1402_v22, %v1402_v22  ;;  %v1411_v53 = vrot.slane %v1402_v22, %v7626_v8  ;;  %v1494_v50 = vpack.c.bf16 %v7633_v0, %v7633_v0  ;;  %v7695_v59 = vld [vmem:[#allocation7 + $0x84] ss:$16 sps:$4 sm:$0xff]   ;;  %v7698_v34 = vld [vmem:[#allocation7 + $0x8c] ss:$16 sps:$4 sm:$0xff]   ;;  %v7701_v22 = vld [vmem:[#allocation7 + $0x80] ss:$16 sps:$4 sm:$0xff]  }
 0x1ea   : > { %9243 = vst [vmem:[#allocation43_spill] sm:$0xff] %v7695_v59  ;;  %9244 = vst [vmem:[#allocation44_spill] sm:$0xff] %v7698_v34 }
 0x1eb   : > { %v1418_v24 = vrot.slane %v1404_v61, %v7626_v8  ;;  %v1419_v45 = vcombine.high %v1411_v53, %v1411_v53  ;;  %v1427_v30 = vrot.slane %v1411_v53, %v7626_v8  ;;  %5292 = vst.sshfl [vmem:[%s7296_s16] sm:$0x1 pattern:$0x73625140] %v1411_v53  ;;  %1528 = vmatmul.mubr.bf16.vlgmr.msra.gmra.mrb[20].mxu0 %v1494_v50  ;;  %9245 = vst [vmem:[#allocation45_spill] sm:$0xff] %v7701_v22  ;;  %v7704_v61 = vld [vmem:[#allocation7 + $0x88] ss:$16 sps:$4 sm:$0xff]  }
 0x1ec   : > { %1569 = vmatmul.mubr.bf16.vlgmr.msra.gmra.mrb[20].mxu1 %v1494_v50  ;;  %2002 = vmatpush1.bf16.msra.mxu0 %v7641_v36  ;;  %9246 = vst [vmem:[#allocation46_spill] sm:$0xff] %v7704_v61  ;;  %v7707_v53 = vld [vmem:[#allocation7 + $0xa4] ss:$16 sps:$4 sm:$0xff]   ;;  %v7710_v50 = vld [vmem:[#allocation7 + $0xac] ss:$16 sps:$4 sm:$0xff]  }
 0x1ed   : > { %2043 = vmatpush1.bf16.msra.mxu1 %v7644_v9  ;;  %v1420_v33 = vcombine.high %v1418_v24, %v1418_v24  ;;  %v1434_v2 = vrot.slane %v1418_v24, %v7626_v8  ;;  %v1441_v31 = vrot.slane %v1419_v45, %v7626_v8  ;;  %v1449_v13 = vcombine.high %v1427_v30, %v1427_v30  ;;  %v7719_v30 = vld [vmem:[#allocation7 + $0xc4] ss:$16 sps:$4 sm:$0xff]  }
 0x1ee   : > { %5293 = vst.sshfl [vmem:[%s7296_s16 + $0x8] sm:$0x1 pattern:$0x73625140] %v1419_v45  ;;  %2003 = vmatprep.subr.bf16.mxu0 %v7651_v3  ;;  %2044 = vmatprep.subr.bf16.mxu1 %v7654_v18  ;;  %9247 = vst [vmem:[#allocation47_spill] sm:$0xff] %v7707_v53 }
 0x1ef   : > { %5294 = vst.sshfl [vmem:[%s7296_s16 + $0x20] sm:$0x1 pattern:$0x73625140] %v1418_v24  ;;  %2033 = vmatprep.mubr.bf16.mxu0 %v9235_v43  ;;  %v1448_v5 = vrot.slane %v1420_v33, %v7626_v8  ;;  %v1450_v52 = vcombine.high %v1434_v2, %v1434_v2  ;;  %v1451_v20 = vcombine.high %v1441_v31, %v1441_v31  ;;  %1463 = vst [vmem:[%s7296_s16 + $0x10] sm:$0x1] %v1449_v13 }
 0x1f0   : > { %5295 = vst.sshfl [vmem:[%s7296_s16 + $0x28] sm:$0x1 pattern:$0x73625140] %v1420_v33  ;;  %2074 = vmatprep.mubr.bf16.mxu1 %v9235_v43  ;;  %2004 = vmatpush1.bf16.msra.mxu0 %v7662_v44  ;;  %9248 = vst [vmem:[#allocation48_spill] sm:$0xff] %v7710_v50 }
 0x1f1   : > { %2045 = vmatpush1.bf16.msra.mxu1 %v7665_v11  ;;  %v1452_v23 = vcombine.high %v1448_v5, %v1448_v5  ;;  %1464 = vst [vmem:[%s7296_s16 + $0x18] sm:$0x1] %v1451_v20  ;;  %1467 = vst [vmem:[%s7296_s16 + $0x30] sm:$0x1] %v1450_v52  ;;  %2005 = vmatprep.subr.bf16.mxu0 %v7670_v6  ;;  %v7713_v24 = vld [vmem:[#allocation7 + $0xa0] ss:$16 sps:$4 sm:$0xff]  }
 0x1f2   : > { %2046 = vmatprep.subr.bf16.mxu1 %v7673_v28  ;;  %9249 = vst [vmem:[#allocation49_spill] sm:$0xff] %v7713_v24  ;;  %v7716_v45 = vld [vmem:[#allocation7 + $0xa8] ss:$16 sps:$4 sm:$0xff]   ;;  %9251 = vst [vmem:[#allocation51_spill] sm:$0xff] %v7719_v30  ;;  %v7722_v33 = vld [vmem:[#allocation7 + $0xcc] ss:$16 sps:$4 sm:$0xff]  }
 0x1f3   : > { %1468 = vst [vmem:[%s7296_s16 + $0x38] sm:$0x1] %v1452_v23  ;;  %9250 = vst [vmem:[#allocation50_spill] sm:$0xff] %v7716_v45  ;;  %v7725_v2 = vld [vmem:[#allocation7 + $0xc0] ss:$16 sps:$4 sm:$0xff]  }
 0x1f4   : > { %2006 = vmatpush1.bf16.msra.mxu0 %v7677_v37  ;;  %9252 = vst [vmem:[#allocation52_spill] sm:$0xff] %v7722_v33  ;;  %9253 = vst [vmem:[#allocation53_spill] sm:$0xff] %v7725_v2  ;;  %v7728_v31 = vld [vmem:[#allocation7 + $0xc8] ss:$16 sps:$4 sm:$0xff]   ;;  %v7731_v13 = vld [vmem:[#allocation7 + $0xe4] ss:$16 sps:$4 sm:$0xff]  }
 0x1f5   : > { %2047 = vmatpush1.bf16.msra.mxu1 %v7680_v15  ;;  %2007 = vmatprep.subr.bf16.mxu0 %v7683_v26  ;;  %9254 = vst [vmem:[#allocation54_spill] sm:$0xff] %v7728_v31  ;;  %9255 = vst [vmem:[#allocation55_spill] sm:$0xff] %v7731_v13  ;;  %v7734_v5 = vld [vmem:[#allocation7 + $0xec] ss:$16 sps:$4 sm:$0xff]   ;;  %v7737_v52 = vld [vmem:[#allocation7 + $0xe0] ss:$16 sps:$4 sm:$0xff]  }
 0x1f6   : > { %2048 = vmatprep.subr.bf16.mxu1 %v7686_v32  ;;  %9256 = vst [vmem:[#allocation56_spill] sm:$0xff] %v7734_v5  ;;  %9257 = vst [vmem:[#allocation57_spill] sm:$0xff] %v7737_v52  ;;  %v7740_v20 = vld [vmem:[#allocation7 + $0xe8] ss:$16 sps:$4 sm:$0xff]   ;;  %v7743_v23 = vld [vmem:[#allocation7 + $0x4] ss:$16 sps:$4 sm:$0xff]  }
 0x1f7   : > { %9258 = vst [vmem:[#allocation58_spill] sm:$0xff] %v7740_v20  ;;  %9259 = vst [vmem:[#allocation59_spill] sm:$0xff] %v7743_v23 }
 0x1f8   : > { %2008 = vmatpush1.bf16.msra.mxu0 %v7689_v48 }
 0x1f9   : > { %2049 = vmatpush1.bf16.msra.mxu1 %v7692_v55  ;;  %2009 = vmatprep.subr.bf16.mxu0 %v7695_v59 }
 0x1fa   : > { %2050 = vmatprep.subr.bf16.mxu1 %v7698_v34 }
 0x1fc   : > { %2010 = vmatpush1.bf16.msra.mxu0 %v7701_v22 }
 0x1fd   : > { %2051 = vmatpush1.bf16.msra.mxu1 %v7704_v61  ;;  %2011 = vmatprep.subr.bf16.mxu0 %v7707_v53 }
 0x1fe   : > { %2052 = vmatprep.subr.bf16.mxu1 %v7710_v50 }
 0x200   : > { %2012 = vmatpush1.bf16.msra.mxu0 %v7713_v24 }
 0x201   : > { %2053 = vmatpush1.bf16.msra.mxu1 %v7716_v45  ;;  %2013 = vmatprep.subr.bf16.mxu0 %v7719_v30 }
 0x202   : > { %2054 = vmatprep.subr.bf16.mxu1 %v7722_v33 }
 0x204   : > { %2014 = vmatpush1.bf16.msra.mxu0 %v7725_v2 }
 0x205   : > { %2055 = vmatpush1.bf16.msra.mxu1 %v7728_v31  ;;  %2015 = vmatprep.subr.bf16.mxu0 %v7731_v13  ;;  %v7746_v31 = vld [vmem:[#allocation7 + $0xc] ss:$16 sps:$4 sm:$0xff]  }
 0x206   : > { %2056 = vmatprep.subr.bf16.mxu1 %v7734_v5  ;;  %9260 = vst [vmem:[#allocation60_spill] sm:$0xff] %v7746_v31 }
 0x208   : > { %2016 = vmatpush1.bf16.msra.mxu0 %v7737_v52 }
 0x209   : > { %2057 = vmatpush1.bf16.msra.mxu1 %v7740_v20  ;;  %2507 = vmatprep.subr.bf16.mxu0 %v7743_v23 }
 0x20a   : > { %2548 = vmatprep.subr.bf16.mxu1 %v7746_v31 }
 0x2be   : > { %v1529_v13 = vpop.f32.mrb[20].mxu0 }
 0x2bf   : > { %v7749_v2 = vpop.f32.mrb[20].mxu1  ;;  %v1581_v5 = vrot.slane %v1529_v13, 7  ;;  %v1585_v33 = vrot.slane %v1529_v13, 1  ;;  %v1589_v30 = vrot.slane %v1529_v13, 2  ;;  %v1593_v45 = vrot.slane %v1529_v13, 3  ;;  %v7751_v52 = vpop.f32.mrb[21].mxu0 }
 0x2c0   : > { %v7753_v24 = vpop.f32.mrb[21].mxu1  ;;  %v1597_v20 = vrot.slane %v1529_v13, 4  ;;  %v1601_v50 = vrot.slane %v1529_v13, 5  ;;  %v1605_v53 = vrot.slane %v1529_v13, 6  ;;  %v1645_v23 = vadd.f32 %v1529_v13, %v7433_v42  ;;  %v1533_v61 = vpop.f32.mrb[22].mxu0 }
 0x2c1   : > { %v1574_v22 = vpop.f32.mrb[22].mxu1  ;;  %v1641_v31 = vadd.f32 %v1581_v5, %v7425_v35  ;;  %v1649_v34 = vadd.f32 %v1585_v33, %v7447_v51  ;;  %v1653_v59 = vadd.f32 %v1589_v30, %v7455_v58  ;;  %v1657_v55 = vadd.f32 %v1593_v45, %v7469_v4  ;;  %v1534_v48 = vpop.f32.mrb[23].mxu0 }
 0x2c2   : > { %v1575_v32 = vpop.f32.mrb[23].mxu1  ;;  %v1661_v26 = vadd.f32 %v1597_v20, %v7477_v12  ;;  %v1665_v15 = vadd.f32 %v1601_v50, %v7491_v21  ;;  %v5297_v37 = vmul.f32 -1.442695, %v1645_v23  ;;  %v1669_v28 = vadd.f32 %v1605_v53, %v7499_v29 }
 0x2c3   : > { %v5296_v13 = vmul.f32 -1.442695, %v1641_v31  ;;  %v5298_v61 = vmul.f32 -1.442695, %v1649_v34  ;;  %v5299_v22 = vmul.f32 -1.442695, %v1653_v59 }
 0x2c4   : > { %5835 = vpow2.f32 %v5297_v37  ;;  %v5300_v5 = vmul.f32 -1.442695, %v1657_v55  ;;  %v5301_v33 = vmul.f32 -1.442695, %v1661_v26  ;;  %v1583_v30 = vrot.slane %v7749_v2, 7 }
 0x2c5   : > { %5837 = vpow2.f32 %v5296_v13  ;;  %v5302_v45 = vmul.f32 -1.442695, %v1665_v15  ;;  %v1587_v32 = vrot.slane %v7749_v2, 1  ;;  %v5303_v48 = vmul.f32 -1.442695, %v1669_v28 }
 0x2c6   : > { %5839 = vpow2.f32 %v5298_v61  ;;  %v1591_v50 = vrot.slane %v7749_v2, 2  ;;  %v1595_v53 = vrot.slane %v7749_v2, 3  ;;  %v1643_v34 = vadd.f32 %v1583_v30, %v7431_v40 }
 0x2c7   : > { %5841 = vpow2.f32 %v5299_v22  ;;  %v1647_v37 = vadd.f32 %v7749_v2, %v7442_v47  ;;  %v1651_v26 = vadd.f32 %v1587_v32, %v7453_v56  ;;  %v1599_v28 = vrot.slane %v7749_v2, 4 }
 0x2c8   : > { %5843 = vpow2.f32 %v5300_v5  ;;  %v1655_v15 = vadd.f32 %v1591_v50, %v7464_v63  ;;  %v1659_v55 = vadd.f32 %v1595_v53, %v7475_v10  ;;  %v1603_v31 = vrot.slane %v7749_v2, 5 }
 0x2c9   : > { %5845 = vpow2.f32 %v5301_v33  ;;  %v1582_v22 = vrot.slane %v7751_v52, 7  ;;  %v1607_v30 = vrot.slane %v7749_v2, 6  ;;  %v1586_v53 = vrot.slane %v7751_v52, 1 }
 0x2ca   : > { %5847 = vpow2.f32 %v5302_v45  ;;  %v1663_v45 = vadd.f32 %v1599_v28, %v7486_v17  ;;  %v1667_v50 = vadd.f32 %v1603_v31, %v7497_v27  ;;  %v1598_v2 = vrot.slane %v7751_v52, 4 }
 0x2cb   : > { %5849 = vpow2.f32 %v5303_v48  ;;  %v1642_v28 = vadd.f32 %v1582_v22, %v7428_v38  ;;  %v1602_v31 = vrot.slane %v7751_v52, 5 }
 0x2cc   : > { %5851 = vtanh.f32 %v1643_v34 }
 0x2cd   : > { %5853 = vtanh.f32 %v1647_v37  ;;  %v5304_v38 = vmul.f32 -1.442695, %v1642_v28 }
 0x2ce   : > { %v5836_v59 = vpop.eup %5835  ;;  %5855 = vtanh.f32 %v1651_v26  ;;  %v1590_v26 = vrot.slane %v7751_v52, 2 }
 0x2cf   : > { %v5838_v20 = vpop.eup %5837  ;;  %v1698_v23 = vadd.f32 1.0, %v5836_v59  ;;  %5857 = vtanh.f32 %v1655_v15  ;;  %v1594_v15 = vrot.slane %v7751_v52, 3 }
 0x2d0   : > { %v5840_v13 = vpop.eup %5839  ;;  %v1697_v61 = vadd.f32 1.0, %v5838_v20  ;;  %5859 = vtanh.f32 %v1659_v55  ;;  %v1654_v22 = vadd.f32 %v1590_v26, %v7461_v62  ;;  %v1588_v26 = vrot.slane %v7753_v24, 1 }
 0x2d1   : > { %v5842_v5 = vpop.eup %5841  ;;  %v1699_v33 = vadd.f32 1.0, %v5840_v13  ;;  %5861 = vrcp.f32 %v1698_v23  ;;  %v1646_v13 = vadd.f32 %v7751_v52, %v7439_v46  ;;  %v1584_v46 = vrot.slane %v7753_v24, 7 }
 0x2d2   : > { %v5844_v32 = vpop.eup %5843  ;;  %v1700_v48 = vadd.f32 1.0, %v5842_v5  ;;  %5863 = vrcp.f32 %v1697_v61 }
 0x2d3   : > { %v5846_v34 = vpop.eup %5845  ;;  %v1701_v37 = vadd.f32 1.0, %v5844_v32  ;;  %5865 = vrcp.f32 %v1699_v33  ;;  %v1606_v33 = vrot.slane %v7751_v52, 6  ;;  %v1650_v32 = vadd.f32 %v1586_v53, %v7450_v54 }
 0x2d4   : > { %v5848_v55 = vpop.eup %5847  ;;  %v1702_v59 = vadd.f32 1.0, %v5846_v34  ;;  %5867 = vrcp.f32 %v1700_v48  ;;  %v1671_v34 = vadd.f32 %v1607_v30, %v7508_v41  ;;  %v1666_v52 = vadd.f32 %v1602_v31, %v7494_v25  ;;  %v9261_v31 = vld [vmem:[#allocation21_spill] sm:$0xff] }
 0x2d5   : > { %v5850_v20 = vpop.eup %5849  ;;  %v1703_v23 = vadd.f32 1.0, %v5848_v55  ;;  %5869 = vrcp.f32 %v1701_v37  ;;  %v1658_v37 = vadd.f32 %v1594_v15, %v7472_v7  ;;  %v5305_v53 = vmul.f32 -1.442695, %v1646_v13 }
 0x2d6   : > { %v5852_v61 = vpop.eup %5851  ;;  %v1704_v5 = vadd.f32 1.0, %v5850_v20  ;;  %5871 = vrcp.f32 %v1702_v59  ;;  %v1662_v59 = vadd.f32 %v1598_v2, %v7483_v16  ;;  %v1670_v30 = vadd.f32 %v1606_v33, %v7505_v39 }
 0x2d7   : > { %v5854_v48 = vpop.eup %5853  ;;  %5873 = vrcp.f32 %v1703_v23  ;;  %v5306_v23 = vmul.f32 -1.442695, %v1650_v32  ;;  %v5308_v28 = vmul.f32 -1.442695, %v1658_v37  ;;  %v1592_v7 = vrot.slane %v7753_v24, 2 }
 0x2d8   : > { %v5856_v55 = vpop.eup %5855  ;;  %5875 = vrcp.f32 %v1704_v5  ;;  %v5307_v5 = vmul.f32 -1.442695, %v1654_v22  ;;  %v1596_v2 = vrot.slane %v7753_v24, 3  ;;  %v1644_v13 = vadd.f32 %v1584_v46, %v9261_v31 }
 0x2d9   : > { %v5858_v27 = vpop.eup %5857  ;;  %5877 = vtanh.f32 %v1663_v45  ;;  %v5309_v33 = vmul.f32 -1.442695, %v1662_v59  ;;  %v1648_v32 = vadd.f32 %v7753_v24, %v7445_v49  ;;  %v5310_v37 = vmul.f32 -1.442695, %v1666_v52 }
 0x2da   : > { %v5860_v20 = vpop.eup %5859  ;;  %5879 = vtanh.f32 %v1667_v50  ;;  %v5311_v46 = vmul.f32 -1.442695, %v1670_v30  ;;  %v1660_v59 = vadd.f32 %v1596_v2, %v7480_v14  ;;  %v5312_v49 = vmul.f32 -1.442695, %v1644_v13 }
 0x2db   : > { %v5862_v15 = vpop.eup %5861  ;;  %5881 = vtanh.f32 %v1671_v34 }
 0x2dc   : > { %v5864_v62 = vpop.eup %5863  ;;  %v7798_v45 = vmul.f32 %v5862_v15, %v5854_v48  ;;  %5883 = vpow2.f32 %v5304_v38  ;;  %v1652_v48 = vadd.f32 %v1588_v26, %v7458_v60 }
 0x2dd   : > { %v5866_v50 = vpop.eup %5865  ;;  %v7802_v25 = vmul.f32 %v5864_v62, %v5852_v61  ;;  %5885 = vpow2.f32 %v5305_v53  ;;  %v1656_v62 = vadd.f32 %v1592_v7, %v7467_v1  ;;  %v5316_v7 = vmul.f32 -1.442695, %v1660_v59 }
 0x2de   : > { %v5868_v34 = vpop.eup %5867  ;;  %v7806_v22 = vmul.f32 %v5866_v50, %v5856_v55  ;;  %5887 = vpow2.f32 %v5306_v23  ;;  %v5313_v23 = vmul.f32 -1.442695, %v1648_v32  ;;  %v5314_v26 = vmul.f32 -1.442695, %v1652_v48 }
 0x2df   : > { %v5870_v38 = vpop.eup %5869  ;;  %v7809_v15 = vmul.f32 %v5868_v34, %v5858_v27  ;;  %5889 = vpow2.f32 %v5307_v5  ;;  %v5315_v27 = vmul.f32 -1.442695, %v1656_v62  ;;  %v1608_v48 = vrot.slane %v7753_v24, 6 }
 0x2e0   : > { %v5872_v61 = vpop.eup %5871  ;;  %v7812_v53 = vmul.f32 %v5870_v38, %v5860_v20  ;;  %5891 = vpow2.f32 %v5308_v28  ;;  %v1600_v28 = vrot.slane %v7753_v24, 4 }
 0x2e1   : > { %v5874_v55 = vpop.eup %5873  ;;  %5893 = vpow2.f32 %v5309_v33  ;;  %v1604_v33 = vrot.slane %v7753_v24, 5 }
 0x2e2   : > { %v5876_v52 = vpop.eup %5875  ;;  %5895 = vpow2.f32 %v5310_v37 }
 0x2e3   : > { %v5878_v50 = vpop.eup %5877  ;;  %5897 = vpow2.f32 %v5311_v46 }
 0x2e4   : > { %v5880_v5 = vpop.eup %5879  ;;  %v7815_v30 = vmul.f32 %v5878_v50, %v5872_v61  ;;  %5899 = vpow2.f32 %v5312_v49  ;;  %v1664_v61 = vadd.f32 %v1600_v28, %v7489_v19 }
 0x2e5   : > { %v5882_v20 = vpop.eup %5881  ;;  %5901 = vpow2.f32 %v5313_v23  ;;  %v7818_v2 = vmul.f32 %v5880_v5, %v5874_v55  ;;  %v9262_v23 = vld [vmem:[#allocation32_spill] sm:$0xff]  ;;  %v9263_v5 = vld [vmem:[#allocation35_spill] sm:$0xff] }
 0x2e6   : > { %v5884_v13 = vpop.eup %5883  ;;  %5903 = vpow2.f32 %v5314_v26  ;;  %v7821_v32 = vmul.f32 %v5882_v20, %v5876_v52  ;;  %v1668_v26 = vadd.f32 %v1604_v33, %v9262_v23  ;;  %v1672_v20 = vadd.f32 %v1608_v48, %v9263_v5 }
 0x2e7   : > { %v5886_v34 = vpop.eup %5885  ;;  %v1745_v37 = vadd.f32 1.0, %v5884_v13  ;;  %5905 = vpow2.f32 %v5315_v27 }
 0x2e8   : > { %v5888_v38 = vpop.eup %5887  ;;  %v1746_v49 = vadd.f32 1.0, %v5886_v34  ;;  %5907 = vpow2.f32 %v5316_v7  ;;  %v5317_v34 = vmul.f32 -1.442695, %v1664_v61  ;;  %v5318_v28 = vmul.f32 -1.442695, %v1668_v26 }
 0x2e9   : > { %v5890_v46 = vpop.eup %5889  ;;  %v1747_v62 = vadd.f32 1.0, %v5888_v38  ;;  %5909 = vrcp.f32 %v1745_v37  ;;  %v1827_v26 = vrot.slane %v7618_v57, 1 }
 0x2ea   : > { %v5892_v59 = vpop.eup %5891  ;;  %v1748_v55 = vadd.f32 1.0, %v5890_v46  ;;  %5911 = vrcp.f32 %v1746_v49  ;;  %v5319_v49 = vmul.f32 -1.442695, %v1672_v20 }
 0x2eb   : > { %v5894_v52 = vpop.eup %5893  ;;  %v1749_v50 = vadd.f32 1.0, %v5892_v59  ;;  %5913 = vrcp.f32 %v1747_v62 }
 0x2ec   : > { %v5896_v24 = vpop.eup %5895  ;;  %v1750_v27 = vadd.f32 1.0, %v5894_v52  ;;  %5915 = vrcp.f32 %v1748_v55  ;;  %v1826_v55 = vrot.slane %v7618_v57, 7 }
 0x2ed   : > { %v5898_v13 = vpop.eup %5897  ;;  %v1751_v7 = vadd.f32 1.0, %v5896_v24  ;;  %5917 = vrcp.f32 %v1749_v50 }
 0x2ee   : > { %v5900_v37 = vpop.eup %5899  ;;  %v1752_v38 = vadd.f32 1.0, %v5898_v13  ;;  %5919 = vrcp.f32 %v1750_v27 }
 0x2ef   : > { %v5902_v46 = vpop.eup %5901  ;;  %5921 = vrcp.f32 %v1751_v7  ;;  %v1801_v59 = vadd.f32 1.0, %v5900_v37  ;;  %v1828_v7 = vrot.slane %v7618_v57, 2 }
 0x2f0   : > { %v5904_v33 = vpop.eup %5903  ;;  %5923 = vrcp.f32 %v1752_v38  ;;  %v1802_v48 = vadd.f32 1.0, %v5902_v46 }
 0x2f1   : > { %v5906_v62 = vpop.eup %5905  ;;  %5925 = vpow2.f32 %v5317_v34  ;;  %v1803_v52 = vadd.f32 1.0, %v5904_v33  ;;  %v1829_v34 = vrot.slane %v7618_v57, 3 }
 0x2f2   : > { %v5908_v5 = vpop.eup %5907  ;;  %5927 = vpow2.f32 %v5318_v28  ;;  %v1804_v61 = vadd.f32 1.0, %v5906_v62 }
 0x2f3   : > { %v5910_v50 = vpop.eup %5909  ;;  %5929 = vpow2.f32 %v5319_v49  ;;  %v1805_v13 = vadd.f32 1.0, %v5908_v5  ;;  %v1830_v49 = vrot.slane %v7618_v57, 4 }
 0x2f4   : > { %v5912_v24 = vpop.eup %5911  ;;  %v1841_v27 = vmul.f32 %v5910_v50, %v1826_v55  ;;  %5931 = vrcp.f32 %v1801_v59  ;;  %v1831_v59 = vrot.slane %v7618_v57, 5 }
 0x2f5   : > { %v5914_v20 = vpop.eup %5913  ;;  %v1842_v37 = vmul.f32 %v5912_v24, %v7618_v57  ;;  %5933 = vrcp.f32 %v1802_v48 }
 0x2f6   : > { %v5916_v38 = vpop.eup %5915  ;;  %v1843_v28 = vmul.f32 %v5914_v20, %v1827_v26  ;;  %v1857_v46 = vadd.f32 %v7802_v25, %v1841_v27  ;;  %5935 = vrcp.f32 %v1803_v52  ;;  %v1832_v25 = vrot.slane %v7618_v57, 6 }
 0x2f7   : > { %v5918_v33 = vpop.eup %5917  ;;  %v1844_v62 = vmul.f32 %v5916_v38, %v1828_v7  ;;  %v1858_v5 = vadd.f32 %v7798_v45, %v1842_v37  ;;  %5937 = vrcp.f32 %v1804_v61 }
 0x2f8   : > { %v5920_v55 = vpop.eup %5919  ;;  %v1845_v50 = vmul.f32 %v5918_v33, %v1829_v34  ;;  %v1859_v23 = vadd.f32 %v7806_v22, %v1843_v28  ;;  %v1984_v24 = vrot.slane %v1857_v46, 1  ;;  %5939 = vrcp.f32 %v1805_v13 }
 0x2f9   : > { %v5922_v48 = vpop.eup %5921  ;;  %5941 = vtanh.f32 %v1858_v5  ;;  %v1846_v52 = vmul.f32 %v5920_v55, %v1830_v49  ;;  %v1860_v26 = vadd.f32 %v7809_v15, %v1844_v62 }
 0x2fa   : > { %v5924_v27 = vpop.eup %5923  ;;  %v1985_v20 = vsel %vm1381_vm1, %v1858_v5, %v1984_v24  ;;  %v1986_v45 = vrot.slane %v1859_v23, 7  ;;  %v1847_v61 = vmul.f32 %v5922_v48, %v1831_v59  ;;  %v1861_v7 = vadd.f32 %v7812_v53, %v1845_v50 }
 0x2fb   : > { %v5926_v37 = vpop.eup %5925  ;;  %v1848_v34 = vmul.f32 %v5924_v27, %v1832_v25  ;;  %v1862_v22 = vadd.f32 %v7815_v30, %v1846_v52  ;;  %5943 = vtanh.f32 %v1857_v46  ;;  %v1988_v13 = vrot.slane %v1860_v26, 6 }
 0x2fc   : > { %v5928_v38 = vpop.eup %5927  ;;  %v1987_v28 = vsel %vm1384_vm2, %v1986_v45, %v1985_v20  ;;  %v1806_v33 = vadd.f32 1.0, %v5926_v37  ;;  %v1863_v49 = vadd.f32 %v7818_v2, %v1847_v61  ;;  %5945 = vtanh.f32 %v1859_v23 }
 0x2fd   : > { %v5930_v15 = vpop.eup %5929  ;;  %v1807_v62 = vadd.f32 1.0, %v5928_v38  ;;  %v1864_v5 = vadd.f32 %v7821_v32, %v1848_v34  ;;  %5947 = vtanh.f32 %v1860_v26  ;;  %v1989_v53 = vsel %vm1387_vm3, %v1988_v13, %v1987_v28  ;;  %v1883_v26 = vpop.permute.xlu1 %1882 }
 0x2fe   : > { %v5932_v59 = vpop.eup %5931  ;;  %v1808_v55 = vadd.f32 1.0, %v5930_v15  ;;  %5949 = vrcp.f32 %v1806_v33  ;;  %v1990_v30 = vrot.slane %v1861_v7, 5  ;;  %v1992_v50 = vrot.slane %v1862_v22, 4 }
 0x2ff   : > { %v5934_v46 = vpop.eup %5933  ;;  %5951 = vrcp.f32 %v1807_v62  ;;  %v1994_v2 = vrot.slane %v1863_v49, 3  ;;  %v1996_v32 = vrot.slane %v1864_v5, 2  ;;  %vm1884_vm9 = vcmp.eq.s32.totalorder %v1883_v26, 1 }
 0x300   : > { %v5936_v24 = vpop.eup %5935  ;;  %5953 = vrcp.f32 %v1808_v55  ;;  %v1991_v48 = vsel %vm1390_vm4, %v1990_v30, %v1989_v53 }
 0x301   : > { %v5938_v23 = vpop.eup %5937  ;;  %5955 = vtanh.f32 %v1861_v7  ;;  %v1993_v25 = vsel %vm1393_vm5, %v1992_v50, %v1991_v48 }
 0x302   : > { %v5940_v52 = vpop.eup %5939  ;;  %5957 = vtanh.f32 %v1862_v22  ;;  %v1995_v27 = vsel %vm1396_vm6, %v1994_v2, %v1993_v25 }
 0x303   : > { %v5942_v20 = vpop.eup %5941  ;;  %5959 = vtanh.f32 %v1863_v49  ;;  %v1997_v45 = vsel %vm1399_vm7, %v1996_v32, %v1995_v27 }
 0x304   : > { %5961 = vtanh.f32 %v1864_v5  ;;  %v1874_v61 = vmul.f32 %v5942_v20, %v5934_v46  ;;  %v7852_v37 = vsel %vm1884_vm9, %v1997_v45, %v7618_v57 }
 0x305   : > { %v5944_v7 = vpop.eup %5943 }
 0x306   : > { %v5946_v34 = vpop.eup %5945  ;;  %v1873_v13 = vmul.f32 %v5944_v7, %v5932_v59 }
 0x307   : > { %v5948_v38 = vpop.eup %5947  ;;  %v1875_v28 = vmul.f32 %v5946_v34, %v5936_v24 }
 0x308   : > { %v5950_v33 = vpop.eup %5949  ;;  %v1876_v22 = vmul.f32 %v5948_v38, %v5938_v23  ;;  %v1893_v15 = vrot.slane %v1873_v13, 1 }
 0x309   : > { %v5952_v62 = vpop.eup %5951  ;;  %v1895_v53 = vrot.slane %v1875_v28, 7 }
 0x30a   : > { %v5954_v55 = vpop.eup %5953  ;;  %v1894_v49 = vsel %vm1381_vm1, %v1874_v61, %v1893_v15  ;;  %v1897_v30 = vrot.slane %v1876_v22, 6 }
 0x30b   : > { %v5956_v5 = vpop.eup %5955  ;;  %v1896_v46 = vsel %vm1384_vm2, %v1895_v53, %v1894_v49 }
 0x30c   : > { %v5958_v50 = vpop.eup %5957  ;;  %v1877_v57 = vmul.f32 %v5956_v5, %v5940_v52  ;;  %v1898_v48 = vsel %vm1387_vm3, %v1897_v30, %v1896_v46  ;;  %v9266_v46 = vld [vmem:[#allocation38_spill] sm:$0xff] }
 0x30d   : > { %v5960_v2 = vpop.eup %5959  ;;  %v1878_v59 = vmul.f32 %v5958_v50, %v5950_v33  ;;  %v9267_v50 = vld [vmem:[#allocation39_spill] sm:$0xff] }
 0x30e   : > { %v5962_v25 = vpop.eup %5961  ;;  %v1879_v24 = vmul.f32 %v5960_v2, %v5952_v62  ;;  %v1899_v32 = vrot.slane %v1877_v57, 5  ;;  %v9268_v57 = vld [vmem:[#allocation40_spill] sm:$0xff] }
 0x30f   : > { %v1880_v23 = vmul.f32 %v5962_v25, %v5954_v55  ;;  %v1901_v27 = vrot.slane %v1878_v59, 4  ;;  %v9272_v2 = vld [vmem:[#allocation44_spill] sm:$0xff]  ;;  %v9274_v59 = vld [vmem:[#allocation46_spill] sm:$0xff]  ;;  %v9275_v25 = vld [vmem:[#allocation47_spill] sm:$0xff] }
 0x310   : > { %v1900_v20 = vsel %vm1390_vm4, %v1899_v32, %v1898_v48  ;;  %v1903_v45 = vrot.slane %v1879_v24, 3  ;;  %v9269_v48 = vld [vmem:[#allocation41_spill] sm:$0xff]  ;;  %v9276_v24 = vld [vmem:[#allocation48_spill] sm:$0xff] }
 0x311   : > { %v1902_v61 = vsel %vm1393_vm5, %v1901_v27, %v1900_v20  ;;  %v1905_v7 = vrot.slane %v1880_v23, 2  ;;  %v9277_v32 = vld [vmem:[#allocation49_spill] sm:$0xff]  ;;  %v9278_v23 = vld [vmem:[#allocation50_spill] sm:$0xff]  ;;  %v9279_v27 = vld [vmem:[#allocation51_spill] sm:$0xff] }
 0x312   : > { %v1904_v34 = vsel %vm1396_vm6, %v1903_v45, %v1902_v61  ;;  %v9280_v20 = vld [vmem:[#allocation52_spill] sm:$0xff]  ;;  %v9281_v45 = vld [vmem:[#allocation53_spill] sm:$0xff]  ;;  %v9282_v61 = vld [vmem:[#allocation54_spill] sm:$0xff] }
 0x313   : > { %v1906_v52 = vsel %vm1399_vm7, %v1905_v7, %v1904_v34  ;;  %v9283_v7 = vld [vmem:[#allocation55_spill] sm:$0xff]  ;;  %v9284_v34 = vld [vmem:[#allocation56_spill] sm:$0xff] }
 0x314   : > { %v1908_v13 = vsel %vm1884_vm9, %v1906_v52, 0.0  ;;  %v7864_v38 = vsel %vm1884_vm9, %v1906_v52, %v7633_v0  ;;  %v9285_v52 = vld [vmem:[#allocation57_spill] sm:$0xff] }
 0x315   : > { %v1910_v28 = vcombine.high %v1908_v13, %v1908_v13  ;;  %v1917_v33 = vrot.slane %v1908_v13, %v7626_v8  ;;  %v2000_v22 = vpack.c.bf16 %v7864_v38, %v7864_v38  ;;  %v9286_v13 = vld [vmem:[#allocation58_spill] sm:$0xff] }
 0x317   : > { %v1924_v15 = vrot.slane %v1910_v28, %v7626_v8  ;;  %v1925_v62 = vcombine.high %v1917_v33, %v1917_v33  ;;  %v1933_v53 = vrot.slane %v1917_v33, %v7626_v8  ;;  %5320 = vst.sshfl [vmem:[%s7296_s16 + $0x1] sm:$0x1 pattern:$0x73625140] %v1917_v33  ;;  %2034 = vmatmul.mubr.bf16.vlgmr.msra.gmra.mrb[24].mxu0 %v2000_v22  ;;  %v9287_v28 = vld [vmem:[#allocation59_spill] sm:$0xff]  ;;  %v9288_v33 = vld [vmem:[#allocation60_spill] sm:$0xff] }
 0x318   : > { %2075 = vmatmul.mubr.bf16.vlgmr.msra.gmra.mrb[24].mxu1 %v2000_v22  ;;  %2508 = vmatpush1.bf16.msra.mxu0 %v7641_v36 }
 0x319   : > { %2549 = vmatpush1.bf16.msra.mxu1 %v7644_v9  ;;  %v1926_v0 = vcombine.high %v1924_v15, %v1924_v15  ;;  %v1940_v26 = vrot.slane %v1924_v15, %v7626_v8  ;;  %v1947_v55 = vrot.slane %v1925_v62, %v7626_v8  ;;  %v1955_v49 = vcombine.high %v1933_v53, %v1933_v53 }
 0x31a   : > { %5321 = vst.sshfl [vmem:[%s7296_s16 + $0x9] sm:$0x1 pattern:$0x73625140] %v1925_v62  ;;  %2509 = vmatprep.subr.bf16.mxu0 %v7651_v3  ;;  %2550 = vmatprep.subr.bf16.mxu1 %v7654_v18  ;;  %v9264_v3 = vld [vmem:[#allocation36_spill] sm:$0xff]  ;;  %v9265_v18 = vld [vmem:[#allocation37_spill] sm:$0xff] }
 0x31b   : > { %5322 = vst.sshfl [vmem:[%s7296_s16 + $0x21] sm:$0x1 pattern:$0x73625140] %v1924_v15  ;;  %2539 = vmatprep.mubr.bf16.mxu0 %v9235_v43  ;;  %v1954_v36 = vrot.slane %v1926_v0, %v7626_v8  ;;  %v1956_v9 = vcombine.high %v1940_v26, %v1940_v26  ;;  %v1957_v30 = vcombine.high %v1947_v55, %v1947_v55  ;;  %1969 = vst [vmem:[%s7296_s16 + $0x11] sm:$0x1] %v1955_v49 }
 0x31c   : > { %5323 = vst.sshfl [vmem:[%s7296_s16 + $0x29] sm:$0x1 pattern:$0x73625140] %v1926_v0  ;;  %2580 = vmatprep.mubr.bf16.mxu1 %v9235_v43  ;;  %2510 = vmatpush1.bf16.msra.mxu0 %v7662_v44  ;;  %v9270_v44 = vld [vmem:[#allocation42_spill] sm:$0xff] }
 0x31d   : > { %2551 = vmatpush1.bf16.msra.mxu1 %v7665_v11  ;;  %v1958_v5 = vcombine.high %v1954_v36, %v1954_v36  ;;  %1970 = vst [vmem:[%s7296_s16 + $0x19] sm:$0x1] %v1957_v30  ;;  %1973 = vst [vmem:[%s7296_s16 + $0x31] sm:$0x1] %v1956_v9  ;;  %2511 = vmatprep.subr.bf16.mxu0 %v7670_v6  ;;  %v9271_v11 = vld [vmem:[#allocation43_spill] sm:$0xff]  ;;  %v9273_v6 = vld [vmem:[#allocation45_spill] sm:$0xff] }
 0x31e   : > { %2552 = vmatprep.subr.bf16.mxu1 %v9264_v3 }
 0x31f   : > { %1974 = vst [vmem:[%s7296_s16 + $0x39] sm:$0x1] %v1958_v5 }
 0x320   : > { %2512 = vmatpush1.bf16.msra.mxu0 %v9265_v18 }
 0x321   : > { %2553 = vmatpush1.bf16.msra.mxu1 %v9266_v46  ;;  %2513 = vmatprep.subr.bf16.mxu0 %v9267_v50 }
 0x322   : > { %2554 = vmatprep.subr.bf16.mxu1 %v9268_v57 }
 0x324   : > { %2514 = vmatpush1.bf16.msra.mxu0 %v9269_v48 }
 0x325   : > { %2555 = vmatpush1.bf16.msra.mxu1 %v9270_v44  ;;  %2515 = vmatprep.subr.bf16.mxu0 %v9271_v11 }
 0x326   : > { %2556 = vmatprep.subr.bf16.mxu1 %v9272_v2 }
 0x328   : > { %2516 = vmatpush1.bf16.msra.mxu0 %v9273_v6 }
 0x329   : > { %2557 = vmatpush1.bf16.msra.mxu1 %v9274_v59  ;;  %2517 = vmatprep.subr.bf16.mxu0 %v9275_v25 }
 0x32a   : > { %2558 = vmatprep.subr.bf16.mxu1 %v9276_v24 }
 0x32c   : > { %2518 = vmatpush1.bf16.msra.mxu0 %v9277_v32 }
 0x32d   : > { %2559 = vmatpush1.bf16.msra.mxu1 %v9278_v23  ;;  %2519 = vmatprep.subr.bf16.mxu0 %v9279_v27 }
 0x32e   : > { %2560 = vmatprep.subr.bf16.mxu1 %v9280_v20 }
 0x330   : > { %2520 = vmatpush1.bf16.msra.mxu0 %v9281_v45 }
 0x331   : > { %2561 = vmatpush1.bf16.msra.mxu1 %v9282_v61  ;;  %2521 = vmatprep.subr.bf16.mxu0 %v9283_v7 }
 0x332   : > { %2562 = vmatprep.subr.bf16.mxu1 %v9284_v34 }
 0x334   : > { %2522 = vmatpush1.bf16.msra.mxu0 %v9285_v52 }
 0x335   : > { %2563 = vmatpush1.bf16.msra.mxu1 %v9286_v13  ;;  %3013 = vmatprep.subr.bf16.mxu0 %v9287_v28 }
 0x336   : > { %3054 = vmatprep.subr.bf16.mxu1 %v9288_v33 }
 0x3ea   : > { %v2035_v22 = vpop.f32.mrb[24].mxu0 }
 0x3eb   : > { %v7916_v15 = vpop.f32.mrb[24].mxu1  ;;  %v2087_v62 = vrot.slane %v2035_v22, 6  ;;  %v2091_v53 = vrot.slane %v2035_v22, 7  ;;  %v2095_v0 = vrot.slane %v2035_v22, 1  ;;  %v2099_v26 = vrot.slane %v2035_v22, 2  ;;  %v7918_v55 = vpop.f32.mrb[25].mxu0 }
 0x3ec   : > { %v7920_v49 = vpop.f32.mrb[25].mxu1  ;;  %v2103_v36 = vrot.slane %v2035_v22, 3  ;;  %v2107_v9 = vrot.slane %v2035_v22, 4  ;;  %v2111_v30 = vrot.slane %v2035_v22, 5  ;;  %v2155_v5 = vadd.f32 %v2035_v22, %v7447_v51  ;;  %v2039_v3 = vpop.f32.mrb[26].mxu0 }
 0x3ed   : > { %v2080_v18 = vpop.f32.mrb[26].mxu1  ;;  %v2147_v46 = vadd.f32 %v2087_v62, %v7425_v35  ;;  %v2151_v50 = vadd.f32 %v2091_v53, %v7433_v42  ;;  %v2159_v57 = vadd.f32 %v2095_v0, %v7455_v58  ;;  %v2163_v48 = vadd.f32 %v2099_v26, %v7469_v4  ;;  %v2040_v44 = vpop.f32.mrb[27].mxu0 }
 0x3ee   : > { %v2081_v11 = vpop.f32.mrb[27].mxu1  ;;  %v2167_v2 = vadd.f32 %v2103_v36, %v7477_v12  ;;  %v2171_v6 = vadd.f32 %v2107_v9, %v7491_v21  ;;  %v5326_v59 = vmul.f32 -1.442695, %v2155_v5  ;;  %v2175_v25 = vadd.f32 %v2111_v30, %v7499_v29 }
 0x3ef   : > { %v5324_v24 = vmul.f32 -1.442695, %v2147_v46  ;;  %v5325_v32 = vmul.f32 -1.442695, %v2151_v50  ;;  %v5327_v23 = vmul.f32 -1.442695, %v2159_v57  ;;  %v2157_v22 = vadd.f32 %v7916_v15, %v7453_v56 }
 0x3f0   : > { %5963 = vpow2.f32 %v5326_v59  ;;  %v5328_v27 = vmul.f32 -1.442695, %v2163_v48  ;;  %v5329_v20 = vmul.f32 -1.442695, %v2167_v2  ;;  %v2089_v45 = vrot.slane %v7916_v15, 6 }
 0x3f1   : > { %5965 = vpow2.f32 %v5324_v24  ;;  %v2093_v61 = vrot.slane %v7916_v15, 7  ;;  %v5330_v7 = vmul.f32 -1.442695, %v2171_v6  ;;  %v5331_v34 = vmul.f32 -1.442695, %v2175_v25  ;;  %v9289_v6 = vld [vmem:[#allocation31_spill] sm:$0xff] }
 0x3f2   : > { %5967 = vpow2.f32 %v5325_v32  ;;  %v2097_v52 = vrot.slane %v7916_v15, 1  ;;  %v2101_v13 = vrot.slane %v7916_v15, 2  ;;  %v2149_v28 = vadd.f32 %v2089_v45, %v7431_v40  ;;  %v9290_v45 = vld [vmem:[#allocation20_spill] sm:$0xff] }
 0x3f3   : > { %5969 = vpow2.f32 %v5327_v23  ;;  %v2153_v33 = vadd.f32 %v2093_v61, %v7442_v47  ;;  %v2105_v26 = vrot.slane %v7916_v15, 3  ;;  %v2109_v36 = vrot.slane %v7916_v15, 4 }
 0x3f4   : > { %5971 = vpow2.f32 %v5328_v27  ;;  %v2161_v62 = vadd.f32 %v2097_v52, %v7464_v63  ;;  %v2165_v53 = vadd.f32 %v2101_v13, %v7475_v10  ;;  %v2088_v18 = vrot.slane %v7918_v55, 6  ;;  %v9291_v13 = vld [vmem:[#allocation22_spill] sm:$0xff] }
 0x3f5   : > { %5973 = vpow2.f32 %v5329_v20  ;;  %v2113_v57 = vrot.slane %v7916_v15, 5  ;;  %v2092_v48 = vrot.slane %v7918_v55, 7  ;;  %v2169_v2 = vadd.f32 %v2105_v26, %v7486_v17 }
 0x3f6   : > { %5975 = vpow2.f32 %v5330_v7  ;;  %v2173_v59 = vadd.f32 %v2109_v36, %v9289_v6  ;;  %v2096_v32 = vrot.slane %v7918_v55, 1  ;;  %v2100_v23 = vrot.slane %v7918_v55, 2  ;;  %v9292_v36 = vld [vmem:[#allocation25_spill] sm:$0xff] }
 0x3f7   : > { %5977 = vpow2.f32 %v5331_v34  ;;  %v2104_v15 = vrot.slane %v7918_v55, 3  ;;  %v2148_v61 = vadd.f32 %v2088_v18, %v9290_v45  ;;  %v2108_v52 = vrot.slane %v7918_v55, 4 }
 0x3f8   : > { %5979 = vtanh.f32 %v2149_v28  ;;  %v2152_v28 = vadd.f32 %v2092_v48, %v9291_v13  ;;  %v2177_v26 = vadd.f32 %v2113_v57, %v7508_v41 }
 0x3f9   : > { %5981 = vtanh.f32 %v2153_v33  ;;  %v5332_v18 = vmul.f32 -1.442695, %v2148_v61  ;;  %v2168_v48 = vadd.f32 %v2104_v15, %v7483_v16  ;;  %v2098_v61 = vrot.slane %v7920_v49, 1 }
 0x3fa   : > { %v5964_v0 = vpop.eup %5963  ;;  %5983 = vtanh.f32 %v2157_v22  ;;  %v2102_v15 = vrot.slane %v7920_v49, 2 }
 0x3fb   : > { %v5966_v9 = vpop.eup %5965  ;;  %v2205_v30 = vadd.f32 1.0, %v5964_v0  ;;  %5985 = vtanh.f32 %v2161_v62  ;;  %v2112_v62 = vrot.slane %v7918_v55, 5 }
 0x3fc   : > { %v5968_v5 = vpop.eup %5967  ;;  %v2203_v3 = vadd.f32 1.0, %v5966_v9  ;;  %5987 = vtanh.f32 %v2165_v53  ;;  %v2156_v53 = vadd.f32 %v7918_v55, %v7450_v54  ;;  %v2160_v9 = vadd.f32 %v2096_v32, %v9292_v36 }
 0x3fd   : > { %v5970_v46 = vpop.eup %5969  ;;  %v2204_v50 = vadd.f32 1.0, %v5968_v5  ;;  %5989 = vrcp.f32 %v2205_v30  ;;  %v9293_v30 = vld [vmem:[#allocation26_spill] sm:$0xff]  ;;  %v2094_v55 = vrot.slane %v7920_v49, 7 }
 0x3fe   : > { %v5972_v44 = vpop.eup %5971  ;;  %v2206_v11 = vadd.f32 1.0, %v5970_v46  ;;  %5991 = vrcp.f32 %v2203_v3  ;;  %v2164_v5 = vadd.f32 %v2100_v23, %v9293_v30  ;;  %v2090_v46 = vrot.slane %v7920_v49, 6 }
 0x3ff   : > { %v5974_v25 = vpop.eup %5973  ;;  %v2207_v24 = vadd.f32 1.0, %v5972_v44  ;;  %5993 = vrcp.f32 %v2204_v50  ;;  %v5333_v44 = vmul.f32 -1.442695, %v2152_v28  ;;  %v5334_v32 = vmul.f32 -1.442695, %v2156_v53 }
 0x400   : > { %v5976_v27 = vpop.eup %5975  ;;  %v2208_v20 = vadd.f32 1.0, %v5974_v25  ;;  %5995 = vrcp.f32 %v2206_v11  ;;  %v9294_v25 = vld [vmem:[#allocation30_spill] sm:$0xff] }
 0x401   : > { %v5978_v7 = vpop.eup %5977  ;;  %v2209_v34 = vadd.f32 1.0, %v5976_v27  ;;  %5997 = vrcp.f32 %v2207_v24  ;;  %v2172_v57 = vadd.f32 %v2108_v52, %v9294_v25  ;;  %v2176_v24 = vadd.f32 %v2112_v62, %v7505_v39 }
 0x402   : > { %v5980_v33 = vpop.eup %5979  ;;  %v2210_v22 = vadd.f32 1.0, %v5978_v7  ;;  %5999 = vrcp.f32 %v2208_v20  ;;  %v5335_v27 = vmul.f32 -1.442695, %v2160_v9  ;;  %v5336_v20 = vmul.f32 -1.442695, %v2164_v5 }
 0x403   : > { %v5982_v0 = vpop.eup %5981  ;;  %6001 = vrcp.f32 %v2209_v34  ;;  %v2150_v34 = vadd.f32 %v2090_v46, %v9261_v31  ;;  %v5337_v52 = vmul.f32 -1.442695, %v2168_v48  ;;  %v5338_v9 = vmul.f32 -1.442695, %v2172_v57 }
 0x404   : > { %v5984_v3 = vpop.eup %5983  ;;  %6003 = vrcp.f32 %v2210_v22  ;;  %v9295_v22 = vld [vmem:[#allocation23_spill] sm:$0xff]  ;;  %v2158_v5 = vadd.f32 %v7920_v49, %v7458_v60  ;;  %v5339_v46 = vmul.f32 -1.442695, %v2176_v24  ;;  %v2166_v48 = vadd.f32 %v2102_v15, %v7480_v14 }
 0x405   : > { %v5986_v50 = vpop.eup %5985  ;;  %6005 = vtanh.f32 %v2169_v2  ;;  %v2154_v62 = vadd.f32 %v2094_v55, %v9295_v22 }
 0x406   : > { %v5988_v11 = vpop.eup %5987  ;;  %6007 = vtanh.f32 %v2173_v59 }
 0x407   : > { %v5990_v23 = vpop.eup %5989  ;;  %6009 = vtanh.f32 %v2177_v26  ;;  %v5341_v57 = vmul.f32 -1.442695, %v2154_v62 }
 0x408   : > { %v5992_v7 = vpop.eup %5991  ;;  %v7965_v2 = vmul.f32 %v5990_v23, %v5984_v3  ;;  %6011 = vpow2.f32 %v5332_v18 }
 0x409   : > { %v5994_v59 = vpop.eup %5993  ;;  %v7969_v28 = vmul.f32 %v5992_v7, %v5980_v33  ;;  %6013 = vpow2.f32 %v5333_v44  ;;  %v2162_v33 = vadd.f32 %v2098_v61, %v7467_v1  ;;  %v5342_v7 = vmul.f32 -1.442695, %v2158_v5 }
 0x40a   : > { %v5996_v53 = vpop.eup %5995  ;;  %v7972_v26 = vmul.f32 %v5994_v59, %v5982_v0  ;;  %6015 = vpow2.f32 %v5334_v32  ;;  %v5340_v0 = vmul.f32 -1.442695, %v2150_v34  ;;  %v5344_v61 = vmul.f32 -1.442695, %v2166_v48 }
 0x40b   : > { %v5998_v3 = vpop.eup %5997  ;;  %v7976_v18 = vmul.f32 %v5996_v53, %v5986_v50  ;;  %6017 = vpow2.f32 %v5335_v27  ;;  %v5343_v50 = vmul.f32 -1.442695, %v2162_v33  ;;  %v2114_v5 = vrot.slane %v7920_v49, 5 }
 0x40c   : > { %v6000_v23 = vpop.eup %5999  ;;  %v7979_v44 = vmul.f32 %v5998_v3, %v5988_v11  ;;  %6019 = vpow2.f32 %v5336_v20  ;;  %v2106_v20 = vrot.slane %v7920_v49, 3 }
 0x40d   : > { %v6002_v55 = vpop.eup %6001  ;;  %6021 = vpow2.f32 %v5337_v52  ;;  %v2110_v52 = vrot.slane %v7920_v49, 4 }
 0x40e   : > { %v6004_v32 = vpop.eup %6003  ;;  %6023 = vpow2.f32 %v5338_v9  ;;  %v2170_v48 = vadd.f32 %v2106_v20, %v7489_v19 }
 0x40f   : > { %v6006_v59 = vpop.eup %6005  ;;  %6025 = vpow2.f32 %v5339_v46 }
 0x410   : > { %v6008_v27 = vpop.eup %6007  ;;  %v7982_v24 = vmul.f32 %v6006_v59, %v6000_v23  ;;  %6027 = vpow2.f32 %v5340_v0 }
 0x411   : > { %v6010_v11 = vpop.eup %6009  ;;  %6029 = vpow2.f32 %v5341_v57  ;;  %v7985_v15 = vmul.f32 %v6008_v27, %v6002_v55  ;;  %v9296_v57 = vld [vmem:[#allocation32_spill] sm:$0xff]  ;;  %v9297_v27 = vld [vmem:[#allocation35_spill] sm:$0xff] }
 0x412   : > { %v6012_v34 = vpop.eup %6011  ;;  %6031 = vpow2.f32 %v5342_v7  ;;  %v7988_v62 = vmul.f32 %v6010_v11, %v6004_v32  ;;  %v2174_v7 = vadd.f32 %v2110_v52, %v9296_v57  ;;  %v2178_v11 = vadd.f32 %v2114_v5, %v9297_v27 }
 0x413   : > { %v6014_v53 = vpop.eup %6013  ;;  %v2251_v9 = vadd.f32 1.0, %v6012_v34  ;;  %6033 = vpow2.f32 %v5343_v50 }
 0x414   : > { %v6016_v3 = vpop.eup %6015  ;;  %v2252_v46 = vadd.f32 1.0, %v6014_v53  ;;  %6035 = vpow2.f32 %v5344_v61  ;;  %v5345_v53 = vmul.f32 -1.442695, %v2170_v48  ;;  %v5346_v20 = vmul.f32 -1.442695, %v2174_v7 }
 0x415   : > { %v6018_v33 = vpop.eup %6017  ;;  %v2253_v23 = vadd.f32 1.0, %v6016_v3  ;;  %6037 = vrcp.f32 %v2251_v9  ;;  %v2333_v48 = vrot.slane %v7852_v37, 7 }
 0x416   : > { %v6020_v0 = vpop.eup %6019  ;;  %v2254_v55 = vadd.f32 1.0, %v6018_v33  ;;  %6039 = vrcp.f32 %v2252_v46  ;;  %v5347_v46 = vmul.f32 -1.442695, %v2178_v11 }
 0x417   : > { %v6022_v32 = vpop.eup %6021  ;;  %v2255_v59 = vadd.f32 1.0, %v6020_v0  ;;  %6041 = vrcp.f32 %v2253_v23 }
 0x418   : > { %v6024_v49 = vpop.eup %6023  ;;  %v2256_v50 = vadd.f32 1.0, %v6022_v32  ;;  %6043 = vrcp.f32 %v2254_v55  ;;  %v2332_v55 = vrot.slane %v7852_v37, 6 }
 0x419   : > { %v6026_v34 = vpop.eup %6025  ;;  %v2257_v61 = vadd.f32 1.0, %v6024_v49  ;;  %6045 = vrcp.f32 %v2255_v59 }
 0x41a   : > { %v6028_v9 = vpop.eup %6027  ;;  %v2258_v3 = vadd.f32 1.0, %v6026_v34  ;;  %6047 = vrcp.f32 %v2256_v50  ;;  %v2334_v50 = vrot.slane %v7852_v37, 1 }
 0x41b   : > { %v6030_v33 = vpop.eup %6029  ;;  %6049 = vrcp.f32 %v2257_v61  ;;  %v2307_v0 = vadd.f32 1.0, %v6028_v9 }
 0x41c   : > { %v6032_v52 = vpop.eup %6031  ;;  %6051 = vrcp.f32 %v2258_v3  ;;  %v2308_v5 = vadd.f32 1.0, %v6030_v33  ;;  %v2336_v3 = vrot.slane %v7852_v37, 3 }
 0x41d   : > { %v6034_v23 = vpop.eup %6033  ;;  %6053 = vpow2.f32 %v5345_v53  ;;  %v2309_v32 = vadd.f32 1.0, %v6032_v52  ;;  %v2335_v53 = vrot.slane %v7852_v37, 2 }
 0x41e   : > { %v6036_v27 = vpop.eup %6035  ;;  %6055 = vpow2.f32 %v5346_v20  ;;  %v2310_v49 = vadd.f32 1.0, %v6034_v23 }
 0x41f   : > { %v6038_v59 = vpop.eup %6037  ;;  %6057 = vpow2.f32 %v5347_v46  ;;  %v2311_v34 = vadd.f32 1.0, %v6036_v27  ;;  %v2337_v46 = vrot.slane %v7852_v37, 4 }
 0x420   : > { %v6040_v7 = vpop.eup %6039  ;;  %v2347_v11 = vmul.f32 %v6038_v59, %v2332_v55  ;;  %6059 = vrcp.f32 %v2307_v0  ;;  %v2338_v0 = vrot.slane %v7852_v37, 5 }
 0x421   : > { %v6042_v61 = vpop.eup %6041  ;;  %v2348_v9 = vmul.f32 %v6040_v7, %v2333_v48  ;;  %6061 = vrcp.f32 %v2308_v5 }
 0x422   : > { %v6044_v20 = vpop.eup %6043  ;;  %v2349_v33 = vmul.f32 %v6042_v61, %v7852_v37  ;;  %v2363_v52 = vadd.f32 %v7969_v28, %v2347_v11  ;;  %6063 = vrcp.f32 %v2309_v32 }
 0x423   : > { %v6046_v23 = vpop.eup %6045  ;;  %v2350_v57 = vmul.f32 %v6044_v20, %v2334_v50  ;;  %v2364_v27 = vadd.f32 %v7972_v26, %v2348_v9  ;;  %6065 = vrcp.f32 %v2310_v49 }
 0x424   : > { %v6048_v55 = vpop.eup %6047  ;;  %v2351_v59 = vmul.f32 %v6046_v23, %v2335_v53  ;;  %v2365_v5 = vadd.f32 %v7965_v2, %v2349_v33  ;;  %v2490_v48 = vrot.slane %v2363_v52, 2  ;;  %6067 = vrcp.f32 %v2311_v34 }
 0x425   : > { %v6050_v7 = vpop.eup %6049  ;;  %v2491_v61 = vrot.slane %v2364_v27, 1  ;;  %v2352_v19 = vmul.f32 %v6048_v55, %v2336_v3  ;;  %v2366_v28 = vadd.f32 %v7976_v18, %v2350_v57  ;;  %6069 = vtanh.f32 %v2363_v52 }
 0x426   : > { %v6052_v32 = vpop.eup %6051  ;;  %v2353_v11 = vmul.f32 %v6050_v7, %v2337_v46  ;;  %v2367_v50 = vadd.f32 %v7979_v44, %v2351_v59  ;;  %6071 = vtanh.f32 %v2364_v27  ;;  %v2389_v7 = vpop.permute.xlu1 %2388 }
 0x427   : > { %v6054_v26 = vpop.eup %6053  ;;  %v2492_v49 = vsel %vm1381_vm1, %v2491_v61, %v2490_v48  ;;  %v2354_v9 = vmul.f32 %v6052_v32, %v2338_v0  ;;  %v2368_v53 = vadd.f32 %v7982_v24, %v2352_v19  ;;  %6073 = vtanh.f32 %v2365_v5 }
 0x428   : > { %v6056_v2 = vpop.eup %6055  ;;  %v2493_v34 = vsel %vm1384_vm2, %v2365_v5, %v2492_v49  ;;  %v2312_v20 = vadd.f32 1.0, %v6054_v26  ;;  %v2369_v3 = vadd.f32 %v7985_v15, %v2353_v11  ;;  %6075 = vtanh.f32 %v2366_v28 }
 0x429   : > { %v6058_v18 = vpop.eup %6057  ;;  %v2313_v57 = vadd.f32 1.0, %v6056_v2  ;;  %v2370_v33 = vadd.f32 %v7988_v62, %v2354_v9  ;;  %6077 = vtanh.f32 %v2367_v50  ;;  %v2494_v44 = vrot.slane %v2366_v28, 7 }
 0x42a   : > { %v6060_v52 = vpop.eup %6059  ;;  %v2314_v46 = vadd.f32 1.0, %v6058_v18  ;;  %6079 = vrcp.f32 %v2312_v20  ;;  %v2496_v23 = vrot.slane %v2367_v50, 6  ;;  %v2498_v24 = vrot.slane %v2368_v53, 5 }
 0x42b   : > { %v6062_v27 = vpop.eup %6061  ;;  %6081 = vrcp.f32 %v2313_v57  ;;  %v2495_v19 = vsel %vm1387_vm3, %v2494_v44, %v2493_v34  ;;  %v2500_v55 = vrot.slane %v2369_v3, 4  ;;  %v2502_v5 = vrot.slane %v2370_v33, 3 }
 0x42c   : > { %v6064_v0 = vpop.eup %6063  ;;  %6083 = vrcp.f32 %v2314_v46  ;;  %v2497_v15 = vsel %vm1390_vm4, %v2496_v23, %v2495_v19  ;;  %vm2390_vm10 = vcmp.eq.s32.totalorder %v2389_v7, 1 }
 0x42d   : > { %v6066_v59 = vpop.eup %6065  ;;  %6085 = vtanh.f32 %v2368_v53  ;;  %v2499_v62 = vsel %vm1393_vm5, %v2498_v24, %v2497_v15 }
 0x42e   : > { %v6068_v48 = vpop.eup %6067  ;;  %6087 = vtanh.f32 %v2369_v3  ;;  %v2501_v61 = vsel %vm1396_vm6, %v2500_v55, %v2499_v62 }
 0x42f   : > { %v6070_v28 = vpop.eup %6069  ;;  %6089 = vtanh.f32 %v2370_v33  ;;  %v2503_v32 = vsel %vm1399_vm7, %v2502_v5, %v2501_v61 }
 0x430   : > { %v6072_v11 = vpop.eup %6071  ;;  %v2379_v50 = vmul.f32 %v6070_v28, %v6060_v52  ;;  %v8019_v26 = vsel %vm2390_vm10, %v2503_v32, %v7852_v37 }
 0x431   : > { %v6074_v49 = vpop.eup %6073  ;;  %v2380_v9 = vmul.f32 %v6072_v11, %v6062_v27 }
 0x432   : > { %v6076_v53 = vpop.eup %6075  ;;  %v2381_v2 = vmul.f32 %v6074_v49, %v6064_v0  ;;  %v2399_v34 = vrot.slane %v2379_v50, 2 }
 0x433   : > { %v6078_v20 = vpop.eup %6077  ;;  %v2382_v3 = vmul.f32 %v6076_v53, %v6066_v59  ;;  %v2400_v18 = vrot.slane %v2380_v9, 1 }
 0x434   : > { %v6080_v57 = vpop.eup %6079  ;;  %v2383_v44 = vmul.f32 %v6078_v20, %v6068_v48 }
 0x435   : > { %v6082_v46 = vpop.eup %6081  ;;  %v2401_v33 = vsel %vm1381_vm1, %v2400_v18, %v2399_v34  ;;  %v2403_v23 = vrot.slane %v2382_v3, 7 }
 0x436   : > { %v6084_v19 = vpop.eup %6083  ;;  %v2402_v52 = vsel %vm1384_vm2, %v2381_v2, %v2401_v33  ;;  %v2405_v24 = vrot.slane %v2383_v44, 6 }
 0x437   : > { %v6086_v37 = vpop.eup %6085  ;;  %v2404_v15 = vsel %vm1387_vm3, %v2403_v23, %v2402_v52  ;;  %v8049_v23 = vld [vmem:[#allocation7 + $0x24] ss:$16 sps:$4 sm:$0xff]  }
 0x438   : > { %v6088_v27 = vpop.eup %6087  ;;  %v2384_v55 = vmul.f32 %v6086_v37, %v6080_v57  ;;  %v2406_v0 = vsel %vm1390_vm4, %v2405_v24, %v2404_v15  ;;  %v8039_v57 = vld [vmem:[#allocation7] ss:$16 sps:$4 sm:$0xff]  }
 0x439   : > { %v6090_v62 = vpop.eup %6089  ;;  %v2385_v59 = vmul.f32 %v6088_v27, %v6082_v46  ;;  %v8060_v15 = vld [vmem:[#allocation7 + $0x20] ss:$16 sps:$4 sm:$0xff]   ;;  %v8063_v27 = vld [vmem:[#allocation7 + $0x28] ss:$16 sps:$4 sm:$0xff]  }
 0x43a   : > { %v2386_v5 = vmul.f32 %v6090_v62, %v6084_v19  ;;  %v2407_v48 = vrot.slane %v2384_v55, 5  ;;  %v8052_v19 = vld [vmem:[#allocation7 + $0x2c] ss:$16 sps:$4 sm:$0xff]  }
 0x43b   : > { %v2409_v61 = vrot.slane %v2385_v59, 4  ;;  %v8071_v62 = vld [vmem:[#allocation7 + $0x4c] ss:$16 sps:$4 sm:$0xff]   ;;  %v8075_v59 = vld [vmem:[#allocation7 + $0x40] ss:$16 sps:$4 sm:$0xff]  }
 0x43c   : > { %v2408_v28 = vsel %vm1393_vm5, %v2407_v48, %v2406_v0  ;;  %v2411_v32 = vrot.slane %v2386_v5, 3  ;;  %v8068_v0 = vld [vmem:[#allocation7 + $0x44] ss:$16 sps:$4 sm:$0xff]   ;;  %9298 = vst [vmem:[#allocation21_spill] sm:$0xff] %v8071_v62  ;;  %9299 = vst [vmem:[#allocation36_spill] sm:$0xff] %v8075_v59 }
 0x43d   : > { %v2410_v11 = vsel %vm1396_vm6, %v2409_v61, %v2408_v28  ;;  %v8078_v5 = vld [vmem:[#allocation7 + $0x48] ss:$16 sps:$4 sm:$0xff]   ;;  %v8081_v48 = vld [vmem:[#allocation7 + $0x64] ss:$16 sps:$4 sm:$0xff]   ;;  %v8084_v61 = vld [vmem:[#allocation7 + $0x6c] ss:$16 sps:$4 sm:$0xff]  }
 0x43e   : > { %v2412_v50 = vsel %vm1399_vm7, %v2411_v32, %v2410_v11  ;;  %9300 = vst [vmem:[#allocation37_spill] sm:$0xff] %v8078_v5  ;;  %9301 = vst [vmem:[#allocation38_spill] sm:$0xff] %v8081_v48  ;;  %v8087_v28 = vld [vmem:[#allocation7 + $0x60] ss:$16 sps:$4 sm:$0xff]   ;;  %v8090_v32 = vld [vmem:[#allocation7 + $0x68] ss:$16 sps:$4 sm:$0xff]  }
 0x43f   : > { %v2414_v49 = vsel %vm2390_vm10, %v2412_v50, 0.0  ;;  %v8031_v9 = vsel %vm2390_vm10, %v2412_v50, %v7864_v38  ;;  %v8042_v38 = vld [vmem:[#allocation7 + $0x8] ss:$16 sps:$4 sm:$0xff]   ;;  %9302 = vst [vmem:[#allocation39_spill] sm:$0xff] %v8084_v61  ;;  %9303 = vst [vmem:[#allocation40_spill] sm:$0xff] %v8087_v28 }
 0x440   : > { %v2416_v53 = vcombine.high %v2414_v49, %v2414_v49  ;;  %v2423_v2 = vrot.slane %v2414_v49, %v7626_v8  ;;  %v2506_v34 = vpack.c.bf16 %v8031_v9, %v8031_v9  ;;  %9304 = vst [vmem:[#allocation41_spill] sm:$0xff] %v8090_v32  ;;  %v8093_v11 = vld [vmem:[#allocation7 + $0x84] ss:$16 sps:$4 sm:$0xff]   ;;  %v8096_v50 = vld [vmem:[#allocation7 + $0x8c] ss:$16 sps:$4 sm:$0xff]  }
 0x441   : > { %9305 = vst [vmem:[#allocation42_spill] sm:$0xff] %v8093_v11  ;;  %9306 = vst [vmem:[#allocation43_spill] sm:$0xff] %v8096_v50  ;;  %v8099_v49 = vld [vmem:[#allocation7 + $0x80] ss:$16 sps:$4 sm:$0xff]  }
 0x442   : > { %v2430_v20 = vrot.slane %v2416_v53, %v7626_v8  ;;  %v2431_v3 = vcombine.high %v2423_v2, %v2423_v2  ;;  %v2439_v18 = vrot.slane %v2423_v2, %v7626_v8  ;;  %5348 = vst.sshfl [vmem:[%s7296_s16 + $0x2] sm:$0x1 pattern:$0x73625140] %v2423_v2  ;;  %2540 = vmatmul.mubr.bf16.vlgmr.msra.gmra.mrb[28].mxu0 %v2506_v34  ;;  %9307 = vst [vmem:[#allocation44_spill] sm:$0xff] %v8099_v49 }
 0x443   : > { %2581 = vmatmul.mubr.bf16.vlgmr.msra.gmra.mrb[28].mxu1 %v2506_v34  ;;  %3014 = vmatpush1.bf16.msra.mxu0 %v8039_v57  ;;  %v8102_v53 = vld [vmem:[#allocation7 + $0x88] ss:$16 sps:$4 sm:$0xff]   ;;  %v8105_v2 = vld [vmem:[#allocation7 + $0xa4] ss:$16 sps:$4 sm:$0xff]   ;;  %v8108_v34 = vld [vmem:[#allocation7 + $0xac] ss:$16 sps:$4 sm:$0xff]  }
 0x444   : > { %3055 = vmatpush1.bf16.msra.mxu1 %v8042_v38  ;;  %v2432_v7 = vcombine.high %v2430_v20, %v2430_v20  ;;  %v2446_v44 = vrot.slane %v2430_v20, %v7626_v8  ;;  %v2453_v46 = vrot.slane %v2431_v3, %v7626_v8  ;;  %v2461_v33 = vcombine.high %v2439_v18, %v2439_v18  ;;  %v8117_v18 = vld [vmem:[#allocation7 + $0xc4] ss:$16 sps:$4 sm:$0xff]  }
 0x445   : > { %5349 = vst.sshfl [vmem:[%s7296_s16 + $0xa] sm:$0x1 pattern:$0x73625140] %v2431_v3  ;;  %3015 = vmatprep.subr.bf16.mxu0 %v8049_v23  ;;  %3056 = vmatprep.subr.bf16.mxu1 %v8052_v19  ;;  %9308 = vst [vmem:[#allocation45_spill] sm:$0xff] %v8102_v53 }
 0x446   : > { %5350 = vst.sshfl [vmem:[%s7296_s16 + $0x22] sm:$0x1 pattern:$0x73625140] %v2430_v20  ;;  %3045 = vmatprep.mubr.bf16.mxu0 %v9235_v43  ;;  %v2460_v52 = vrot.slane %v2432_v7, %v7626_v8  ;;  %v2462_v24 = vcombine.high %v2446_v44, %v2446_v44  ;;  %v2463_v37 = vcombine.high %v2453_v46, %v2453_v46  ;;  %2475 = vst [vmem:[%s7296_s16 + $0x12] sm:$0x1] %v2461_v33 }
 0x447   : > { %5351 = vst.sshfl [vmem:[%s7296_s16 + $0x2a] sm:$0x1 pattern:$0x73625140] %v2432_v7  ;;  %3086 = vmatprep.mubr.bf16.mxu1 %v9235_v43  ;;  %3016 = vmatpush1.bf16.msra.mxu0 %v8060_v15  ;;  %9309 = vst [vmem:[#allocation46_spill] sm:$0xff] %v8105_v2 }
 0x448   : > { %3057 = vmatpush1.bf16.msra.mxu1 %v8063_v27  ;;  %v2464_v55 = vcombine.high %v2460_v52, %v2460_v52  ;;  %2476 = vst [vmem:[%s7296_s16 + $0x1a] sm:$0x1] %v2463_v37  ;;  %2479 = vst [vmem:[%s7296_s16 + $0x32] sm:$0x1] %v2462_v24  ;;  %3017 = vmatprep.subr.bf16.mxu0 %v8068_v0  ;;  %v8111_v20 = vld [vmem:[#allocation7 + $0xa0] ss:$16 sps:$4 sm:$0xff]  }
 0x449   : > { %3058 = vmatprep.subr.bf16.mxu1 %v8071_v62  ;;  %9310 = vst [vmem:[#allocation47_spill] sm:$0xff] %v8108_v34  ;;  %9311 = vst [vmem:[#allocation48_spill] sm:$0xff] %v8111_v20  ;;  %v8114_v3 = vld [vmem:[#allocation7 + $0xa8] ss:$16 sps:$4 sm:$0xff]   ;;  %v8120_v7 = vld [vmem:[#allocation7 + $0xcc] ss:$16 sps:$4 sm:$0xff]  }
 0x44a   : > { %2480 = vst [vmem:[%s7296_s16 + $0x3a] sm:$0x1] %v2464_v55  ;;  %9312 = vst [vmem:[#allocation49_spill] sm:$0xff] %v8114_v3  ;;  %v8123_v44 = vld [vmem:[#allocation7 + $0xc0] ss:$16 sps:$4 sm:$0xff]  }
 0x44b   : > { %3018 = vmatpush1.bf16.msra.mxu0 %v8075_v59  ;;  %9313 = vst [vmem:[#allocation50_spill] sm:$0xff] %v8117_v18  ;;  %9314 = vst [vmem:[#allocation51_spill] sm:$0xff] %v8120_v7  ;;  %v8126_v46 = vld [vmem:[#allocation7 + $0xc8] ss:$16 sps:$4 sm:$0xff]   ;;  %v8129_v33 = vld [vmem:[#allocation7 + $0xe4] ss:$16 sps:$4 sm:$0xff]  }
 0x44c   : > { %3059 = vmatpush1.bf16.msra.mxu1 %v8078_v5  ;;  %3019 = vmatprep.subr.bf16.mxu0 %v8081_v48  ;;  %9315 = vst [vmem:[#allocation52_spill] sm:$0xff] %v8123_v44  ;;  %9316 = vst [vmem:[#allocation53_spill] sm:$0xff] %v8126_v46  ;;  %v8132_v52 = vld [vmem:[#allocation7 + $0xec] ss:$16 sps:$4 sm:$0xff]   ;;  %v8135_v24 = vld [vmem:[#allocation7 + $0xe0] ss:$16 sps:$4 sm:$0xff]  }
 0x44d   : > { %3060 = vmatprep.subr.bf16.mxu1 %v8084_v61  ;;  %9317 = vst [vmem:[#allocation54_spill] sm:$0xff] %v8129_v33  ;;  %9318 = vst [vmem:[#allocation55_spill] sm:$0xff] %v8132_v52  ;;  %v8138_v37 = vld [vmem:[#allocation7 + $0xe8] ss:$16 sps:$4 sm:$0xff]   ;;  %v8141_v55 = vld [vmem:[#allocation7 + $0x4] ss:$16 sps:$4 sm:$0xff]  }
 0x44e   : > { %9319 = vst [vmem:[#allocation56_spill] sm:$0xff] %v8135_v24  ;;  %9320 = vst [vmem:[#allocation57_spill] sm:$0xff] %v8138_v37 }
 0x44f   : > { %3020 = vmatpush1.bf16.msra.mxu0 %v8087_v28  ;;  %9321 = vst [vmem:[#allocation58_spill] sm:$0xff] %v8141_v55 }
 0x450   : > { %3061 = vmatpush1.bf16.msra.mxu1 %v8090_v32  ;;  %3021 = vmatprep.subr.bf16.mxu0 %v8093_v11 }
 0x451   : > { %3062 = vmatprep.subr.bf16.mxu1 %v8096_v50 }
 0x453   : > { %3022 = vmatpush1.bf16.msra.mxu0 %v8099_v49 }
 0x454   : > { %3063 = vmatpush1.bf16.msra.mxu1 %v8102_v53  ;;  %3023 = vmatprep.subr.bf16.mxu0 %v8105_v2 }
 0x455   : > { %3064 = vmatprep.subr.bf16.mxu1 %v8108_v34 }
 0x457   : > { %3024 = vmatpush1.bf16.msra.mxu0 %v8111_v20 }
 0x458   : > { %3065 = vmatpush1.bf16.msra.mxu1 %v8114_v3  ;;  %3025 = vmatprep.subr.bf16.mxu0 %v8117_v18 }
 0x459   : > { %3066 = vmatprep.subr.bf16.mxu1 %v8120_v7 }
 0x45b   : > { %3026 = vmatpush1.bf16.msra.mxu0 %v8123_v44 }
 0x45c   : > { %3067 = vmatpush1.bf16.msra.mxu1 %v8126_v46  ;;  %3027 = vmatprep.subr.bf16.mxu0 %v8129_v33  ;;  %v8144_v46 = vld [vmem:[#allocation7 + $0xc] ss:$16 sps:$4 sm:$0xff]  }
 0x45d   : > { %3068 = vmatprep.subr.bf16.mxu1 %v8132_v52  ;;  %9322 = vst [vmem:[#allocation59_spill] sm:$0xff] %v8144_v46 }
 0x45f   : > { %3028 = vmatpush1.bf16.msra.mxu0 %v8135_v24 }
 0x460   : > { %3069 = vmatpush1.bf16.msra.mxu1 %v8138_v37  ;;  %3519 = vmatprep.subr.bf16.mxu0 %v8141_v55 }
 0x461   : > { %3560 = vmatprep.subr.bf16.mxu1 %v8144_v46 }
 0x515   : > { %v2541_v33 = vpop.f32.mrb[28].mxu0 }
 0x516   : > { %v8147_v44 = vpop.f32.mrb[28].mxu1  ;;  %v2593_v52 = vrot.slane %v2541_v33, 5  ;;  %v2597_v7 = vrot.slane %v2541_v33, 6  ;;  %v2601_v18 = vrot.slane %v2541_v33, 7  ;;  %v2605_v3 = vrot.slane %v2541_v33, 1  ;;  %v8149_v24 = vpop.f32.mrb[29].mxu0 }
 0x517   : > { %v8151_v20 = vpop.f32.mrb[29].mxu1  ;;  %v2609_v37 = vrot.slane %v2541_v33, 2  ;;  %v2613_v34 = vrot.slane %v2541_v33, 3  ;;  %v2617_v2 = vrot.slane %v2541_v33, 4  ;;  %v2665_v55 = vadd.f32 %v2541_v33, %v7455_v58  ;;  %v2545_v53 = vpop.f32.mrb[30].mxu0 }
 0x518   : > { %v2586_v49 = vpop.f32.mrb[30].mxu1  ;;  %v2653_v46 = vadd.f32 %v2593_v52, %v7425_v35  ;;  %v2657_v50 = vadd.f32 %v2597_v7, %v7433_v42  ;;  %v2661_v11 = vadd.f32 %v2601_v18, %v7447_v51  ;;  %v2669_v32 = vadd.f32 %v2605_v3, %v7469_v4  ;;  %v2546_v28 = vpop.f32.mrb[31].mxu0 }
 0x519   : > { %v2587_v61 = vpop.f32.mrb[31].mxu1  ;;  %v2673_v48 = vadd.f32 %v2609_v37, %v7477_v12  ;;  %v2677_v5 = vadd.f32 %v2613_v34, %v7491_v21  ;;  %v5355_v59 = vmul.f32 -1.442695, %v2665_v55  ;;  %v2681_v62 = vadd.f32 %v2617_v2, %v7499_v29 }
 0x51a   : > { %v5352_v33 = vmul.f32 -1.442695, %v2653_v46  ;;  %v5353_v53 = vmul.f32 -1.442695, %v2657_v50  ;;  %v5354_v49 = vmul.f32 -1.442695, %v2661_v11 }
 0x51b   : > { %6091 = vpow2.f32 %v5355_v59  ;;  %v5356_v52 = vmul.f32 -1.442695, %v2669_v32  ;;  %v5357_v7 = vmul.f32 -1.442695, %v2673_v48  ;;  %v2595_v18 = vrot.slane %v8147_v44, 5 }
 0x51c   : > { %6093 = vpow2.f32 %v5352_v33  ;;  %v2599_v3 = vrot.slane %v8147_v44, 6  ;;  %v5358_v61 = vmul.f32 -1.442695, %v2677_v5  ;;  %v2603_v28 = vrot.slane %v8147_v44, 7 }
 0x51d   : > { %6095 = vpow2.f32 %v5353_v53  ;;  %v5359_v34 = vmul.f32 -1.442695, %v2681_v62  ;;  %v2607_v2 = vrot.slane %v8147_v44, 1  ;;  %v2655_v50 = vadd.f32 %v2595_v18, %v7431_v40 }
 0x51e   : > { %6097 = vpow2.f32 %v5354_v49  ;;  %v2659_v59 = vadd.f32 %v2599_v3, %v7442_v47  ;;  %v2663_v48 = vadd.f32 %v2603_v28, %v7453_v56  ;;  %v2667_v32 = vadd.f32 %v8147_v44, %v7464_v63 }
 0x51f   : > { %6099 = vpow2.f32 %v5356_v52  ;;  %v2671_v5 = vadd.f32 %v2607_v2, %v7475_v10  ;;  %v2611_v11 = vrot.slane %v8147_v44, 2  ;;  %v2615_v55 = vrot.slane %v8147_v44, 3 }
 0x520   : > { %6101 = vpow2.f32 %v5357_v7  ;;  %v2619_v49 = vrot.slane %v8147_v44, 4  ;;  %v2594_v52 = vrot.slane %v8149_v24, 5  ;;  %v2598_v3 = vrot.slane %v8149_v24, 6 }
 0x521   : > { %6103 = vpow2.f32 %v5358_v61  ;;  %v2602_v2 = vrot.slane %v8149_v24, 7  ;;  %v2679_v44 = vadd.f32 %v2615_v55, %v9289_v6  ;;  %v2614_v55 = vrot.slane %v8149_v24, 3 }
 0x522   : > { %6105 = vpow2.f32 %v5359_v34  ;;  %v2675_v34 = vadd.f32 %v2611_v11, %v7486_v17  ;;  %v2610_v11 = vrot.slane %v8149_v24, 2 }
 0x523   : > { %6107 = vtanh.f32 %v2655_v50 }
 0x524   : > { %6109 = vtanh.f32 %v2659_v59 }
 0x525   : > { %v6092_v62 = vpop.eup %6091  ;;  %6111 = vtanh.f32 %v2663_v48  ;;  %v2606_v48 = vrot.slane %v8149_v24, 1 }
 0x526   : > { %v6094_v46 = vpop.eup %6093  ;;  %v2712_v37 = vadd.f32 1.0, %v6092_v62  ;;  %6113 = vtanh.f32 %v2667_v32  ;;  %v2683_v62 = vadd.f32 %v2619_v49, %v7508_v41  ;;  %v2618_v49 = vrot.slane %v8149_v24, 4 }
 0x527   : > { %v6096_v33 = vpop.eup %6095  ;;  %v2709_v53 = vadd.f32 1.0, %v6094_v46  ;;  %6115 = vtanh.f32 %v2671_v5  ;;  %v2654_v46 = vadd.f32 %v2594_v52, %v9290_v45  ;;  %v2666_v52 = vadd.f32 %v8149_v24, %v9292_v36 }
 0x528   : > { %v6098_v7 = vpop.eup %6097  ;;  %v2710_v18 = vadd.f32 1.0, %v6096_v33  ;;  %6117 = vrcp.f32 %v2712_v37  ;;  %v2604_v24 = vrot.slane %v8151_v20, 7 }
 0x529   : > { %v6100_v61 = vpop.eup %6099  ;;  %v2711_v28 = vadd.f32 1.0, %v6098_v7  ;;  %6119 = vrcp.f32 %v2709_v53  ;;  %v2658_v53 = vadd.f32 %v2598_v3, %v9291_v13  ;;  %v2596_v3 = vrot.slane %v8151_v20, 5 }
 0x52a   : > { %v6102_v50 = vpop.eup %6101  ;;  %v2713_v59 = vadd.f32 1.0, %v6100_v61  ;;  %6121 = vrcp.f32 %v2710_v18  ;;  %v2662_v61 = vadd.f32 %v2602_v2, %v7450_v54  ;;  %v2600_v2 = vrot.slane %v8151_v20, 6 }
 0x52b   : > { %v6104_v32 = vpop.eup %6103  ;;  %v2714_v5 = vadd.f32 1.0, %v6102_v50  ;;  %6123 = vrcp.f32 %v2711_v28  ;;  %v2670_v28 = vadd.f32 %v2606_v48, %v9293_v30  ;;  %v5361_v41 = vmul.f32 -1.442695, %v2658_v53 }
 0x52c   : > { %v6106_v37 = vpop.eup %6105  ;;  %v2715_v33 = vadd.f32 1.0, %v6104_v32  ;;  %6125 = vrcp.f32 %v2713_v59  ;;  %v5360_v32 = vmul.f32 -1.442695, %v2654_v46  ;;  %v2678_v54 = vadd.f32 %v2614_v55, %v9294_v25 }
 0x52d   : > { %v6108_v7 = vpop.eup %6107  ;;  %v2716_v18 = vadd.f32 1.0, %v6106_v37  ;;  %6127 = vrcp.f32 %v2714_v5  ;;  %v2674_v5 = vadd.f32 %v2610_v11, %v7483_v16  ;;  %v5362_v13 = vmul.f32 -1.442695, %v2662_v61 }
 0x52e   : > { %v6110_v50 = vpop.eup %6109  ;;  %6129 = vrcp.f32 %v2715_v33  ;;  %v2682_v46 = vadd.f32 %v2618_v49, %v7505_v39  ;;  %v5364_v30 = vmul.f32 -1.442695, %v2670_v28  ;;  %v2608_v11 = vrot.slane %v8151_v20, 1 }
 0x52f   : > { %v6112_v59 = vpop.eup %6111  ;;  %6131 = vrcp.f32 %v2716_v18  ;;  %v5363_v18 = vmul.f32 -1.442695, %v2666_v52  ;;  %v2656_v53 = vadd.f32 %v2596_v3, %v9261_v31  ;;  %v5365_v55 = vmul.f32 -1.442695, %v2674_v5 }
 0x530   : > { %v6114_v37 = vpop.eup %6113  ;;  %6133 = vtanh.f32 %v2675_v34  ;;  %v2660_v61 = vadd.f32 %v2600_v2, %v9295_v22  ;;  %v5366_v49 = vmul.f32 -1.442695, %v2678_v54  ;;  %v2664_v52 = vadd.f32 %v2604_v24, %v7458_v60 }
 0x531   : > { %v6116_v33 = vpop.eup %6115  ;;  %6135 = vtanh.f32 %v2679_v44  ;;  %v2672_v3 = vadd.f32 %v2608_v11, %v7480_v14 }
 0x532   : > { %v6118_v48 = vpop.eup %6117  ;;  %6137 = vtanh.f32 %v2683_v62  ;;  %v5369_v54 = vmul.f32 -1.442695, %v2660_v61  ;;  %v5370_v2 = vmul.f32 -1.442695, %v2664_v52 }
 0x533   : > { %v6120_v36 = vpop.eup %6119  ;;  %v8196_v34 = vmul.f32 %v6118_v48, %v6114_v37  ;;  %6139 = vpow2.f32 %v5360_v32  ;;  %v5367_v37 = vmul.f32 -1.442695, %v2682_v46 }
 0x534   : > { %v6122_v44 = vpop.eup %6121  ;;  %v8200_v16 = vmul.f32 %v6120_v36, %v6108_v7  ;;  %6141 = vpow2.f32 %v5361_v41  ;;  %v2668_v36 = vadd.f32 %v8151_v20, %v7467_v1 }
 0x535   : > { %v6124_v62 = vpop.eup %6123  ;;  %v8203_v25 = vmul.f32 %v6122_v44, %v6110_v50  ;;  %6143 = vpow2.f32 %v5362_v13  ;;  %v5368_v50 = vmul.f32 -1.442695, %v2656_v53  ;;  %v2616_v44 = vrot.slane %v8151_v20, 3 }
 0x536   : > { %v6126_v28 = vpop.eup %6125  ;;  %v8206_v32 = vmul.f32 %v6124_v62, %v6112_v59  ;;  %6145 = vpow2.f32 %v5363_v18  ;;  %v5371_v24 = vmul.f32 -1.442695, %v2668_v36  ;;  %v5372_v18 = vmul.f32 -1.442695, %v2672_v3 }
 0x537   : > { %v6128_v7 = vpop.eup %6127  ;;  %v8210_v41 = vmul.f32 %v6126_v28, %v6116_v33  ;;  %6147 = vpow2.f32 %v5364_v30  ;;  %v2612_v30 = vrot.slane %v8151_v20, 2 }
 0x538   : > { %v6130_v5 = vpop.eup %6129  ;;  %6149 = vpow2.f32 %v5365_v55 }
 0x539   : > { %v6132_v13 = vpop.eup %6131  ;;  %6151 = vpow2.f32 %v5366_v49  ;;  %v2620_v49 = vrot.slane %v8151_v20, 4 }
 0x53a   : > { %v6134_v59 = vpop.eup %6133  ;;  %6153 = vpow2.f32 %v5367_v37 }
 0x53b   : > { %v6136_v48 = vpop.eup %6135  ;;  %v8213_v46 = vmul.f32 %v6134_v59, %v6128_v7  ;;  %6155 = vpow2.f32 %v5368_v50  ;;  %v9323_v7 = vld [vmem:[#allocation29_spill] sm:$0xff] }
 0x53c   : > { %v6138_v33 = vpop.eup %6137  ;;  %6157 = vpow2.f32 %v5369_v54  ;;  %v8216_v11 = vmul.f32 %v6136_v48, %v6130_v5  ;;  %v2676_v3 = vadd.f32 %v2612_v30, %v9323_v7  ;;  %v9324_v54 = vld [vmem:[#allocation32_spill] sm:$0xff]  ;;  %v9325_v48 = vld [vmem:[#allocation35_spill] sm:$0xff] }
 0x53d   : > { %v6140_v53 = vpop.eup %6139  ;;  %6159 = vpow2.f32 %v5370_v2  ;;  %v8219_v55 = vmul.f32 %v6138_v33, %v6132_v13  ;;  %v2680_v2 = vadd.f32 %v2616_v44, %v9324_v54  ;;  %v2684_v33 = vadd.f32 %v2620_v49, %v9325_v48 }
 0x53e   : > { %v6142_v61 = vpop.eup %6141  ;;  %v2757_v62 = vadd.f32 1.0, %v6140_v53  ;;  %6161 = vpow2.f32 %v5371_v24 }
 0x53f   : > { %v6144_v52 = vpop.eup %6143  ;;  %v2758_v28 = vadd.f32 1.0, %v6142_v61  ;;  %6163 = vpow2.f32 %v5372_v18  ;;  %v5373_v61 = vmul.f32 -1.442695, %v2676_v3  ;;  %v5374_v30 = vmul.f32 -1.442695, %v2680_v2 }
 0x540   : > { %v6146_v37 = vpop.eup %6145  ;;  %v2759_v36 = vadd.f32 1.0, %v6144_v52  ;;  %6165 = vrcp.f32 %v2757_v62  ;;  %v2839_v3 = vrot.slane %v8019_v26, 6 }
 0x541   : > { %v6148_v50 = vpop.eup %6147  ;;  %v2760_v5 = vadd.f32 1.0, %v6146_v37  ;;  %6167 = vrcp.f32 %v2758_v28  ;;  %v5375_v28 = vmul.f32 -1.442695, %v2684_v33 }
 0x542   : > { %v6150_v13 = vpop.eup %6149  ;;  %v2761_v59 = vadd.f32 1.0, %v6148_v50  ;;  %6169 = vrcp.f32 %v2759_v36 }
 0x543   : > { %v6152_v20 = vpop.eup %6151  ;;  %v2762_v24 = vadd.f32 1.0, %v6150_v13  ;;  %6171 = vrcp.f32 %v2760_v5  ;;  %v2838_v5 = vrot.slane %v8019_v26, 5 }
 0x544   : > { %v6154_v53 = vpop.eup %6153  ;;  %v2763_v18 = vadd.f32 1.0, %v6152_v20  ;;  %6173 = vrcp.f32 %v2761_v59 }
 0x545   : > { %v6156_v62 = vpop.eup %6155  ;;  %v2764_v52 = vadd.f32 1.0, %v6154_v53  ;;  %6175 = vrcp.f32 %v2762_v24  ;;  %v2840_v24 = vrot.slane %v8019_v26, 7 }
 0x546   : > { %v6158_v37 = vpop.eup %6157  ;;  %6177 = vrcp.f32 %v2763_v18  ;;  %v2813_v50 = vadd.f32 1.0, %v6156_v62 }
 0x547   : > { %v6160_v44 = vpop.eup %6159  ;;  %6179 = vrcp.f32 %v2764_v52  ;;  %v2814_v49 = vadd.f32 1.0, %v6158_v37  ;;  %v2842_v52 = vrot.slane %v8019_v26, 2 }
 0x548   : > { %v6162_v36 = vpop.eup %6161  ;;  %6181 = vpow2.f32 %v5373_v61  ;;  %v2815_v13 = vadd.f32 1.0, %v6160_v44  ;;  %v2841_v61 = vrot.slane %v8019_v26, 1 }
 0x549   : > { %v6164_v48 = vpop.eup %6163  ;;  %6183 = vpow2.f32 %v5374_v30  ;;  %v2816_v20 = vadd.f32 1.0, %v6162_v36 }
 0x54a   : > { %v6166_v59 = vpop.eup %6165  ;;  %6185 = vpow2.f32 %v5375_v28  ;;  %v2817_v53 = vadd.f32 1.0, %v6164_v48  ;;  %v2843_v28 = vrot.slane %v8019_v26, 3 }
 0x54b   : > { %v6168_v2 = vpop.eup %6167  ;;  %v2853_v33 = vmul.f32 %v6166_v59, %v2838_v5  ;;  %6187 = vrcp.f32 %v2813_v50  ;;  %v2844_v50 = vrot.slane %v8019_v26, 4 }
 0x54c   : > { %v6170_v18 = vpop.eup %6169  ;;  %v2854_v62 = vmul.f32 %v6168_v2, %v2839_v3  ;;  %6189 = vrcp.f32 %v2814_v49 }
 0x54d   : > { %v6172_v30 = vpop.eup %6171  ;;  %v2855_v37 = vmul.f32 %v6170_v18, %v2840_v24  ;;  %v2869_v44 = vadd.f32 %v8200_v16, %v2853_v33  ;;  %6191 = vrcp.f32 %v2815_v13 }
 0x54e   : > { %v6174_v36 = vpop.eup %6173  ;;  %v2856_v54 = vmul.f32 %v6172_v30, %v8019_v26  ;;  %v2870_v48 = vadd.f32 %v8203_v25, %v2854_v62  ;;  %6193 = vrcp.f32 %v2816_v20 }
 0x54f   : > { %v6176_v5 = vpop.eup %6175  ;;  %v2857_v59 = vmul.f32 %v6174_v36, %v2841_v61  ;;  %v2871_v49 = vadd.f32 %v8206_v32, %v2855_v37  ;;  %v2996_v3 = vrot.slane %v2869_v44, 3  ;;  %6195 = vrcp.f32 %v2817_v53 }
 0x550   : > { %v6178_v2 = vpop.eup %6177  ;;  %v2872_v16 = vadd.f32 %v8196_v34, %v2856_v54  ;;  %v2997_v13 = vrot.slane %v2870_v48, 2  ;;  %v2858_v24 = vmul.f32 %v6176_v5, %v2842_v52  ;;  %6197 = vtanh.f32 %v2869_v44 }
 0x551   : > { %v6180_v33 = vpop.eup %6179  ;;  %v2999_v18 = vrot.slane %v2871_v49, 1  ;;  %v2859_v30 = vmul.f32 %v6178_v2, %v2843_v28  ;;  %v2873_v25 = vadd.f32 %v8210_v41, %v2857_v59  ;;  %6199 = vtanh.f32 %v2870_v48 }
 0x552   : > { %v6182_v20 = vpop.eup %6181  ;;  %v2998_v62 = vsel %vm1381_vm1, %v2997_v13, %v2996_v3  ;;  %v2860_v61 = vmul.f32 %v6180_v33, %v2844_v50  ;;  %v2874_v32 = vadd.f32 %v8213_v46, %v2858_v24  ;;  %6201 = vtanh.f32 %v2871_v49 }
 0x553   : > { %v6184_v53 = vpop.eup %6183  ;;  %v3000_v37 = vsel %vm1384_vm2, %v2999_v18, %v2998_v62  ;;  %v2818_v34 = vadd.f32 1.0, %v6182_v20  ;;  %v2875_v54 = vadd.f32 %v8216_v11, %v2859_v30  ;;  %6203 = vtanh.f32 %v2872_v16 }
 0x554   : > { %v6186_v52 = vpop.eup %6185  ;;  %v3001_v44 = vsel %vm1387_vm3, %v2872_v16, %v3000_v37  ;;  %v2819_v28 = vadd.f32 1.0, %v6184_v53  ;;  %v2876_v41 = vadd.f32 %v8219_v55, %v2860_v61  ;;  %6205 = vtanh.f32 %v2873_v25  ;;  %v2895_v55 = vpop.permute.xlu0 %2894 }
 0x555   : > { %v6188_v36 = vpop.eup %6187  ;;  %v2820_v48 = vadd.f32 1.0, %v6186_v52  ;;  %6207 = vrcp.f32 %v2818_v34  ;;  %v3002_v50 = vrot.slane %v2873_v25, 7  ;;  %v3004_v5 = vrot.slane %v2874_v32, 6 }
 0x556   : > { %v6190_v46 = vpop.eup %6189  ;;  %6209 = vrcp.f32 %v2819_v28  ;;  %v3006_v11 = vrot.slane %v2875_v54, 5  ;;  %v3008_v16 = vrot.slane %v2876_v41, 4  ;;  %vm2896_vm11 = vcmp.eq.s32.totalorder %v2895_v55, 1 }
 0x557   : > { %v6192_v59 = vpop.eup %6191  ;;  %6211 = vrcp.f32 %v2820_v48  ;;  %v3003_v49 = vsel %vm1390_vm4, %v3002_v50, %v3001_v44 }
 0x558   : > { %v6194_v3 = vpop.eup %6193  ;;  %6213 = vtanh.f32 %v2874_v32  ;;  %v3005_v2 = vsel %vm1393_vm5, %v3004_v5, %v3003_v49 }
 0x559   : > { %v6196_v13 = vpop.eup %6195  ;;  %6215 = vtanh.f32 %v2875_v54  ;;  %v3007_v24 = vsel %vm1396_vm6, %v3006_v11, %v3005_v2 }
 0x55a   : > { %v6198_v33 = vpop.eup %6197  ;;  %6217 = vtanh.f32 %v2876_v41  ;;  %v3009_v18 = vsel %vm1399_vm7, %v3008_v16, %v3007_v24 }
 0x55b   : > { %v6200_v30 = vpop.eup %6199  ;;  %v2885_v25 = vmul.f32 %v6198_v33, %v6188_v36  ;;  %v8250_v20 = vsel %vm2896_vm11, %v3009_v18, %v8019_v26 }
 0x55c   : > { %v6202_v62 = vpop.eup %6201  ;;  %v2886_v61 = vmul.f32 %v6200_v30, %v6190_v46 }
 0x55d   : > { %v6204_v32 = vpop.eup %6203  ;;  %v2887_v53 = vmul.f32 %v6202_v62, %v6192_v59  ;;  %v2905_v37 = vrot.slane %v2885_v25, 3 }
 0x55e   : > { %v6206_v34 = vpop.eup %6205  ;;  %v2888_v54 = vmul.f32 %v6204_v32, %v6194_v3  ;;  %v2906_v52 = vrot.slane %v2886_v61, 2 }
 0x55f   : > { %v6208_v44 = vpop.eup %6207  ;;  %v2889_v28 = vmul.f32 %v6206_v34, %v6196_v13  ;;  %v2908_v48 = vrot.slane %v2887_v53, 1 }
 0x560   : > { %v6210_v41 = vpop.eup %6209  ;;  %v2907_v50 = vsel %vm1381_vm1, %v2906_v52, %v2905_v37 }
 0x561   : > { %v6212_v5 = vpop.eup %6211  ;;  %v2909_v36 = vsel %vm1384_vm2, %v2908_v48, %v2907_v50  ;;  %v2911_v49 = vrot.slane %v2889_v28, 7 }
 0x562   : > { %v6214_v26 = vpop.eup %6213  ;;  %v2910_v11 = vsel %vm1387_vm3, %v2888_v54, %v2909_v36  ;;  %v9329_v36 = vld [vmem:[#allocation38_spill] sm:$0xff] }
 0x563   : > { %v6216_v46 = vpop.eup %6215  ;;  %v2890_v2 = vmul.f32 %v6214_v26, %v6208_v44  ;;  %v2912_v59 = vsel %vm1390_vm4, %v2911_v49, %v2910_v11  ;;  %v9330_v49 = vld [vmem:[#allocation39_spill] sm:$0xff]  ;;  %v9331_v26 = vld [vmem:[#allocation40_spill] sm:$0xff] }
 0x564   : > { %v6218_v16 = vpop.eup %6217  ;;  %v2891_v3 = vmul.f32 %v6216_v46, %v6210_v41  ;;  %v9334_v11 = vld [vmem:[#allocation43_spill] sm:$0xff]  ;;  %v9336_v46 = vld [vmem:[#allocation45_spill] sm:$0xff] }
 0x565   : > { %v2892_v24 = vmul.f32 %v6218_v16, %v6212_v5  ;;  %v2913_v13 = vrot.slane %v2890_v2, 6  ;;  %v9328_v5 = vld [vmem:[#allocation37_spill] sm:$0xff]  ;;  %v9337_v2 = vld [vmem:[#allocation46_spill] sm:$0xff]  ;;  %v9339_v16 = vld [vmem:[#allocation48_spill] sm:$0xff] }
 0x566   : > { %v2915_v33 = vrot.slane %v2891_v3, 5  ;;  %v9340_v3 = vld [vmem:[#allocation49_spill] sm:$0xff] }
 0x567   : > { %v2914_v18 = vsel %vm1393_vm5, %v2913_v13, %v2912_v59  ;;  %v2917_v30 = vrot.slane %v2892_v24, 4  ;;  %v9338_v59 = vld [vmem:[#allocation47_spill] sm:$0xff]  ;;  %v9341_v24 = vld [vmem:[#allocation50_spill] sm:$0xff] }
 0x568   : > { %v2916_v25 = vsel %vm1396_vm6, %v2915_v33, %v2914_v18  ;;  %v9342_v13 = vld [vmem:[#allocation51_spill] sm:$0xff]  ;;  %v9343_v33 = vld [vmem:[#allocation52_spill] sm:$0xff]  ;;  %v9344_v18 = vld [vmem:[#allocation53_spill] sm:$0xff] }
 0x569   : > { %v2918_v62 = vsel %vm1399_vm7, %v2917_v30, %v2916_v25  ;;  %v9345_v30 = vld [vmem:[#allocation54_spill] sm:$0xff]  ;;  %v9346_v25 = vld [vmem:[#allocation55_spill] sm:$0xff] }
 0x56a   : > { %v2920_v61 = vsel %vm2896_vm11, %v2918_v62, 0.0  ;;  %v8262_v32 = vsel %vm2896_vm11, %v2918_v62, %v8031_v9  ;;  %v9347_v62 = vld [vmem:[#allocation56_spill] sm:$0xff] }
 0x56b   : > { %v2922_v53 = vcombine.high %v2920_v61, %v2920_v61  ;;  %v2929_v37 = vrot.slane %v2920_v61, %v7626_v8  ;;  %v3012_v34 = vpack.c.bf16 %v8262_v32, %v8262_v32  ;;  %v9348_v61 = vld [vmem:[#allocation57_spill] sm:$0xff] }
 0x56d   : > { %v2936_v54 = vrot.slane %v2922_v53, %v7626_v8  ;;  %v2937_v52 = vcombine.high %v2929_v37, %v2929_v37  ;;  %v2945_v44 = vrot.slane %v2929_v37, %v7626_v8  ;;  %5376 = vst.sshfl [vmem:[%s7296_s16 + $0x3] sm:$0x1 pattern:$0x73625140] %v2929_v37  ;;  %3046 = vmatmul.mubr.bf16.vlgmr.msra.gmra.mrb[32].mxu0 %v3012_v34  ;;  %v9349_v53 = vld [vmem:[#allocation58_spill] sm:$0xff]  ;;  %v9350_v37 = vld [vmem:[#allocation59_spill] sm:$0xff] }
 0x56e   : > { %3087 = vmatmul.mubr.bf16.vlgmr.msra.gmra.mrb[32].mxu1 %v3012_v34  ;;  %3520 = vmatpush1.bf16.msra.mxu0 %v8039_v57 }
 0x56f   : > { %3561 = vmatpush1.bf16.msra.mxu1 %v8042_v38  ;;  %v2938_v9 = vcombine.high %v2936_v54, %v2936_v54  ;;  %v2952_v55 = vrot.slane %v2936_v54, %v7626_v8  ;;  %v2959_v28 = vrot.slane %v2937_v52, %v7626_v8  ;;  %v2967_v48 = vcombine.high %v2945_v44, %v2945_v44 }
 0x570   : > { %5377 = vst.sshfl [vmem:[%s7296_s16 + $0xb] sm:$0x1 pattern:$0x73625140] %v2937_v52  ;;  %3521 = vmatprep.subr.bf16.mxu0 %v8049_v23  ;;  %3562 = vmatprep.subr.bf16.mxu1 %v8052_v19  ;;  %v9326_v23 = vld [vmem:[#allocation21_spill] sm:$0xff]  ;;  %v9327_v19 = vld [vmem:[#allocation36_spill] sm:$0xff] }
 0x571   : > { %5378 = vst.sshfl [vmem:[%s7296_s16 + $0x23] sm:$0x1 pattern:$0x73625140] %v2936_v54  ;;  %3551 = vmatprep.mubr.bf16.mxu0 %v9235_v43  ;;  %v2966_v57 = vrot.slane %v2938_v9, %v7626_v8  ;;  %v2968_v38 = vcombine.high %v2952_v55, %v2952_v55  ;;  %v2969_v41 = vcombine.high %v2959_v28, %v2959_v28  ;;  %2981 = vst [vmem:[%s7296_s16 + $0x13] sm:$0x1] %v2967_v48 }
 0x572   : > { %5379 = vst.sshfl [vmem:[%s7296_s16 + $0x2b] sm:$0x1 pattern:$0x73625140] %v2938_v9  ;;  %3592 = vmatprep.mubr.bf16.mxu1 %v9235_v43  ;;  %3522 = vmatpush1.bf16.msra.mxu0 %v8060_v15  ;;  %v9332_v15 = vld [vmem:[#allocation41_spill] sm:$0xff] }
 0x573   : > { %3563 = vmatpush1.bf16.msra.mxu1 %v8063_v27  ;;  %v2970_v50 = vcombine.high %v2966_v57, %v2966_v57  ;;  %2982 = vst [vmem:[%s7296_s16 + $0x1b] sm:$0x1] %v2969_v41  ;;  %2985 = vst [vmem:[%s7296_s16 + $0x33] sm:$0x1] %v2968_v38  ;;  %3523 = vmatprep.subr.bf16.mxu0 %v8068_v0  ;;  %v9333_v27 = vld [vmem:[#allocation42_spill] sm:$0xff]  ;;  %v9335_v0 = vld [vmem:[#allocation44_spill] sm:$0xff] }
 0x574   : > { %3564 = vmatprep.subr.bf16.mxu1 %v9326_v23 }
 0x575   : > { %2986 = vst [vmem:[%s7296_s16 + $0x3b] sm:$0x1] %v2970_v50 }
 0x576   : > { %3524 = vmatpush1.bf16.msra.mxu0 %v9327_v19 }
 0x577   : > { %3565 = vmatpush1.bf16.msra.mxu1 %v9328_v5  ;;  %3525 = vmatprep.subr.bf16.mxu0 %v9329_v36 }
 0x578   : > { %3566 = vmatprep.subr.bf16.mxu1 %v9330_v49 }
 0x57a   : > { %3526 = vmatpush1.bf16.msra.mxu0 %v9331_v26 }
 0x57b   : > { %3567 = vmatpush1.bf16.msra.mxu1 %v9332_v15  ;;  %3527 = vmatprep.subr.bf16.mxu0 %v9333_v27 }
 0x57c   : > { %3568 = vmatprep.subr.bf16.mxu1 %v9334_v11 }
 0x57e   : > { %3528 = vmatpush1.bf16.msra.mxu0 %v9335_v0 }
 0x57f   : > { %3569 = vmatpush1.bf16.msra.mxu1 %v9336_v46  ;;  %3529 = vmatprep.subr.bf16.mxu0 %v9337_v2 }
 0x580   : > { %3570 = vmatprep.subr.bf16.mxu1 %v9338_v59 }
 0x582   : > { %3530 = vmatpush1.bf16.msra.mxu0 %v9339_v16 }
 0x583   : > { %3571 = vmatpush1.bf16.msra.mxu1 %v9340_v3  ;;  %3531 = vmatprep.subr.bf16.mxu0 %v9341_v24 }
 0x584   : > { %3572 = vmatprep.subr.bf16.mxu1 %v9342_v13 }
 0x586   : > { %3532 = vmatpush1.bf16.msra.mxu0 %v9343_v33 }
 0x587   : > { %3573 = vmatpush1.bf16.msra.mxu1 %v9344_v18  ;;  %3533 = vmatprep.subr.bf16.mxu0 %v9345_v30 }
 0x588   : > { %3574 = vmatprep.subr.bf16.mxu1 %v9346_v25 }
 0x58a   : > { %3534 = vmatpush1.bf16.msra.mxu0 %v9347_v62 }
 0x58b   : > { %3575 = vmatpush1.bf16.msra.mxu1 %v9348_v61  ;;  %4025 = vmatprep.subr.bf16.mxu0 %v9349_v53 }
 0x58c   : > { %4066 = vmatprep.subr.bf16.mxu1 %v9350_v37 }
 0x640   : > { %v3047_v34 = vpop.f32.mrb[32].mxu0 }
 0x641   : > { %v8314_v54 = vpop.f32.mrb[32].mxu1  ;;  %v3099_v52 = vrot.slane %v3047_v34, 4  ;;  %v3103_v44 = vrot.slane %v3047_v34, 5  ;;  %v3107_v9 = vrot.slane %v3047_v34, 6  ;;  %v3111_v55 = vrot.slane %v3047_v34, 7  ;;  %v8316_v28 = vpop.f32.mrb[33].mxu0 }
 0x642   : > { %v8318_v48 = vpop.f32.mrb[33].mxu1  ;;  %v3115_v57 = vrot.slane %v3047_v34, 1  ;;  %v3119_v38 = vrot.slane %v3047_v34, 2  ;;  %v3123_v41 = vrot.slane %v3047_v34, 3  ;;  %v3175_v50 = vadd.f32 %v3047_v34, %v7469_v4  ;;  %v3051_v23 = vpop.f32.mrb[34].mxu0 }
 0x643   : > { %v3092_v19 = vpop.f32.mrb[34].mxu1  ;;  %v3159_v5 = vadd.f32 %v3099_v52, %v7425_v35  ;;  %v3163_v36 = vadd.f32 %v3103_v44, %v7433_v42  ;;  %v3167_v49 = vadd.f32 %v3107_v9, %v7447_v51  ;;  %v3171_v26 = vadd.f32 %v3111_v55, %v7455_v58  ;;  %v3052_v15 = vpop.f32.mrb[35].mxu0 }
 0x644   : > { %v3093_v27 = vpop.f32.mrb[35].mxu1  ;;  %v3179_v11 = vadd.f32 %v3115_v57, %v7477_v12  ;;  %v3183_v0 = vadd.f32 %v3119_v38, %v7491_v21  ;;  %v5384_v46 = vmul.f32 -1.442695, %v3175_v50  ;;  %v3187_v2 = vadd.f32 %v3123_v41, %v7499_v29 }
 0x645   : > { %v5380_v59 = vmul.f32 -1.442695, %v3159_v5  ;;  %v5381_v16 = vmul.f32 -1.442695, %v3163_v36  ;;  %v5382_v3 = vmul.f32 -1.442695, %v3167_v49  ;;  %v3177_v44 = vadd.f32 %v8314_v54, %v7475_v10 }
 0x646   : > { %v5383_v24 = vmul.f32 -1.442695, %v3171_v26  ;;  %6219 = vpow2.f32 %v5384_v46  ;;  %v5385_v13 = vmul.f32 -1.442695, %v3179_v11  ;;  %v3101_v33 = vrot.slane %v8314_v54, 4 }
 0x647   : > { %6221 = vpow2.f32 %v5380_v59  ;;  %v3105_v18 = vrot.slane %v8314_v54, 5  ;;  %v5386_v30 = vmul.f32 -1.442695, %v3183_v0  ;;  %v3109_v25 = vrot.slane %v8314_v54, 6 }
 0x648   : > { %6223 = vpow2.f32 %v5381_v16  ;;  %v5387_v62 = vmul.f32 -1.442695, %v3187_v2  ;;  %v3113_v61 = vrot.slane %v8314_v54, 7  ;;  %v3161_v53 = vadd.f32 %v3101_v33, %v7431_v40 }
 0x649   : > { %6225 = vpow2.f32 %v5382_v3  ;;  %v3165_v37 = vadd.f32 %v3105_v18, %v7442_v47  ;;  %v3169_v34 = vadd.f32 %v3109_v25, %v7453_v56  ;;  %v3117_v38 = vrot.slane %v8314_v54, 1 }
 0x64a   : > { %6227 = vpow2.f32 %v5383_v24  ;;  %v3173_v52 = vadd.f32 %v3113_v61, %v7464_v63  ;;  %v3121_v23 = vrot.slane %v8314_v54, 2  ;;  %v3100_v19 = vrot.slane %v8316_v28, 4 }
 0x64b   : > { %6229 = vpow2.f32 %v5385_v13  ;;  %v3104_v49 = vrot.slane %v8316_v28, 5  ;;  %v3125_v27 = vrot.slane %v8314_v54, 3  ;;  %v3108_v11 = vrot.slane %v8316_v28, 6 }
 0x64c   : > { %6231 = vpow2.f32 %v5386_v30  ;;  %v3181_v2 = vadd.f32 %v3117_v38, %v7486_v17  ;;  %v3112_v59 = vrot.slane %v8316_v28, 7  ;;  %v3185_v24 = vadd.f32 %v3121_v23, %v9289_v6  ;;  %v9351_v30 = vld [vmem:[#allocation22_spill] sm:$0xff] }
 0x64d   : > { %6233 = vpow2.f32 %v5387_v62  ;;  %v3160_v13 = vadd.f32 %v3100_v19, %v9290_v45  ;;  %v3116_v54 = vrot.slane %v8316_v28, 1  ;;  %v3164_v25 = vadd.f32 %v3104_v49, %v9351_v30  ;;  %v9356_v49 = vld [vmem:[#allocation28_spill] sm:$0xff] }
 0x64e   : > { %6235 = vtanh.f32 %v3161_v53  ;;  %v3120_v53 = vrot.slane %v8316_v28, 2 }
 0x64f   : > { %6237 = vtanh.f32 %v3165_v37  ;;  %v9352_v37 = vld [vmem:[#allocation24_spill] sm:$0xff]  ;;  %v5388_v19 = vmul.f32 -1.442695, %v3160_v13 }
 0x650   : > { %v6220_v9 = vpop.eup %6219  ;;  %6239 = vtanh.f32 %v3169_v34  ;;  %v3168_v34 = vadd.f32 %v3108_v11, %v9352_v37  ;;  %v3106_v11 = vrot.slane %v8318_v48, 5 }
 0x651   : > { %v6222_v55 = vpop.eup %6221  ;;  %v3219_v57 = vadd.f32 1.0, %v6220_v9  ;;  %6241 = vtanh.f32 %v3173_v52 }
 0x652   : > { %v6224_v41 = vpop.eup %6223  ;;  %v3215_v50 = vadd.f32 1.0, %v6222_v55  ;;  %6243 = vtanh.f32 %v3177_v44  ;;  %v9353_v44 = vld [vmem:[#allocation34_spill] sm:$0xff]  ;;  %v3124_v55 = vrot.slane %v8316_v28, 3 }
 0x653   : > { %v6226_v5 = vpop.eup %6225  ;;  %v3216_v36 = vadd.f32 1.0, %v6224_v41  ;;  %6245 = vrcp.f32 %v3219_v57  ;;  %v3189_v9 = vadd.f32 %v3125_v27, %v9353_v44  ;;  %v9354_v57 = vld [vmem:[#allocation25_spill] sm:$0xff] }
 0x654   : > { %v6228_v26 = vpop.eup %6227  ;;  %v3217_v15 = vadd.f32 1.0, %v6226_v5  ;;  %6247 = vrcp.f32 %v3215_v50  ;;  %v3172_v38 = vadd.f32 %v3112_v59, %v9354_v57  ;;  %v9355_v50 = vld [vmem:[#allocation26_spill] sm:$0xff]  ;;  %v3102_v5 = vrot.slane %v8318_v48, 4 }
 0x655   : > { %v6230_v0 = vpop.eup %6229  ;;  %v3218_v46 = vadd.f32 1.0, %v6228_v26  ;;  %6249 = vrcp.f32 %v3216_v36  ;;  %v3176_v23 = vadd.f32 %v8316_v28, %v9355_v50  ;;  %v3180_v26 = vadd.f32 %v3116_v54, %v9356_v49 }
 0x656   : > { %v6232_v16 = vpop.eup %6231  ;;  %v3220_v3 = vadd.f32 1.0, %v6230_v0  ;;  %6251 = vrcp.f32 %v3217_v15  ;;  %v5389_v15 = vmul.f32 -1.442695, %v3164_v25  ;;  %v9357_v0 = vld [vmem:[#allocation30_spill] sm:$0xff]  ;;  %v5390_v59 = vmul.f32 -1.442695, %v3168_v34 }
 0x657   : > { %v6234_v33 = vpop.eup %6233  ;;  %v3221_v18 = vadd.f32 1.0, %v6232_v16  ;;  %6253 = vrcp.f32 %v3218_v46  ;;  %v3184_v46 = vadd.f32 %v3120_v53, %v9357_v0  ;;  %v3110_v16 = vrot.slane %v8318_v48, 6 }
 0x658   : > { %v6236_v62 = vpop.eup %6235  ;;  %v3222_v61 = vadd.f32 1.0, %v6234_v33  ;;  %6255 = vrcp.f32 %v3220_v3  ;;  %v3188_v28 = vadd.f32 %v3124_v55, %v7505_v39  ;;  %v5391_v13 = vmul.f32 -1.442695, %v3172_v38 }
 0x659   : > { %v6238_v52 = vpop.eup %6237  ;;  %6257 = vrcp.f32 %v3221_v18  ;;  %v3114_v33 = vrot.slane %v8318_v48, 7  ;;  %v5392_v54 = vmul.f32 -1.442695, %v3176_v23  ;;  %v3162_v25 = vadd.f32 %v3102_v5, %v9261_v31 }
 0x65a   : > { %v6240_v41 = vpop.eup %6239  ;;  %6259 = vrcp.f32 %v3222_v61  ;;  %v5393_v53 = vmul.f32 -1.442695, %v3180_v26  ;;  %v3166_v34 = vadd.f32 %v3106_v11, %v9295_v22  ;;  %v5394_v55 = vmul.f32 -1.442695, %v3184_v46 }
 0x65b   : > { %v6242_v36 = vpop.eup %6241  ;;  %6261 = vtanh.f32 %v3181_v2  ;;  %v3170_v38 = vadd.f32 %v3110_v16, %v7458_v60  ;;  %v5395_v23 = vmul.f32 -1.442695, %v3188_v28  ;;  %v3178_v26 = vadd.f32 %v8318_v48, %v7480_v14 }
 0x65c   : > { %v6244_v27 = vpop.eup %6243  ;;  %6263 = vtanh.f32 %v3185_v24  ;;  %v5397_v11 = vmul.f32 -1.442695, %v3166_v34 }
 0x65d   : > { %v6246_v3 = vpop.eup %6245  ;;  %6265 = vtanh.f32 %v3189_v9 }
 0x65e   : > { %v6248_v2 = vpop.eup %6247  ;;  %v8364_v18 = vmul.f32 %v6246_v3, %v6244_v27  ;;  %6267 = vpow2.f32 %v5388_v19  ;;  %v3174_v19 = vadd.f32 %v3114_v33, %v7467_v1 }
 0x65f   : > { %v6250_v24 = vpop.eup %6249  ;;  %v8367_v61 = vmul.f32 %v6248_v2, %v6236_v62  ;;  %6269 = vpow2.f32 %v5389_v15  ;;  %v3118_v2 = vrot.slane %v8318_v48, 1 }
 0x660   : > { %v6252_v9 = vpop.eup %6251  ;;  %v8370_v0 = vmul.f32 %v6250_v24, %v6238_v52  ;;  %6271 = vpow2.f32 %v5390_v59  ;;  %v5396_v52 = vmul.f32 -1.442695, %v3162_v25  ;;  %v5398_v59 = vmul.f32 -1.442695, %v3170_v38 }
 0x661   : > { %v6254_v27 = vpop.eup %6253  ;;  %v8373_v3 = vmul.f32 %v6252_v9, %v6240_v41  ;;  %6273 = vpow2.f32 %v5391_v13  ;;  %v5399_v16 = vmul.f32 -1.442695, %v3174_v19  ;;  %v3122_v24 = vrot.slane %v8318_v48, 2 }
 0x662   : > { %v6256_v62 = vpop.eup %6255  ;;  %v8376_v5 = vmul.f32 %v6254_v27, %v6242_v36  ;;  %6275 = vpow2.f32 %v5392_v54  ;;  %v5400_v36 = vmul.f32 -1.442695, %v3178_v26 }
 0x663   : > { %v6258_v15 = vpop.eup %6257  ;;  %6277 = vpow2.f32 %v5393_v53 }
 0x664   : > { %v6260_v46 = vpop.eup %6259  ;;  %6279 = vpow2.f32 %v5394_v55  ;;  %v3126_v55 = vrot.slane %v8318_v48, 3 }
 0x665   : > { %v6262_v41 = vpop.eup %6261  ;;  %6281 = vpow2.f32 %v5395_v23 }
 0x666   : > { %v6264_v28 = vpop.eup %6263  ;;  %v8380_v13 = vmul.f32 %v6262_v41, %v6256_v62  ;;  %6283 = vpow2.f32 %v5396_v52  ;;  %v3182_v62 = vadd.f32 %v3118_v2, %v9323_v7  ;;  %v9359_v41 = vld [vmem:[#allocation35_spill] sm:$0xff] }
 0x667   : > { %v6266_v33 = vpop.eup %6265  ;;  %6285 = vpow2.f32 %v5397_v11  ;;  %v8383_v54 = vmul.f32 %v6264_v28, %v6258_v15  ;;  %v9358_v15 = vld [vmem:[#allocation32_spill] sm:$0xff]  ;;  %v3190_v28 = vadd.f32 %v3126_v55, %v9359_v41 }
 0x668   : > { %v6268_v25 = vpop.eup %6267  ;;  %6287 = vpow2.f32 %v5398_v59  ;;  %v8386_v53 = vmul.f32 %v6266_v33, %v6260_v46  ;;  %v3186_v11 = vadd.f32 %v3122_v24, %v9358_v15 }
 0x669   : > { %v6270_v34 = vpop.eup %6269  ;;  %v3263_v9 = vadd.f32 1.0, %v6268_v25  ;;  %6289 = vpow2.f32 %v5399_v16  ;;  %v5401_v25 = vmul.f32 -1.442695, %v3182_v62  ;;  %v3345_v62 = vrot.slane %v8250_v20, 5 }
 0x66a   : > { %v6272_v38 = vpop.eup %6271  ;;  %v3264_v27 = vadd.f32 1.0, %v6270_v34  ;;  %6291 = vpow2.f32 %v5400_v36  ;;  %v5402_v2 = vmul.f32 -1.442695, %v3186_v11 }
 0x66b   : > { %v6274_v23 = vpop.eup %6273  ;;  %v3265_v19 = vadd.f32 1.0, %v6272_v38  ;;  %6293 = vrcp.f32 %v3263_v9 }
 0x66c   : > { %v6276_v26 = vpop.eup %6275  ;;  %v3266_v52 = vadd.f32 1.0, %v6274_v23  ;;  %6295 = vrcp.f32 %v3264_v27  ;;  %v5403_v27 = vmul.f32 -1.442695, %v3190_v28 }
 0x66d   : > { %v6278_v46 = vpop.eup %6277  ;;  %v3267_v59 = vadd.f32 1.0, %v6276_v26  ;;  %6297 = vrcp.f32 %v3265_v19 }
 0x66e   : > { %v6280_v48 = vpop.eup %6279  ;;  %v3268_v16 = vadd.f32 1.0, %v6278_v46  ;;  %6299 = vrcp.f32 %v3266_v52  ;;  %v3344_v52 = vrot.slane %v8250_v20, 4 }
 0x66f   : > { %v6282_v33 = vpop.eup %6281  ;;  %v3269_v36 = vadd.f32 1.0, %v6280_v48  ;;  %6301 = vrcp.f32 %v3267_v59 }
 0x670   : > { %v6284_v34 = vpop.eup %6283  ;;  %v3270_v9 = vadd.f32 1.0, %v6282_v33  ;;  %6303 = vrcp.f32 %v3268_v16  ;;  %v3346_v16 = vrot.slane %v8250_v20, 6 }
 0x671   : > { %v6286_v38 = vpop.eup %6285  ;;  %6305 = vrcp.f32 %v3269_v36  ;;  %v3319_v23 = vadd.f32 1.0, %v6284_v34 }
 0x672   : > { %v6288_v24 = vpop.eup %6287  ;;  %6307 = vrcp.f32 %v3270_v9  ;;  %v3320_v55 = vadd.f32 1.0, %v6286_v38  ;;  %v3348_v9 = vrot.slane %v8250_v20, 1 }
 0x673   : > { %v6290_v19 = vpop.eup %6289  ;;  %6309 = vpow2.f32 %v5401_v25  ;;  %v3321_v46 = vadd.f32 1.0, %v6288_v24  ;;  %v3347_v25 = vrot.slane %v8250_v20, 7 }
 0x674   : > { %v6292_v26 = vpop.eup %6291  ;;  %6311 = vpow2.f32 %v5402_v2  ;;  %v3322_v48 = vadd.f32 1.0, %v6290_v19 }
 0x675   : > { %v6294_v59 = vpop.eup %6293  ;;  %6313 = vpow2.f32 %v5403_v27  ;;  %v3323_v33 = vadd.f32 1.0, %v6292_v26  ;;  %v3349_v27 = vrot.slane %v8250_v20, 2 }
 0x676   : > { %v6296_v11 = vpop.eup %6295  ;;  %v3359_v28 = vmul.f32 %v6294_v59, %v3344_v52  ;;  %6315 = vrcp.f32 %v3319_v23  ;;  %v3350_v23 = vrot.slane %v8250_v20, 3 }
 0x677   : > { %v6298_v36 = vpop.eup %6297  ;;  %v3360_v34 = vmul.f32 %v6296_v11, %v3345_v62  ;;  %6317 = vrcp.f32 %v3320_v55 }
 0x678   : > { %v6300_v2 = vpop.eup %6299  ;;  %v3361_v38 = vmul.f32 %v6298_v36, %v3346_v16  ;;  %v3375_v24 = vadd.f32 %v8367_v61, %v3359_v28  ;;  %6319 = vrcp.f32 %v3321_v46 }
 0x679   : > { %v6302_v19 = vpop.eup %6301  ;;  %v3362_v41 = vmul.f32 %v6300_v2, %v3347_v25  ;;  %v3376_v52 = vadd.f32 %v8370_v0, %v3360_v34  ;;  %6321 = vrcp.f32 %v3322_v48 }
 0x67a   : > { %v6304_v26 = vpop.eup %6303  ;;  %v3363_v59 = vmul.f32 %v6302_v19, %v8250_v20  ;;  %v3377_v55 = vadd.f32 %v8373_v3, %v3361_v38  ;;  %v3502_v62 = vrot.slane %v3375_v24, 4  ;;  %6323 = vrcp.f32 %v3323_v33 }
 0x67b   : > { %v6306_v11 = vpop.eup %6305  ;;  %v3503_v16 = vrot.slane %v3376_v52, 3  ;;  %v3364_v61 = vmul.f32 %v6304_v26, %v3348_v9  ;;  %v3378_v46 = vadd.f32 %v8376_v5, %v3362_v41  ;;  %6325 = vtanh.f32 %v3375_v24 }
 0x67c   : > { %v6308_v28 = vpop.eup %6307  ;;  %v3505_v36 = vrot.slane %v3377_v55, 2  ;;  %v3365_v25 = vmul.f32 %v6306_v11, %v3349_v27  ;;  %v3379_v0 = vadd.f32 %v8364_v18, %v3363_v59  ;;  %6327 = vtanh.f32 %v3376_v52 }
 0x67d   : > { %v6310_v48 = vpop.eup %6309  ;;  %v3504_v34 = vsel %vm1381_vm1, %v3503_v16, %v3502_v62  ;;  %v3366_v2 = vmul.f32 %v6308_v28, %v3350_v23  ;;  %v3380_v3 = vadd.f32 %v8380_v13, %v3364_v61  ;;  %6329 = vtanh.f32 %v3377_v55  ;;  %v3401_v61 = vpop.permute.xlu1 %3400 }
 0x67e   : > { %v6312_v33 = vpop.eup %6311  ;;  %v3324_v38 = vadd.f32 1.0, %v6310_v48  ;;  %v3381_v9 = vadd.f32 %v8383_v54, %v3365_v25  ;;  %6331 = vtanh.f32 %v3378_v46  ;;  %v3506_v5 = vsel %vm1384_vm2, %v3505_v36, %v3504_v34 }
 0x67f   : > { %v6314_v41 = vpop.eup %6313  ;;  %v3325_v24 = vadd.f32 1.0, %v6312_v33  ;;  %v3382_v27 = vadd.f32 %v8386_v53, %v3366_v2  ;;  %6333 = vtanh.f32 %v3379_v0  ;;  %v3507_v18 = vrot.slane %v3378_v46, 1 }
 0x680   : > { %v6316_v19 = vpop.eup %6315  ;;  %v3326_v52 = vadd.f32 1.0, %v6314_v41  ;;  %6335 = vrcp.f32 %v3324_v38  ;;  %v3510_v26 = vrot.slane %v3380_v3, 7  ;;  %v3512_v55 = vrot.slane %v3381_v9, 6 }
 0x681   : > { %v6318_v23 = vpop.eup %6317  ;;  %6337 = vrcp.f32 %v3325_v24  ;;  %v3508_v13 = vsel %vm1387_vm3, %v3507_v18, %v3506_v5  ;;  %v3514_v53 = vrot.slane %v3382_v27, 5  ;;  %vm3402_vm12 = vcmp.eq.s32.totalorder %v3401_v61, 1 }
 0x682   : > { %v6320_v59 = vpop.eup %6319  ;;  %6339 = vrcp.f32 %v3326_v52  ;;  %v3509_v54 = vsel %vm1390_vm4, %v3379_v0, %v3508_v13 }
 0x683   : > { %v6322_v62 = vpop.eup %6321  ;;  %6341 = vtanh.f32 %v3380_v3  ;;  %v3511_v11 = vsel %vm1393_vm5, %v3510_v26, %v3509_v54 }
 0x684   : > { %v6324_v16 = vpop.eup %6323  ;;  %6343 = vtanh.f32 %v3381_v9  ;;  %v3513_v46 = vsel %vm1396_vm6, %v3512_v55, %v3511_v11 }
 0x685   : > { %v6326_v28 = vpop.eup %6325  ;;  %6345 = vtanh.f32 %v3382_v27  ;;  %v3515_v36 = vsel %vm1399_vm7, %v3514_v53, %v3513_v46 }
 0x686   : > { %v6328_v25 = vpop.eup %6327  ;;  %v3391_v48 = vmul.f32 %v6326_v28, %v6316_v19  ;;  %v8417_v0 = vsel %vm3402_vm12, %v3515_v36, %v8250_v20 }
 0x687   : > { %v6330_v34 = vpop.eup %6329  ;;  %v3392_v2 = vmul.f32 %v6328_v25, %v6318_v23 }
 0x688   : > { %v6332_v3 = vpop.eup %6331  ;;  %v3393_v33 = vmul.f32 %v6330_v34, %v6320_v59  ;;  %v3411_v38 = vrot.slane %v3391_v48, 4 }
 0x689   : > { %v6334_v5 = vpop.eup %6333  ;;  %v3394_v9 = vmul.f32 %v6332_v3, %v6322_v62  ;;  %v3412_v41 = vrot.slane %v3392_v2, 3 }
 0x68a   : > { %v6336_v24 = vpop.eup %6335  ;;  %v3395_v18 = vmul.f32 %v6334_v5, %v6324_v16  ;;  %v3414_v52 = vrot.slane %v3393_v33, 2 }
 0x68b   : > { %v6338_v27 = vpop.eup %6337  ;;  %v3413_v13 = vsel %vm1381_vm1, %v3412_v41, %v3411_v38  ;;  %v3416_v26 = vrot.slane %v3394_v9, 1 }
 0x68c   : > { %v6340_v19 = vpop.eup %6339  ;;  %v3415_v54 = vsel %vm1384_vm2, %v3414_v52, %v3413_v13 }
 0x68d   : > { %v6342_v20 = vpop.eup %6341  ;;  %v3417_v55 = vsel %vm1387_vm3, %v3416_v26, %v3415_v54  ;;  %v8447_v26 = vld [vmem:[#allocation7 + $0x24] ss:$16 sps:$4 sm:$0xff]  }
 0x68e   : > { %v6344_v23 = vpop.eup %6343  ;;  %v3396_v11 = vmul.f32 %v6342_v20, %v6336_v24  ;;  %v3418_v59 = vsel %vm1390_vm4, %v3395_v18, %v3417_v55  ;;  %v8437_v18 = vld [vmem:[#allocation7] ss:$16 sps:$4 sm:$0xff]  }
 0x68f   : > { %v6346_v53 = vpop.eup %6345  ;;  %v3397_v62 = vmul.f32 %v6344_v23, %v6338_v27  ;;  %v8458_v23 = vld [vmem:[#allocation7 + $0x20] ss:$16 sps:$4 sm:$0xff]  }
 0x690   : > { %v3398_v46 = vmul.f32 %v6346_v53, %v6340_v19  ;;  %v3419_v16 = vrot.slane %v3396_v11, 7  ;;  %v8450_v19 = vld [vmem:[#allocation7 + $0x2c] ss:$16 sps:$4 sm:$0xff]   ;;  %v8461_v11 = vld [vmem:[#allocation7 + $0x28] ss:$16 sps:$4 sm:$0xff]  }
 0x691   : > { %v3421_v28 = vrot.slane %v3397_v62, 6  ;;  %v8466_v53 = vld [vmem:[#allocation7 + $0x44] ss:$16 sps:$4 sm:$0xff]   ;;  %v8469_v62 = vld [vmem:[#allocation7 + $0x4c] ss:$16 sps:$4 sm:$0xff]  }
 0x692   : > { %v3420_v36 = vsel %vm1393_vm5, %v3419_v16, %v3418_v59  ;;  %v3423_v25 = vrot.slane %v3398_v46, 5  ;;  %9360 = vst [vmem:[#allocation60_spill] sm:$0xff] %v8466_v53  ;;  %9361 = vst [vmem:[#allocation20_spill] sm:$0xff] %v8469_v62  ;;  %v8473_v46 = vld [vmem:[#allocation7 + $0x40] ss:$16 sps:$4 sm:$0xff]  }
 0x693   : > { %v3422_v48 = vsel %vm1396_vm6, %v3421_v28, %v3420_v36  ;;  %9362 = vst [vmem:[#allocation23_spill] sm:$0xff] %v8473_v46  ;;  %v8476_v16 = vld [vmem:[#allocation7 + $0x48] ss:$16 sps:$4 sm:$0xff]   ;;  %v8479_v28 = vld [vmem:[#allocation7 + $0x64] ss:$16 sps:$4 sm:$0xff]  }
 0x694   : > { %v3424_v34 = vsel %vm1399_vm7, %v3423_v25, %v3422_v48  ;;  %9363 = vst [vmem:[#allocation29_spill] sm:$0xff] %v8476_v16  ;;  %9364 = vst [vmem:[#allocation21_spill] sm:$0xff] %v8479_v28  ;;  %v8482_v36 = vld [vmem:[#allocation7 + $0x6c] ss:$16 sps:$4 sm:$0xff]   ;;  %v8485_v25 = vld [vmem:[#allocation7 + $0x60] ss:$16 sps:$4 sm:$0xff]  }
 0x695   : > { %v3426_v2 = vsel %vm3402_vm12, %v3424_v34, 0.0  ;;  %v8429_v3 = vsel %vm3402_vm12, %v3424_v34, %v8262_v32  ;;  %v8440_v32 = vld [vmem:[#allocation7 + $0x8] ss:$16 sps:$4 sm:$0xff]   ;;  %9365 = vst [vmem:[#allocation36_spill] sm:$0xff] %v8482_v36  ;;  %9366 = vst [vmem:[#allocation37_spill] sm:$0xff] %v8485_v25 }
 0x696   : > { %v3428_v33 = vcombine.high %v3426_v2, %v3426_v2  ;;  %v3435_v38 = vrot.slane %v3426_v2, %v7626_v8  ;;  %v3518_v5 = vpack.c.bf16 %v8429_v3, %v8429_v3  ;;  %v8488_v48 = vld [vmem:[#allocation7 + $0x68] ss:$16 sps:$4 sm:$0xff]   ;;  %v8491_v34 = vld [vmem:[#allocation7 + $0x84] ss:$16 sps:$4 sm:$0xff]   ;;  %v8494_v2 = vld [vmem:[#allocation7 + $0x8c] ss:$16 sps:$4 sm:$0xff]  }
 0x697   : > { %9367 = vst [vmem:[#allocation38_spill] sm:$0xff] %v8488_v48  ;;  %9368 = vst [vmem:[#allocation39_spill] sm:$0xff] %v8491_v34 }
 0x698   : > { %v3442_v9 = vrot.slane %v3428_v33, %v7626_v8  ;;  %v3443_v41 = vcombine.high %v3435_v38, %v3435_v38  ;;  %v3451_v24 = vrot.slane %v3435_v38, %v7626_v8  ;;  %5404 = vst.sshfl [vmem:[%s7296_s16 + $0x4] sm:$0x1 pattern:$0x73625140] %v3435_v38  ;;  %3552 = vmatmul.mubr.bf16.vlgmr.msra.gmra.mrb[36].mxu0 %v3518_v5  ;;  %9369 = vst [vmem:[#allocation40_spill] sm:$0xff] %v8494_v2 }
 0x699   : > { %3593 = vmatmul.mubr.bf16.vlgmr.msra.gmra.mrb[36].mxu1 %v3518_v5  ;;  %4026 = vmatpush1.bf16.msra.mxu0 %v8437_v18  ;;  %v8497_v33 = vld [vmem:[#allocation7 + $0x80] ss:$16 sps:$4 sm:$0xff]   ;;  %v8500_v38 = vld [vmem:[#allocation7 + $0x88] ss:$16 sps:$4 sm:$0xff]   ;;  %v8503_v5 = vld [vmem:[#allocation7 + $0xa4] ss:$16 sps:$4 sm:$0xff]  }
 0x69a   : > { %4067 = vmatpush1.bf16.msra.mxu1 %v8440_v32  ;;  %v3444_v61 = vcombine.high %v3442_v9, %v3442_v9  ;;  %v3458_v52 = vrot.slane %v3442_v9, %v7626_v8  ;;  %v3465_v27 = vrot.slane %v3443_v41, %v7626_v8  ;;  %v3473_v13 = vcombine.high %v3451_v24, %v3451_v24  ;;  %v8512_v24 = vld [vmem:[#allocation7 + $0xa8] ss:$16 sps:$4 sm:$0xff]  }
 0x69b   : > { %5405 = vst.sshfl [vmem:[%s7296_s16 + $0xc] sm:$0x1 pattern:$0x73625140] %v3443_v41  ;;  %4027 = vmatprep.subr.bf16.mxu0 %v8447_v26  ;;  %4068 = vmatprep.subr.bf16.mxu1 %v8450_v19  ;;  %9370 = vst [vmem:[#allocation41_spill] sm:$0xff] %v8497_v33 }
 0x69c   : > { %5406 = vst.sshfl [vmem:[%s7296_s16 + $0x24] sm:$0x1 pattern:$0x73625140] %v3442_v9  ;;  %4057 = vmatprep.mubr.bf16.mxu0 %v9235_v43  ;;  %v3472_v54 = vrot.slane %v3444_v61, %v7626_v8  ;;  %v3474_v20 = vcombine.high %v3458_v52, %v3458_v52  ;;  %v3475_v55 = vcombine.high %v3465_v27, %v3465_v27  ;;  %3487 = vst [vmem:[%s7296_s16 + $0x14] sm:$0x1] %v3473_v13 }
 0x69d   : > { %5407 = vst.sshfl [vmem:[%s7296_s16 + $0x2c] sm:$0x1 pattern:$0x73625140] %v3444_v61  ;;  %4098 = vmatprep.mubr.bf16.mxu1 %v9235_v43  ;;  %4028 = vmatpush1.bf16.msra.mxu0 %v8458_v23  ;;  %9371 = vst [vmem:[#allocation42_spill] sm:$0xff] %v8500_v38 }
 0x69e   : > { %4069 = vmatpush1.bf16.msra.mxu1 %v8461_v11  ;;  %v3476_v59 = vcombine.high %v3472_v54, %v3472_v54  ;;  %3488 = vst [vmem:[%s7296_s16 + $0x1c] sm:$0x1] %v3475_v55  ;;  %3491 = vst [vmem:[%s7296_s16 + $0x34] sm:$0x1] %v3474_v20  ;;  %4029 = vmatprep.subr.bf16.mxu0 %v8466_v53  ;;  %v8506_v9 = vld [vmem:[#allocation7 + $0xac] ss:$16 sps:$4 sm:$0xff]  }
 0x69f   : > { %4070 = vmatprep.subr.bf16.mxu1 %v8469_v62  ;;  %9372 = vst [vmem:[#allocation43_spill] sm:$0xff] %v8503_v5  ;;  %9373 = vst [vmem:[#allocation44_spill] sm:$0xff] %v8506_v9  ;;  %v8509_v41 = vld [vmem:[#allocation7 + $0xa0] ss:$16 sps:$4 sm:$0xff]   ;;  %v8515_v61 = vld [vmem:[#allocation7 + $0xc4] ss:$16 sps:$4 sm:$0xff]  }
 0x6a0   : > { %3492 = vst [vmem:[%s7296_s16 + $0x3c] sm:$0x1] %v3476_v59  ;;  %9374 = vst [vmem:[#allocation45_spill] sm:$0xff] %v8509_v41  ;;  %v8518_v52 = vld [vmem:[#allocation7 + $0xcc] ss:$16 sps:$4 sm:$0xff]  }
 0x6a1   : > { %4030 = vmatpush1.bf16.msra.mxu0 %v8473_v46  ;;  %9375 = vst [vmem:[#allocation46_spill] sm:$0xff] %v8512_v24  ;;  %9376 = vst [vmem:[#allocation47_spill] sm:$0xff] %v8515_v61  ;;  %v8521_v27 = vld [vmem:[#allocation7 + $0xc0] ss:$16 sps:$4 sm:$0xff]   ;;  %v8524_v13 = vld [vmem:[#allocation7 + $0xc8] ss:$16 sps:$4 sm:$0xff]  }
 0x6a2   : > { %4071 = vmatpush1.bf16.msra.mxu1 %v8476_v16  ;;  %4031 = vmatprep.subr.bf16.mxu0 %v8479_v28  ;;  %9377 = vst [vmem:[#allocation48_spill] sm:$0xff] %v8518_v52  ;;  %9378 = vst [vmem:[#allocation49_spill] sm:$0xff] %v8521_v27  ;;  %v8527_v54 = vld [vmem:[#allocation7 + $0xe4] ss:$16 sps:$4 sm:$0xff]   ;;  %v8530_v20 = vld [vmem:[#allocation7 + $0xec] ss:$16 sps:$4 sm:$0xff]  }
 0x6a3   : > { %4072 = vmatprep.subr.bf16.mxu1 %v8482_v36  ;;  %9379 = vst [vmem:[#allocation50_spill] sm:$0xff] %v8524_v13  ;;  %9380 = vst [vmem:[#allocation51_spill] sm:$0xff] %v8527_v54  ;;  %v8533_v55 = vld [vmem:[#allocation7 + $0xe0] ss:$16 sps:$4 sm:$0xff]   ;;  %v8536_v59 = vld [vmem:[#allocation7 + $0xe8] ss:$16 sps:$4 sm:$0xff]  }
 0x6a4   : > { %9381 = vst [vmem:[#allocation52_spill] sm:$0xff] %v8530_v20  ;;  %9382 = vst [vmem:[#allocation53_spill] sm:$0xff] %v8533_v55 }
 0x6a5   : > { %4032 = vmatpush1.bf16.msra.mxu0 %v8485_v25  ;;  %9383 = vst [vmem:[#allocation54_spill] sm:$0xff] %v8536_v59 }
 0x6a6   : > { %4073 = vmatpush1.bf16.msra.mxu1 %v8488_v48  ;;  %4033 = vmatprep.subr.bf16.mxu0 %v8491_v34 }
 0x6a7   : > { %4074 = vmatprep.subr.bf16.mxu1 %v8494_v2 }
 0x6a9   : > { %4034 = vmatpush1.bf16.msra.mxu0 %v8497_v33 }
 0x6aa   : > { %4075 = vmatpush1.bf16.msra.mxu1 %v8500_v38  ;;  %4035 = vmatprep.subr.bf16.mxu0 %v8503_v5 }
 0x6ab   : > { %4076 = vmatprep.subr.bf16.mxu1 %v8506_v9 }
 0x6ad   : > { %4036 = vmatpush1.bf16.msra.mxu0 %v8509_v41 }
 0x6ae   : > { %4077 = vmatpush1.bf16.msra.mxu1 %v8512_v24  ;;  %4037 = vmatprep.subr.bf16.mxu0 %v8515_v61 }
 0x6af   : > { %4078 = vmatprep.subr.bf16.mxu1 %v8518_v52  ;;  %v6826_v52 = vld [vmem:[#allocation7 + $0xc] ss:$16 sps:$4 sm:$0xff]  }
 0x6b1   : > { %4038 = vmatpush1.bf16.msra.mxu0 %v8521_v27  ;;  %v6825_v27 = vld [vmem:[#allocation7 + $0x4] ss:$16 sps:$4 sm:$0xff]  }
 0x6b2   : > { %4079 = vmatpush1.bf16.msra.mxu1 %v8524_v13  ;;  %4039 = vmatprep.subr.bf16.mxu0 %v8527_v54 }
 0x6b3   : > { %4080 = vmatprep.subr.bf16.mxu1 %v8530_v20 }
 0x6b5   : > { %4040 = vmatpush1.bf16.msra.mxu0 %v8533_v55 }
 0x6b6   : > { %4081 = vmatpush1.bf16.msra.mxu1 %v8536_v59  ;;  %4531 = vmatprep.subr.bf16.mxu0 %v6825_v27 }
 0x6b7   : > { %4572 = vmatprep.subr.bf16.mxu1 %v6826_v52 }
 0x76b   : > { %v3553_v13 = vpop.f32.mrb[36].mxu0 }
 0x76c   : > { %v8539_v61 = vpop.f32.mrb[36].mxu1  ;;  %v3605_v54 = vrot.slane %v3553_v13, 3  ;;  %v3609_v24 = vrot.slane %v3553_v13, 4  ;;  %v3613_v41 = vrot.slane %v3553_v13, 5  ;;  %v3617_v9 = vrot.slane %v3553_v13, 6  ;;  %v8541_v20 = vpop.f32.mrb[37].mxu0 }
 0x76d   : > { %v8543_v5 = vpop.f32.mrb[37].mxu1  ;;  %v3621_v55 = vrot.slane %v3553_v13, 7  ;;  %v3625_v38 = vrot.slane %v3553_v13, 1  ;;  %v3629_v33 = vrot.slane %v3553_v13, 2  ;;  %v3685_v59 = vadd.f32 %v3553_v13, %v7477_v12  ;;  %v3557_v2 = vpop.f32.mrb[38].mxu0 }
 0x76e   : > { %v3598_v27 = vpop.f32.mrb[38].mxu1  ;;  %v3665_v52 = vadd.f32 %v3605_v54, %v7425_v35  ;;  %v3669_v34 = vadd.f32 %v3609_v24, %v7433_v42  ;;  %v3673_v48 = vadd.f32 %v3613_v41, %v7447_v51  ;;  %v3677_v25 = vadd.f32 %v3617_v9, %v7455_v58  ;;  %v3558_v36 = vpop.f32.mrb[39].mxu0 }
 0x76f   : > { %v3599_v28 = vpop.f32.mrb[39].mxu1  ;;  %v3681_v16 = vadd.f32 %v3621_v55, %v7469_v4  ;;  %v3689_v46 = vadd.f32 %v3625_v38, %v7491_v21  ;;  %v5413_v62 = vmul.f32 -1.442695, %v3685_v59  ;;  %v3693_v53 = vadd.f32 %v3629_v33, %v7499_v29 }
 0x770   : > { %v5408_v13 = vmul.f32 -1.442695, %v3665_v52  ;;  %v5409_v2 = vmul.f32 -1.442695, %v3669_v34  ;;  %v5410_v27 = vmul.f32 -1.442695, %v3673_v48 }
 0x771   : > { %v5411_v12 = vmul.f32 -1.442695, %v3677_v25  ;;  %6347 = vpow2.f32 %v5413_v62  ;;  %v5412_v24 = vmul.f32 -1.442695, %v3681_v16  ;;  %v3607_v41 = vrot.slane %v8539_v61, 3 }
 0x772   : > { %6349 = vpow2.f32 %v5408_v13  ;;  %v3611_v9 = vrot.slane %v8539_v61, 4  ;;  %v5414_v28 = vmul.f32 -1.442695, %v3689_v46  ;;  %v3615_v36 = vrot.slane %v8539_v61, 5 }
 0x773   : > { %6351 = vpow2.f32 %v5409_v2  ;;  %v5415_v38 = vmul.f32 -1.442695, %v3693_v53  ;;  %v3619_v54 = vrot.slane %v8539_v61, 6  ;;  %v3623_v34 = vrot.slane %v8539_v61, 7 }
 0x774   : > { %6353 = vpow2.f32 %v5410_v27  ;;  %v3667_v25 = vadd.f32 %v3607_v41, %v7431_v40  ;;  %v3671_v62 = vadd.f32 %v3611_v9, %v7442_v47  ;;  %v3675_v16 = vadd.f32 %v3615_v36, %v7453_v56 }
 0x775   : > { %6355 = vpow2.f32 %v5411_v12  ;;  %v3679_v46 = vadd.f32 %v3619_v54, %v7464_v63  ;;  %v3683_v48 = vadd.f32 %v3623_v34, %v7475_v10  ;;  %v3606_v52 = vrot.slane %v8541_v20, 3 }
 0x776   : > { %6357 = vpow2.f32 %v5412_v24  ;;  %v3627_v27 = vrot.slane %v8539_v61, 1  ;;  %v3610_v24 = vrot.slane %v8541_v20, 4  ;;  %v3614_v36 = vrot.slane %v8541_v20, 5 }
 0x777   : > { %6359 = vpow2.f32 %v5414_v28  ;;  %v3687_v28 = vadd.f32 %v8539_v61, %v7486_v17  ;;  %v3631_v34 = vrot.slane %v8539_v61, 2  ;;  %v3626_v61 = vrot.slane %v8541_v20, 1 }
 0x778   : > { %6361 = vpow2.f32 %v5415_v38 }
 0x779   : > { %6363 = vtanh.f32 %v3667_v25  ;;  %v3618_v25 = vrot.slane %v8541_v20, 6 }
 0x77a   : > { %6365 = vtanh.f32 %v3671_v62 }
 0x77b   : > { %v6348_v53 = vpop.eup %6347  ;;  %6367 = vtanh.f32 %v3675_v16 }
 0x77c   : > { %v6350_v12 = vpop.eup %6349  ;;  %v3726_v33 = vadd.f32 1.0, %v6348_v53  ;;  %6369 = vtanh.f32 %v3679_v46  ;;  %v3622_v46 = vrot.slane %v8541_v20, 7 }
 0x77d   : > { %v6352_v55 = vpop.eup %6351  ;;  %v3721_v59 = vadd.f32 1.0, %v6350_v12  ;;  %6371 = vtanh.f32 %v3683_v48  ;;  %v3666_v48 = vadd.f32 %v3606_v52, %v9290_v45  ;;  %v3630_v52 = vrot.slane %v8541_v20, 2 }
 0x77e   : > { %v6354_v13 = vpop.eup %6353  ;;  %v3722_v2 = vadd.f32 1.0, %v6352_v55  ;;  %6373 = vrcp.f32 %v3726_v33  ;;  %v3691_v33 = vadd.f32 %v3627_v27, %v9289_v6  ;;  %v3670_v55 = vadd.f32 %v3610_v24, %v9351_v30 }
 0x77f   : > { %v6356_v41 = vpop.eup %6355  ;;  %v3723_v9 = vadd.f32 1.0, %v6354_v13  ;;  %6375 = vrcp.f32 %v3721_v59  ;;  %v3682_v27 = vadd.f32 %v3622_v46, %v9355_v50  ;;  %v5416_v24 = vmul.f32 -1.442695, %v3666_v48 }
 0x780   : > { %v6358_v38 = vpop.eup %6357  ;;  %v3724_v54 = vadd.f32 1.0, %v6356_v41  ;;  %6377 = vrcp.f32 %v3722_v2  ;;  %v3674_v2 = vadd.f32 %v3614_v36, %v9352_v37  ;;  %v3686_v36 = vadd.f32 %v8541_v20, %v9356_v49 }
 0x781   : > { %v6360_v62 = vpop.eup %6359  ;;  %v3725_v16 = vadd.f32 1.0, %v6358_v38  ;;  %6379 = vrcp.f32 %v3723_v9  ;;  %v3695_v9 = vadd.f32 %v3631_v34, %v9353_v44  ;;  %v3678_v38 = vadd.f32 %v3618_v25, %v9354_v57  ;;  %v9384_v44 = vld [vmem:[#allocation30_spill] sm:$0xff] }
 0x782   : > { %v6362_v53 = vpop.eup %6361  ;;  %v3727_v12 = vadd.f32 1.0, %v6360_v62  ;;  %6381 = vrcp.f32 %v3724_v54  ;;  %v3608_v62 = vrot.slane %v8543_v5, 3  ;;  %v3690_v37 = vadd.f32 %v3626_v61, %v9384_v44 }
 0x783   : > { %v6364_v59 = vpop.eup %6363  ;;  %v3728_v13 = vadd.f32 1.0, %v6362_v53  ;;  %6383 = vrcp.f32 %v3725_v16  ;;  %v5417_v53 = vmul.f32 -1.442695, %v3670_v55  ;;  %v5418_v25 = vmul.f32 -1.442695, %v3674_v2 }
 0x784   : > { %v6366_v41 = vpop.eup %6365  ;;  %6385 = vrcp.f32 %v3727_v12  ;;  %v3612_v12 = vrot.slane %v8543_v5, 4  ;;  %v3694_v46 = vadd.f32 %v3630_v52, %v7505_v39  ;;  %v5419_v48 = vmul.f32 -1.442695, %v3678_v38 }
 0x785   : > { %v6368_v54 = vpop.eup %6367  ;;  %6387 = vrcp.f32 %v3728_v13  ;;  %v3616_v13 = vrot.slane %v8543_v5, 5  ;;  %v5420_v20 = vmul.f32 -1.442695, %v3682_v27  ;;  %v3624_v55 = vrot.slane %v8543_v5, 7 }
 0x786   : > { %v6370_v16 = vpop.eup %6369  ;;  %6389 = vtanh.f32 %v3687_v28  ;;  %v3620_v28 = vrot.slane %v8543_v5, 6  ;;  %v3668_v49 = vadd.f32 %v3608_v62, %v9261_v31  ;;  %v5421_v61 = vmul.f32 -1.442695, %v3686_v36 }
 0x787   : > { %v6372_v34 = vpop.eup %6371  ;;  %6391 = vtanh.f32 %v3691_v33  ;;  %v3672_v2 = vadd.f32 %v3612_v12, %v9295_v22  ;;  %v5422_v52 = vmul.f32 -1.442695, %v3690_v37  ;;  %v3676_v38 = vadd.f32 %v3616_v13, %v7458_v60 }
 0x788   : > { %v6374_v57 = vpop.eup %6373  ;;  %6393 = vtanh.f32 %v3695_v9  ;;  %v5423_v39 = vmul.f32 -1.442695, %v3694_v46  ;;  %v3680_v62 = vadd.f32 %v3620_v28, %v7467_v1  ;;  %v3684_v36 = vadd.f32 %v3624_v55, %v7480_v14 }
 0x789   : > { %v6376_v50 = vpop.eup %6375  ;;  %6395 = vpow2.f32 %v5416_v24  ;;  %v5425_v37 = vmul.f32 -1.442695, %v3672_v2 }
 0x78a   : > { %v6378_v33 = vpop.eup %6377  ;;  %v8591_v6 = vmul.f32 %v6376_v50, %v6364_v59  ;;  %6397 = vpow2.f32 %v5417_v53  ;;  %v5424_v53 = vmul.f32 -1.442695, %v3668_v49  ;;  %v5427_v46 = vmul.f32 -1.442695, %v3680_v62 }
 0x78b   : > { %v6380_v9 = vpop.eup %6379  ;;  %v8594_v44 = vmul.f32 %v6378_v33, %v6366_v41  ;;  %6399 = vpow2.f32 %v5418_v25 }
 0x78c   : > { %v6382_v24 = vpop.eup %6381  ;;  %v8597_v27 = vmul.f32 %v6380_v9, %v6368_v54  ;;  %6401 = vpow2.f32 %v5419_v48  ;;  %v5426_v54 = vmul.f32 -1.442695, %v3676_v38 }
 0x78d   : > { %v6384_v50 = vpop.eup %6383  ;;  %v8600_v59 = vmul.f32 %v6382_v24, %v6370_v16  ;;  %6403 = vpow2.f32 %v5420_v20  ;;  %v5428_v16 = vmul.f32 -1.442695, %v3684_v36  ;;  %v3688_v24 = vadd.f32 %v8543_v5, %v9323_v7 }
 0x78e   : > { %v6386_v41 = vpop.eup %6385  ;;  %v8603_v12 = vmul.f32 %v6384_v50, %v6372_v34  ;;  %6405 = vpow2.f32 %v5421_v61  ;;  %v3628_v34 = vrot.slane %v8543_v5, 1 }
 0x78f   : > { %v6388_v25 = vpop.eup %6387  ;;  %6407 = vpow2.f32 %v5422_v52 }
 0x790   : > { %v6390_v13 = vpop.eup %6389  ;;  %6409 = vpow2.f32 %v5423_v39  ;;  %v3632_v39 = vrot.slane %v8543_v5, 2  ;;  %v3692_v36 = vadd.f32 %v3628_v34, %v9358_v15 }
 0x791   : > { %v6392_v48 = vpop.eup %6391  ;;  %v8605_v28 = vmul.f32 %v6390_v13, %v6374_v57  ;;  %6411 = vpow2.f32 %v5424_v53 }
 0x792   : > { %v6394_v20 = vpop.eup %6393  ;;  %6413 = vpow2.f32 %v5425_v37  ;;  %v8607_v55 = vmul.f32 %v6392_v48, %v6386_v41  ;;  %v9385_v37 = vld [vmem:[#allocation35_spill] sm:$0xff]  ;;  %v5430_v5 = vmul.f32 -1.442695, %v3692_v36 }
 0x793   : > { %v6396_v49 = vpop.eup %6395  ;;  %6415 = vpow2.f32 %v5426_v54  ;;  %v8610_v33 = vmul.f32 %v6394_v20, %v6388_v25  ;;  %v3696_v25 = vadd.f32 %v3632_v39, %v9385_v37 }
 0x794   : > { %v6398_v61 = vpop.eup %6397  ;;  %v3769_v2 = vadd.f32 1.0, %v6396_v49  ;;  %6417 = vpow2.f32 %v5427_v46 }
 0x795   : > { %v6400_v9 = vpop.eup %6399  ;;  %v3770_v57 = vadd.f32 1.0, %v6398_v61  ;;  %6419 = vpow2.f32 %v5428_v16  ;;  %v5429_v16 = vmul.f32 -1.442695, %v3688_v24  ;;  %v3851_v24 = vrot.slane %v8417_v0, 4 }
 0x796   : > { %v6402_v52 = vpop.eup %6401  ;;  %v3771_v38 = vadd.f32 1.0, %v6400_v9  ;;  %6421 = vrcp.f32 %v3769_v2  ;;  %v5431_v2 = vmul.f32 -1.442695, %v3696_v25 }
 0x797   : > { %v6404_v62 = vpop.eup %6403  ;;  %v3772_v50 = vadd.f32 1.0, %v6402_v52  ;;  %6423 = vrcp.f32 %v3770_v57 }
 0x798   : > { %v6406_v53 = vpop.eup %6405  ;;  %v3773_v41 = vadd.f32 1.0, %v6404_v62  ;;  %6425 = vrcp.f32 %v3771_v38  ;;  %v3850_v38 = vrot.slane %v8417_v0, 3 }
 0x799   : > { %v6408_v54 = vpop.eup %6407  ;;  %v3774_v13 = vadd.f32 1.0, %v6406_v53  ;;  %6427 = vrcp.f32 %v3772_v50 }
 0x79a   : > { %v6410_v46 = vpop.eup %6409  ;;  %v3775_v48 = vadd.f32 1.0, %v6408_v54  ;;  %6429 = vrcp.f32 %v3773_v41  ;;  %v3852_v41 = vrot.slane %v8417_v0, 5 }
 0x79b   : > { %v6412_v20 = vpop.eup %6411  ;;  %v3776_v49 = vadd.f32 1.0, %v6410_v46  ;;  %6431 = vrcp.f32 %v3774_v13  ;;  %v3853_v46 = vrot.slane %v8417_v0, 6 }
 0x79c   : > { %v6414_v61 = vpop.eup %6413  ;;  %6433 = vrcp.f32 %v3775_v48  ;;  %v3825_v9 = vadd.f32 1.0, %v6412_v20  ;;  %v3854_v48 = vrot.slane %v8417_v0, 7 }
 0x79d   : > { %v6416_v34 = vpop.eup %6415  ;;  %6435 = vrcp.f32 %v3776_v49  ;;  %v3826_v39 = vadd.f32 1.0, %v6414_v61  ;;  %v3855_v61 = vrot.slane %v8417_v0, 1 }
 0x79e   : > { %v6418_v57 = vpop.eup %6417  ;;  %6437 = vpow2.f32 %v5429_v16  ;;  %v3827_v62 = vadd.f32 1.0, %v6416_v34 }
 0x79f   : > { %v6420_v52 = vpop.eup %6419  ;;  %6439 = vpow2.f32 %v5430_v5  ;;  %v3828_v53 = vadd.f32 1.0, %v6418_v57 }
 0x7a0   : > { %v6422_v50 = vpop.eup %6421  ;;  %6441 = vpow2.f32 %v5431_v2  ;;  %v3829_v54 = vadd.f32 1.0, %v6420_v52 }
 0x7a1   : > { %v6424_v36 = vpop.eup %6423  ;;  %v3865_v25 = vmul.f32 %v6422_v50, %v3850_v38  ;;  %6443 = vrcp.f32 %v3825_v9  ;;  %v3856_v9 = vrot.slane %v8417_v0, 2 }
 0x7a2   : > { %v6426_v13 = vpop.eup %6425  ;;  %v3866_v16 = vmul.f32 %v6424_v36, %v3851_v24  ;;  %6445 = vrcp.f32 %v3826_v39 }
 0x7a3   : > { %v6428_v20 = vpop.eup %6427  ;;  %v3867_v49 = vmul.f32 %v6426_v13, %v3852_v41  ;;  %v3881_v5 = vadd.f32 %v8591_v6, %v3865_v25  ;;  %6447 = vrcp.f32 %v3827_v62 }
 0x7a4   : > { %v6430_v2 = vpop.eup %6429  ;;  %v3868_v34 = vmul.f32 %v6428_v20, %v3853_v46  ;;  %v3882_v57 = vadd.f32 %v8594_v44, %v3866_v16  ;;  %6449 = vrcp.f32 %v3828_v53 }
 0x7a5   : > { %v6432_v52 = vpop.eup %6431  ;;  %v3869_v38 = vmul.f32 %v6430_v2, %v3854_v48  ;;  %v3883_v50 = vadd.f32 %v8597_v27, %v3867_v49  ;;  %v4008_v24 = vrot.slane %v3881_v5, 5  ;;  %6451 = vrcp.f32 %v3829_v54 }
 0x7a6   : > { %v6434_v39 = vpop.eup %6433  ;;  %v4009_v36 = vrot.slane %v3882_v57, 4  ;;  %v3870_v6 = vmul.f32 %v6432_v52, %v8417_v0  ;;  %v3884_v62 = vadd.f32 %v8600_v59, %v3868_v34  ;;  %6453 = vtanh.f32 %v3881_v5 }
 0x7a7   : > { %v6436_v41 = vpop.eup %6435  ;;  %v4011_v25 = vrot.slane %v3883_v50, 3  ;;  %v3871_v13 = vmul.f32 %v6434_v39, %v3855_v61  ;;  %v3885_v44 = vadd.f32 %v8603_v12, %v3869_v38  ;;  %6455 = vtanh.f32 %v3882_v57 }
 0x7a8   : > { %v6438_v53 = vpop.eup %6437  ;;  %v4010_v46 = vsel %vm1381_vm1, %v4009_v36, %v4008_v24  ;;  %v3872_v48 = vmul.f32 %v6436_v41, %v3856_v9  ;;  %v3886_v27 = vadd.f32 %v8605_v28, %v3870_v6  ;;  %6457 = vtanh.f32 %v3883_v50  ;;  %v3907_v36 = vpop.permute.xlu1 %3906 }
 0x7a9   : > { %v6440_v54 = vpop.eup %6439  ;;  %v3830_v16 = vadd.f32 1.0, %v6438_v53  ;;  %v3887_v20 = vadd.f32 %v8607_v55, %v3871_v13  ;;  %6459 = vtanh.f32 %v3884_v62  ;;  %v4012_v59 = vsel %vm1384_vm2, %v4011_v25, %v4010_v46 }
 0x7aa   : > { %v6442_v49 = vpop.eup %6441  ;;  %v3831_v5 = vadd.f32 1.0, %v6440_v54  ;;  %v3888_v61 = vadd.f32 %v8610_v33, %v3872_v48  ;;  %6461 = vtanh.f32 %v3885_v44  ;;  %v4013_v12 = vrot.slane %v3884_v62, 2 }
 0x7ab   : > { %v6444_v2 = vpop.eup %6443  ;;  %v3832_v34 = vadd.f32 1.0, %v6442_v49  ;;  %6463 = vrcp.f32 %v3830_v16  ;;  %v4015_v57 = vrot.slane %v3885_v44, 1  ;;  %v4018_v38 = vrot.slane %v3887_v20, 7 }
 0x7ac   : > { %v6446_v9 = vpop.eup %6445  ;;  %6465 = vrcp.f32 %v3831_v5  ;;  %v4014_v28 = vsel %vm1387_vm3, %v4013_v12, %v4012_v59  ;;  %v4020_v33 = vrot.slane %v3888_v61, 6  ;;  %vm3908_vm13 = vcmp.eq.s32.totalorder %v3907_v36, 1 }
 0x7ad   : > { %v6448_v52 = vpop.eup %6447  ;;  %6467 = vrcp.f32 %v3832_v34  ;;  %v4016_v55 = vsel %vm1390_vm4, %v4015_v57, %v4014_v28 }
 0x7ae   : > { %v6450_v50 = vpop.eup %6449  ;;  %6469 = vtanh.f32 %v3886_v27  ;;  %v4017_v24 = vsel %vm1393_vm5, %v3886_v27, %v4016_v55 }
 0x7af   : > { %v6452_v39 = vpop.eup %6451  ;;  %6471 = vtanh.f32 %v3887_v20  ;;  %v4019_v6 = vsel %vm1396_vm6, %v4018_v38, %v4017_v24 }
 0x7b0   : > { %v6454_v62 = vpop.eup %6453  ;;  %6473 = vtanh.f32 %v3888_v61  ;;  %v4021_v41 = vsel %vm1399_vm7, %v4020_v33, %v4019_v6 }
 0x7b1   : > { %v6456_v25 = vpop.eup %6455  ;;  %v3897_v13 = vmul.f32 %v6454_v62, %v6444_v2  ;;  %v8642_v44 = vsel %vm3908_vm13, %v4021_v41, %v8417_v0 }
 0x7b2   : > { %v6458_v53 = vpop.eup %6457  ;;  %v3898_v46 = vmul.f32 %v6456_v25, %v6446_v9 }
 0x7b3   : > { %v6460_v48 = vpop.eup %6459  ;;  %v3899_v27 = vmul.f32 %v6458_v53, %v6448_v52  ;;  %v3917_v54 = vrot.slane %v3897_v13, 5 }
 0x7b4   : > { %v6462_v16 = vpop.eup %6461  ;;  %v3900_v20 = vmul.f32 %v6460_v48, %v6450_v50  ;;  %v3918_v59 = vrot.slane %v3898_v46, 4 }
 0x7b5   : > { %v6464_v49 = vpop.eup %6463  ;;  %v3901_v5 = vmul.f32 %v6462_v16, %v6452_v39  ;;  %v3920_v12 = vrot.slane %v3899_v27, 3 }
 0x7b6   : > { %v6466_v61 = vpop.eup %6465  ;;  %v3919_v34 = vsel %vm1381_vm1, %v3918_v59, %v3917_v54  ;;  %v3922_v57 = vrot.slane %v3900_v20, 2 }
 0x7b7   : > { %v6468_v2 = vpop.eup %6467  ;;  %v3921_v28 = vsel %vm1384_vm2, %v3920_v12, %v3919_v34  ;;  %v3924_v0 = vrot.slane %v3901_v5, 1  ;;  %v9388_v34 = vld [vmem:[#allocation23_spill] sm:$0xff] }
 0x7b8   : > { %v6470_v55 = vpop.eup %6469  ;;  %v3923_v9 = vsel %vm1387_vm3, %v3922_v57, %v3921_v28  ;;  %v9389_v57 = vld [vmem:[#allocation29_spill] sm:$0xff]  ;;  %v9391_v28 = vld [vmem:[#allocation36_spill] sm:$0xff] }
 0x7b9   : > { %v6472_v38 = vpop.eup %6471  ;;  %v3902_v52 = vmul.f32 %v6470_v55, %v6464_v49  ;;  %v3925_v24 = vsel %vm1390_vm4, %v3924_v0, %v3923_v9  ;;  %v9395_v0 = vld [vmem:[#allocation40_spill] sm:$0xff]  ;;  %v9396_v55 = vld [vmem:[#allocation41_spill] sm:$0xff]  ;;  %v9397_v9 = vld [vmem:[#allocation42_spill] sm:$0xff] }
 0x7ba   : > { %v6474_v50 = vpop.eup %6473  ;;  %v3903_v33 = vmul.f32 %v6472_v38, %v6466_v61  ;;  %v9398_v38 = vld [vmem:[#allocation43_spill] sm:$0xff] }
 0x7bb   : > { %v3904_v39 = vmul.f32 %v6474_v50, %v6468_v2  ;;  %v3926_v6 = vsel %vm1393_vm5, %v3902_v52, %v3925_v24  ;;  %v9390_v2 = vld [vmem:[#allocation21_spill] sm:$0xff]  ;;  %v9399_v52 = vld [vmem:[#allocation44_spill] sm:$0xff]  ;;  %v9401_v50 = vld [vmem:[#allocation46_spill] sm:$0xff] }
 0x7bc   : > { %v3927_v62 = vrot.slane %v3903_v33, 7  ;;  %v9400_v24 = vld [vmem:[#allocation45_spill] sm:$0xff]  ;;  %v9402_v33 = vld [vmem:[#allocation47_spill] sm:$0xff] }
 0x7bd   : > { %v3929_v41 = vrot.slane %v3904_v39, 6  ;;  %v9403_v39 = vld [vmem:[#allocation48_spill] sm:$0xff] }
 0x7be   : > { %v3928_v25 = vsel %vm1396_vm6, %v3927_v62, %v3926_v6  ;;  %v9404_v6 = vld [vmem:[#allocation49_spill] sm:$0xff]  ;;  %v9405_v62 = vld [vmem:[#allocation50_spill] sm:$0xff] }
 0x7bf   : > { %v3930_v13 = vsel %vm1399_vm7, %v3929_v41, %v3928_v25  ;;  %v9406_v41 = vld [vmem:[#allocation51_spill] sm:$0xff]  ;;  %v9407_v25 = vld [vmem:[#allocation52_spill] sm:$0xff] }
 0x7c0   : > { %v3932_v53 = vsel %vm3908_vm13, %v3930_v13, 0.0  ;;  %v8654_v46 = vsel %vm3908_vm13, %v3930_v13, %v8429_v3  ;;  %v9408_v13 = vld [vmem:[#allocation53_spill] sm:$0xff] }
 0x7c1   : > { %v3934_v48 = vcombine.high %v3932_v53, %v3932_v53  ;;  %v3941_v27 = vrot.slane %v3932_v53, %v7626_v8  ;;  %v4024_v54 = vpack.c.bf16 %v8654_v46, %v8654_v46  ;;  %v9409_v53 = vld [vmem:[#allocation54_spill] sm:$0xff] }
 0x7c3   : > { %v3948_v16 = vrot.slane %v3934_v48, %v7626_v8  ;;  %v3949_v20 = vcombine.high %v3941_v27, %v3941_v27  ;;  %v3957_v59 = vrot.slane %v3941_v27, %v7626_v8  ;;  %5432 = vst.sshfl [vmem:[%s7296_s16 + $0x5] sm:$0x1 pattern:$0x73625140] %v3941_v27  ;;  %4058 = vmatmul.mubr.bf16.vlgmr.msra.gmra.mrb[40].mxu0 %v4024_v54 }
 0x7c4   : > { %4099 = vmatmul.mubr.bf16.vlgmr.msra.gmra.mrb[40].mxu1 %v4024_v54  ;;  %4532 = vmatpush1.bf16.msra.mxu0 %v8437_v18 }
 0x7c5   : > { %4573 = vmatpush1.bf16.msra.mxu1 %v8440_v32  ;;  %v3950_v3 = vcombine.high %v3948_v16, %v3948_v16  ;;  %v3964_v36 = vrot.slane %v3948_v16, %v7626_v8  ;;  %v3971_v49 = vrot.slane %v3949_v20, %v7626_v8  ;;  %v3979_v5 = vcombine.high %v3957_v59, %v3957_v59 }
 0x7c6   : > { %5433 = vst.sshfl [vmem:[%s7296_s16 + $0xd] sm:$0x1 pattern:$0x73625140] %v3949_v20  ;;  %4533 = vmatprep.subr.bf16.mxu0 %v8447_v26  ;;  %4574 = vmatprep.subr.bf16.mxu1 %v8450_v19  ;;  %v9386_v26 = vld [vmem:[#allocation60_spill] sm:$0xff] }
 0x7c7   : > { %5434 = vst.sshfl [vmem:[%s7296_s16 + $0x25] sm:$0x1 pattern:$0x73625140] %v3948_v16  ;;  %4563 = vmatprep.mubr.bf16.mxu0 %v9235_v43  ;;  %v3978_v18 = vrot.slane %v3950_v3, %v7626_v8  ;;  %v3980_v32 = vcombine.high %v3964_v36, %v3964_v36  ;;  %v3981_v12 = vcombine.high %v3971_v49, %v3971_v49  ;;  %3993 = vst [vmem:[%s7296_s16 + $0x15] sm:$0x1] %v3979_v5 }
 0x7c8   : > { %5435 = vst.sshfl [vmem:[%s7296_s16 + $0x2d] sm:$0x1 pattern:$0x73625140] %v3950_v3  ;;  %4604 = vmatprep.mubr.bf16.mxu1 %v9235_v43  ;;  %4534 = vmatpush1.bf16.msra.mxu0 %v8458_v23  ;;  %v9387_v19 = vld [vmem:[#allocation20_spill] sm:$0xff]  ;;  %v9392_v43 = vld [vmem:[#allocation37_spill] sm:$0xff] }
 0x7c9   : > { %4575 = vmatpush1.bf16.msra.mxu1 %v8461_v11  ;;  %v3982_v61 = vcombine.high %v3978_v18, %v3978_v18  ;;  %3994 = vst [vmem:[%s7296_s16 + $0x1d] sm:$0x1] %v3981_v12  ;;  %3997 = vst [vmem:[%s7296_s16 + $0x35] sm:$0x1] %v3980_v32  ;;  %4535 = vmatprep.subr.bf16.mxu0 %v9386_v26  ;;  %v9393_v23 = vld [vmem:[#allocation38_spill] sm:$0xff]  ;;  %v9394_v11 = vld [vmem:[#allocation39_spill] sm:$0xff] }
 0x7ca   : > { %4576 = vmatprep.subr.bf16.mxu1 %v9387_v19 }
 0x7cb   : > { %3998 = vst [vmem:[%s7296_s16 + $0x3d] sm:$0x1] %v3982_v61 }
 0x7cc   : > { %4536 = vmatpush1.bf16.msra.mxu0 %v9388_v34 }
 0x7cd   : > { %4577 = vmatpush1.bf16.msra.mxu1 %v9389_v57  ;;  %4537 = vmatprep.subr.bf16.mxu0 %v9390_v2 }
 0x7ce   : > { %4578 = vmatprep.subr.bf16.mxu1 %v9391_v28 }
 0x7d0   : > { %4538 = vmatpush1.bf16.msra.mxu0 %v9392_v43 }
 0x7d1   : > { %4579 = vmatpush1.bf16.msra.mxu1 %v9393_v23  ;;  %4539 = vmatprep.subr.bf16.mxu0 %v9394_v11  ;;  %v9410_v23 = vld [vmem:[#allocation27_spill] sm:$0xff] }
 0x7d2   : > { %4580 = vmatprep.subr.bf16.mxu1 %v9395_v0 }
 0x7d4   : > { %4540 = vmatpush1.bf16.msra.mxu0 %v9396_v55 }
 0x7d5   : > { %4581 = vmatpush1.bf16.msra.mxu1 %v9397_v9  ;;  %4541 = vmatprep.subr.bf16.mxu0 %v9398_v38 }
 0x7d6   : > { %4582 = vmatprep.subr.bf16.mxu1 %v9399_v52 }
 0x7d8   : > { %4542 = vmatpush1.bf16.msra.mxu0 %v9400_v24 }
 0x7d9   : > { %4583 = vmatpush1.bf16.msra.mxu1 %v9401_v50  ;;  %4543 = vmatprep.subr.bf16.mxu0 %v9402_v33 }
 0x7da   : > { %4584 = vmatprep.subr.bf16.mxu1 %v9403_v39 }
 0x7dc   : > { %4544 = vmatpush1.bf16.msra.mxu0 %v9404_v6 }
 0x7dd   : > { %4585 = vmatpush1.bf16.msra.mxu1 %v9405_v62  ;;  %4545 = vmatprep.subr.bf16.mxu0 %v9406_v41 }
 0x7de   : > { %4586 = vmatprep.subr.bf16.mxu1 %v9407_v25 }
 0x7e0   : > { %4546 = vmatpush1.bf16.msra.mxu0 %v9408_v13 }
 0x7e1   : > { %4587 = vmatpush1.bf16.msra.mxu1 %v9409_v53 }
 0x896   : > { %v4059_v48 = vpop.f32.mrb[40].mxu0 }
 0x897   : > { %v8704_v27 = vpop.f32.mrb[40].mxu1  ;;  %v4111_v54 = vrot.slane %v4059_v48, 2  ;;  %v4115_v16 = vrot.slane %v4059_v48, 3  ;;  %v4119_v20 = vrot.slane %v4059_v48, 4  ;;  %v4123_v59 = vrot.slane %v4059_v48, 5  ;;  %v8706_v3 = vpop.f32.mrb[41].mxu0 }
 0x898   : > { %v8708_v36 = vpop.f32.mrb[41].mxu1  ;;  %v4127_v49 = vrot.slane %v4059_v48, 6  ;;  %v4131_v5 = vrot.slane %v4059_v48, 7  ;;  %v4135_v18 = vrot.slane %v4059_v48, 1  ;;  %v4195_v32 = vadd.f32 %v4059_v48, %v7491_v21  ;;  %v4063_v12 = vpop.f32.mrb[42].mxu0 }
 0x899   : > { %v4104_v61 = vpop.f32.mrb[42].mxu1  ;;  %v4171_v26 = vadd.f32 %v4111_v54, %v7425_v35  ;;  %v4175_v19 = vadd.f32 %v4115_v16, %v7433_v42  ;;  %v4179_v34 = vadd.f32 %v4119_v20, %v7447_v51  ;;  %v4183_v57 = vadd.f32 %v4123_v59, %v7455_v58  ;;  %v4064_v2 = vpop.f32.mrb[43].mxu0 }
 0x89a   : > { %v4105_v28 = vpop.f32.mrb[43].mxu1  ;;  %v4187_v43 = vadd.f32 %v4127_v49, %v7469_v4  ;;  %v4191_v11 = vadd.f32 %v4131_v5, %v9410_v23  ;;  %v5442_v0 = vmul.f32 -1.442695, %v4195_v32  ;;  %v4199_v55 = vadd.f32 %v4135_v18, %v7499_v29 }
 0x89b   : > { %v5436_v9 = vmul.f32 -1.442695, %v4171_v26  ;;  %v5437_v38 = vmul.f32 -1.442695, %v4175_v19  ;;  %v5438_v52 = vmul.f32 -1.442695, %v4179_v34 }
 0x89c   : > { %v5439_v24 = vmul.f32 -1.442695, %v4183_v57  ;;  %6475 = vpow2.f32 %v5442_v0  ;;  %v5440_v50 = vmul.f32 -1.442695, %v4187_v43  ;;  %v4113_v33 = vrot.slane %v8704_v27, 2 }
 0x89d   : > { %6477 = vpow2.f32 %v5436_v9  ;;  %v4117_v39 = vrot.slane %v8704_v27, 3  ;;  %v5441_v6 = vmul.f32 -1.442695, %v4191_v11  ;;  %v4121_v62 = vrot.slane %v8704_v27, 4 }
 0x89e   : > { %6479 = vpow2.f32 %v5437_v38  ;;  %v5443_v41 = vmul.f32 -1.442695, %v4199_v55  ;;  %v4125_v25 = vrot.slane %v8704_v27, 5  ;;  %v4129_v13 = vrot.slane %v8704_v27, 6 }
 0x89f   : > { %6481 = vpow2.f32 %v5438_v52  ;;  %v4173_v53 = vadd.f32 %v4113_v33, %v7431_v40  ;;  %v4177_v48 = vadd.f32 %v4117_v39, %v7442_v47  ;;  %v4181_v54 = vadd.f32 %v4121_v62, %v7453_v56 }
 0x8a0   : > { %6483 = vpow2.f32 %v5439_v24  ;;  %v4185_v16 = vadd.f32 %v4125_v25, %v7464_v63  ;;  %v4189_v20 = vadd.f32 %v4129_v13, %v7475_v10  ;;  %v4133_v18 = vrot.slane %v8704_v27, 7  ;;  %v9411_v13 = vld [vmem:[#allocation31_spill] sm:$0xff] }
 0x8a1   : > { %6485 = vpow2.f32 %v5440_v50  ;;  %v4112_v61 = vrot.slane %v8706_v3, 2  ;;  %v4116_v34 = vrot.slane %v8706_v3, 3  ;;  %v4137_v28 = vrot.slane %v8704_v27, 1 }
 0x8a2   : > { %6487 = vpow2.f32 %v5441_v6  ;;  %v4120_v43 = vrot.slane %v8706_v3, 4  ;;  %v4193_v55 = vadd.f32 %v4133_v18, %v7486_v17  ;;  %v4124_v9 = vrot.slane %v8706_v3, 5 }
 0x8a3   : > { %6489 = vpow2.f32 %v5443_v41  ;;  %v4128_v24 = vrot.slane %v8706_v3, 6  ;;  %v4172_v50 = vadd.f32 %v4112_v61, %v9290_v45  ;;  %v4132_v6 = vrot.slane %v8706_v3, 7 }
 0x8a4   : > { %6491 = vtanh.f32 %v4173_v53  ;;  %v4176_v62 = vadd.f32 %v4116_v34, %v9351_v30  ;;  %v4197_v53 = vadd.f32 %v8704_v27, %v9411_v13  ;;  %v9416_v27 = vld [vmem:[#allocation28_spill] sm:$0xff] }
 0x8a5   : > { %6493 = vtanh.f32 %v4177_v48  ;;  %v9412_v48 = vld [vmem:[#allocation24_spill] sm:$0xff] }
 0x8a6   : > { %v6476_v59 = vpop.eup %6475  ;;  %6495 = vtanh.f32 %v4181_v54  ;;  %v4180_v54 = vadd.f32 %v4120_v43, %v9412_v48  ;;  %v4118_v43 = vrot.slane %v8708_v36, 3 }
 0x8a7   : > { %v6478_v49 = vpop.eup %6477  ;;  %v4233_v5 = vadd.f32 1.0, %v6476_v59  ;;  %6497 = vtanh.f32 %v4185_v16 }
 0x8a8   : > { %v6480_v32 = vpop.eup %6479  ;;  %v4227_v12 = vadd.f32 1.0, %v6478_v49  ;;  %6499 = vtanh.f32 %v4189_v20  ;;  %v9413_v20 = vld [vmem:[#allocation34_spill] sm:$0xff]  ;;  %v4136_v49 = vrot.slane %v8706_v3, 1 }
 0x8a9   : > { %v6482_v26 = vpop.eup %6481  ;;  %v4228_v19 = vadd.f32 1.0, %v6480_v32  ;;  %6501 = vrcp.f32 %v4233_v5  ;;  %v4201_v59 = vadd.f32 %v4137_v28, %v9413_v20  ;;  %v9414_v5 = vld [vmem:[#allocation25_spill] sm:$0xff]  ;;  %v9417_v28 = vld [vmem:[#allocation30_spill] sm:$0xff] }
 0x8aa   : > { %v6484_v57 = vpop.eup %6483  ;;  %v4229_v2 = vadd.f32 1.0, %v6482_v26  ;;  %6503 = vrcp.f32 %v4227_v12  ;;  %v4184_v18 = vadd.f32 %v4124_v9, %v9414_v5  ;;  %v9415_v12 = vld [vmem:[#allocation26_spill] sm:$0xff]  ;;  %v5444_v26 = vmul.f32 -1.442695, %v4172_v50 }
 0x8ab   : > { %v6486_v11 = vpop.eup %6485  ;;  %v4230_v0 = vadd.f32 1.0, %v6484_v57  ;;  %6505 = vrcp.f32 %v4228_v19  ;;  %v4188_v61 = vadd.f32 %v4128_v24, %v9415_v12  ;;  %v4114_v19 = vrot.slane %v8708_v36, 2  ;;  %v9418_v24 = vld [vmem:[#allocation33_spill] sm:$0xff] }
 0x8ac   : > { %v6488_v38 = vpop.eup %6487  ;;  %v4231_v52 = vadd.f32 1.0, %v6486_v11  ;;  %6507 = vrcp.f32 %v4229_v2  ;;  %v4192_v57 = vadd.f32 %v4132_v6, %v9416_v27  ;;  %v5445_v2 = vmul.f32 -1.442695, %v4176_v62 }
 0x8ad   : > { %v6490_v33 = vpop.eup %6489  ;;  %v4232_v39 = vadd.f32 1.0, %v6488_v38  ;;  %6509 = vrcp.f32 %v4230_v0  ;;  %v4196_v0 = vadd.f32 %v8706_v3, %v9417_v28  ;;  %v5446_v9 = vmul.f32 -1.442695, %v4180_v54 }
 0x8ae   : > { %v6492_v41 = vpop.eup %6491  ;;  %v4234_v25 = vadd.f32 1.0, %v6490_v33  ;;  %6511 = vrcp.f32 %v4231_v52  ;;  %v4122_v38 = vrot.slane %v8708_v36, 4  ;;  %v4200_v50 = vadd.f32 %v4136_v49, %v9418_v24 }
 0x8af   : > { %v6494_v16 = vpop.eup %6493  ;;  %6513 = vrcp.f32 %v4232_v39  ;;  %v5447_v33 = vmul.f32 -1.442695, %v4184_v18  ;;  %v5448_v6 = vmul.f32 -1.442695, %v4188_v61  ;;  %v4130_v62 = vrot.slane %v8708_v36, 6 }
 0x8b0   : > { %v6496_v32 = vpop.eup %6495  ;;  %6515 = vrcp.f32 %v4234_v25  ;;  %v4174_v25 = vadd.f32 %v4114_v19, %v9261_v31  ;;  %v5449_v3 = vmul.f32 -1.442695, %v4192_v57  ;;  %v4178_v54 = vadd.f32 %v4118_v43, %v9295_v22 }
 0x8b1   : > { %v6498_v34 = vpop.eup %6497  ;;  %6517 = vtanh.f32 %v4193_v55  ;;  %v4126_v55 = vrot.slane %v8708_v36, 5  ;;  %v5450_v49 = vmul.f32 -1.442695, %v4196_v0  ;;  %v4182_v18 = vadd.f32 %v4122_v38, %v7458_v60 }
 0x8b2   : > { %v6500_v11 = vpop.eup %6499  ;;  %6519 = vtanh.f32 %v4197_v53  ;;  %v5451_v24 = vmul.f32 -1.442695, %v4200_v50  ;;  %v4190_v57 = vadd.f32 %v4130_v62, %v7480_v14  ;;  %v5453_v0 = vmul.f32 -1.442695, %v4178_v54 }
 0x8b3   : > { %v6502_v52 = vpop.eup %6501  ;;  %6521 = vtanh.f32 %v4201_v59  ;;  %v4186_v19 = vadd.f32 %v4126_v55, %v7467_v1  ;;  %v4134_v62 = vrot.slane %v8708_v36, 7 }
 0x8b4   : > { %v6504_v39 = vpop.eup %6503  ;;  %6523 = vpow2.f32 %v5444_v26 }
 0x8b5   : > { %v6506_v53 = vpop.eup %6505  ;;  %v8756_v27 = vmul.f32 %v6504_v39, %v6492_v41  ;;  %6525 = vpow2.f32 %v5445_v2  ;;  %v5452_v2 = vmul.f32 -1.442695, %v4174_v25  ;;  %v5455_v50 = vmul.f32 -1.442695, %v4186_v19 }
 0x8b6   : > { %v6508_v59 = vpop.eup %6507  ;;  %v8759_v28 = vmul.f32 %v6506_v53, %v6494_v16  ;;  %6527 = vpow2.f32 %v5446_v9 }
 0x8b7   : > { %v6510_v26 = vpop.eup %6509  ;;  %v8762_v61 = vmul.f32 %v6508_v59, %v6496_v32  ;;  %6529 = vpow2.f32 %v5447_v33  ;;  %v5454_v32 = vmul.f32 -1.442695, %v4182_v18 }
 0x8b8   : > { %v6512_v41 = vpop.eup %6511  ;;  %v8765_v39 = vmul.f32 %v6510_v26, %v6498_v34  ;;  %6531 = vpow2.f32 %v5448_v6  ;;  %v5456_v34 = vmul.f32 -1.442695, %v4190_v57  ;;  %v4198_v57 = vadd.f32 %v8708_v36, %v9358_v15 }
 0x8b9   : > { %v6514_v16 = vpop.eup %6513  ;;  %v8768_v43 = vmul.f32 %v6512_v41, %v6500_v11  ;;  %6533 = vpow2.f32 %v5449_v3 }
 0x8ba   : > { %v6516_v9 = vpop.eup %6515  ;;  %6535 = vpow2.f32 %v5450_v49 }
 0x8bb   : > { %v6518_v38 = vpop.eup %6517  ;;  %6537 = vpow2.f32 %v5451_v24  ;;  %v4138_v24 = vrot.slane %v8708_v36, 1 }
 0x8bc   : > { %v6520_v33 = vpop.eup %6519  ;;  %v8770_v55 = vmul.f32 %v6518_v38, %v6514_v16  ;;  %6539 = vpow2.f32 %v5452_v2 }
 0x8bd   : > { %v6522_v6 = vpop.eup %6521  ;;  %v8772_v53 = vmul.f32 %v6520_v33, %v6502_v52  ;;  %6541 = vpow2.f32 %v5453_v0  ;;  %v4194_v52 = vadd.f32 %v4134_v62, %v9323_v7  ;;  %v4202_v0 = vadd.f32 %v4138_v24, %v9385_v37 }
 0x8be   : > { %v6524_v11 = vpop.eup %6523  ;;  %6543 = vpow2.f32 %v5454_v32  ;;  %v8775_v25 = vmul.f32 %v6522_v6, %v6516_v9  ;;  %v5458_v62 = vmul.f32 -1.442695, %v4198_v57 }
 0x8bf   : > { %v6526_v3 = vpop.eup %6525  ;;  %v4275_v54 = vadd.f32 1.0, %v6524_v11  ;;  %6545 = vpow2.f32 %v5455_v50  ;;  %v5457_v33 = vmul.f32 -1.442695, %v4194_v52  ;;  %v4357_v52 = vrot.slane %v8642_v44, 3 }
 0x8c0   : > { %v6528_v59 = vpop.eup %6527  ;;  %v4276_v49 = vadd.f32 1.0, %v6526_v3  ;;  %6547 = vpow2.f32 %v5456_v34  ;;  %v5459_v3 = vmul.f32 -1.442695, %v4202_v0 }
 0x8c1   : > { %v6530_v18 = vpop.eup %6529  ;;  %v4277_v26 = vadd.f32 1.0, %v6528_v59  ;;  %6549 = vrcp.f32 %v4275_v54 }
 0x8c2   : > { %v6532_v19 = vpop.eup %6531  ;;  %v4278_v41 = vadd.f32 1.0, %v6530_v18  ;;  %6551 = vrcp.f32 %v4276_v49  ;;  %v4356_v18 = vrot.slane %v8642_v44, 2 }
 0x8c3   : > { %v6534_v2 = vpop.eup %6533  ;;  %v4279_v16 = vadd.f32 1.0, %v6532_v19  ;;  %6553 = vrcp.f32 %v4277_v26 }
 0x8c4   : > { %v6536_v9 = vpop.eup %6535  ;;  %v4280_v32 = vadd.f32 1.0, %v6534_v2  ;;  %6555 = vrcp.f32 %v4278_v41  ;;  %v4358_v2 = vrot.slane %v8642_v44, 4 }
 0x8c5   : > { %v6538_v38 = vpop.eup %6537  ;;  %v4281_v50 = vadd.f32 1.0, %v6536_v9  ;;  %6557 = vrcp.f32 %v4279_v16 }
 0x8c6   : > { %v6540_v34 = vpop.eup %6539  ;;  %v4282_v6 = vadd.f32 1.0, %v6538_v38  ;;  %6559 = vrcp.f32 %v4280_v32  ;;  %v4359_v32 = vrot.slane %v8642_v44, 5  ;;  %v4360_v38 = vrot.slane %v8642_v44, 6 }
 0x8c7   : > { %v6542_v11 = vpop.eup %6541  ;;  %6561 = vrcp.f32 %v4281_v50  ;;  %v4331_v54 = vadd.f32 1.0, %v6540_v34 }
 0x8c8   : > { %v6544_v36 = vpop.eup %6543  ;;  %6563 = vrcp.f32 %v4282_v6  ;;  %v4332_v24 = vadd.f32 1.0, %v6542_v11 }
 0x8c9   : > { %v6546_v59 = vpop.eup %6545  ;;  %6565 = vpow2.f32 %v5457_v33  ;;  %v4333_v26 = vadd.f32 1.0, %v6544_v36 }
 0x8ca   : > { %v6548_v49 = vpop.eup %6547  ;;  %6567 = vpow2.f32 %v5458_v62  ;;  %v4334_v41 = vadd.f32 1.0, %v6546_v59  ;;  %v4361_v62 = vrot.slane %v8642_v44, 7 }
 0x8cb   : > { %v6550_v19 = vpop.eup %6549  ;;  %6569 = vpow2.f32 %v5459_v3  ;;  %v4335_v0 = vadd.f32 1.0, %v6548_v49 }
 0x8cc   : > { %v6552_v57 = vpop.eup %6551  ;;  %v4371_v16 = vmul.f32 %v6550_v19, %v4356_v18  ;;  %6571 = vrcp.f32 %v4331_v54  ;;  %v4362_v54 = vrot.slane %v8642_v44, 1 }
 0x8cd   : > { %v6554_v9 = vpop.eup %6553  ;;  %v4372_v50 = vmul.f32 %v6552_v57, %v4357_v52  ;;  %6573 = vrcp.f32 %v4332_v24 }
 0x8ce   : > { %v6556_v33 = vpop.eup %6555  ;;  %v4373_v34 = vmul.f32 %v6554_v9, %v4358_v2  ;;  %v4387_v6 = vadd.f32 %v8756_v27, %v4371_v16  ;;  %6575 = vrcp.f32 %v4333_v26 }
 0x8cf   : > { %v6558_v11 = vpop.eup %6557  ;;  %v4374_v3 = vmul.f32 %v6556_v33, %v4359_v32  ;;  %v4388_v36 = vadd.f32 %v8759_v28, %v4372_v50  ;;  %6577 = vrcp.f32 %v4334_v41 }
 0x8d0   : > { %v6560_v59 = vpop.eup %6559  ;;  %v4375_v49 = vmul.f32 %v6558_v11, %v4360_v38  ;;  %v4389_v18 = vadd.f32 %v8762_v61, %v4373_v34  ;;  %v4514_v19 = vrot.slane %v4387_v6, 6  ;;  %6579 = vrcp.f32 %v4335_v0 }
 0x8d1   : > { %v6562_v24 = vpop.eup %6561  ;;  %v4515_v52 = vrot.slane %v4388_v36, 5  ;;  %v4376_v57 = vmul.f32 %v6560_v59, %v4361_v62  ;;  %v4390_v27 = vadd.f32 %v8765_v39, %v4374_v3  ;;  %6581 = vtanh.f32 %v4387_v6 }
 0x8d2   : > { %v6564_v26 = vpop.eup %6563  ;;  %v4517_v2 = vrot.slane %v4389_v18, 4  ;;  %v4377_v16 = vmul.f32 %v6562_v24, %v8642_v44  ;;  %v4391_v28 = vadd.f32 %v8768_v43, %v4375_v49  ;;  %6583 = vtanh.f32 %v4388_v36 }
 0x8d3   : > { %v6566_v41 = vpop.eup %6565  ;;  %v4516_v9 = vsel %vm1381_vm1, %v4515_v52, %v4514_v19  ;;  %v4378_v32 = vmul.f32 %v6564_v26, %v4362_v54  ;;  %v4392_v61 = vadd.f32 %v8770_v55, %v4376_v57  ;;  %6585 = vtanh.f32 %v4389_v18 }
 0x8d4   : > { %v6568_v0 = vpop.eup %6567  ;;  %v4336_v38 = vadd.f32 1.0, %v6566_v41  ;;  %v4393_v50 = vadd.f32 %v8772_v53, %v4377_v16  ;;  %6587 = vtanh.f32 %v4390_v27  ;;  %v4518_v39 = vsel %vm1384_vm2, %v4517_v2, %v4516_v9  ;;  %v4413_v53 = vpop.permute.xlu0 %4412 }
 0x8d5   : > { %v6570_v33 = vpop.eup %6569  ;;  %v4337_v34 = vadd.f32 1.0, %v6568_v0  ;;  %v4394_v6 = vadd.f32 %v8775_v25, %v4378_v32  ;;  %6589 = vtanh.f32 %v4391_v28  ;;  %v4519_v43 = vrot.slane %v4390_v27, 3 }
 0x8d6   : > { %v6572_v62 = vpop.eup %6571  ;;  %v4338_v11 = vadd.f32 1.0, %v6570_v33  ;;  %6591 = vrcp.f32 %v4336_v38  ;;  %v4521_v3 = vrot.slane %v4391_v28, 2  ;;  %v4523_v54 = vrot.slane %v4392_v61, 1 }
 0x8d7   : > { %v6574_v36 = vpop.eup %6573  ;;  %6593 = vrcp.f32 %v4337_v34  ;;  %v4520_v55 = vsel %vm1387_vm3, %v4519_v43, %v4518_v39  ;;  %v4526_v19 = vrot.slane %v4394_v6, 7  ;;  %vm4414_vm14 = vcmp.eq.s32.totalorder %v4413_v53, 1 }
 0x8d8   : > { %v6576_v59 = vpop.eup %6575  ;;  %6595 = vrcp.f32 %v4338_v11  ;;  %v4522_v49 = vsel %vm1390_vm4, %v4521_v3, %v4520_v55 }
 0x8d9   : > { %v6578_v18 = vpop.eup %6577  ;;  %6597 = vtanh.f32 %v4392_v61  ;;  %v4524_v25 = vsel %vm1393_vm5, %v4523_v54, %v4522_v49 }
 0x8da   : > { %v6580_v24 = vpop.eup %6579  ;;  %6599 = vtanh.f32 %v4393_v50  ;;  %v4525_v52 = vsel %vm1396_vm6, %v4393_v50, %v4524_v25 }
 0x8db   : > { %v6582_v57 = vpop.eup %6581  ;;  %6601 = vtanh.f32 %v4394_v6  ;;  %v4527_v27 = vsel %vm1399_vm7, %v4526_v19, %v4525_v52 }
 0x8dc   : > { %v6584_v26 = vpop.eup %6583  ;;  %v4403_v2 = vmul.f32 %v6582_v57, %v6572_v62  ;;  %v8807_v16 = vsel %vm4414_vm14, %v4527_v27, %v8642_v44 }
 0x8dd   : > { %v6586_v28 = vpop.eup %6585  ;;  %v4404_v41 = vmul.f32 %v6584_v26, %v6574_v36 }
 0x8de   : > { %v6588_v9 = vpop.eup %6587  ;;  %v4405_v32 = vmul.f32 %v6586_v28, %v6576_v59  ;;  %v4423_v61 = vrot.slane %v4403_v2, 6 }
 0x8df   : > { %v6590_v0 = vpop.eup %6589  ;;  %v4406_v38 = vmul.f32 %v6588_v9, %v6578_v18  ;;  %v4424_v39 = vrot.slane %v4404_v41, 5 }
 0x8e0   : > { %v6592_v50 = vpop.eup %6591  ;;  %v4407_v33 = vmul.f32 %v6590_v0, %v6580_v24  ;;  %v4426_v34 = vrot.slane %v4405_v32, 4 }
 0x8e1   : > { %v6594_v6 = vpop.eup %6593  ;;  %v4425_v43 = vsel %vm1381_vm1, %v4424_v39, %v4423_v61  ;;  %v4428_v11 = vrot.slane %v4406_v38, 3 }
 0x8e2   : > { %v6596_v62 = vpop.eup %6595  ;;  %v4427_v3 = vsel %vm1384_vm2, %v4426_v34, %v4425_v43  ;;  %v4430_v44 = vrot.slane %v4407_v33, 2 }
 0x8e3   : > { %v6598_v55 = vpop.eup %6597  ;;  %v4429_v36 = vsel %vm1387_vm3, %v4428_v11, %v4427_v3 }
 0x8e4   : > { %v6600_v54 = vpop.eup %6599  ;;  %v4408_v59 = vmul.f32 %v6598_v55, %v6592_v50  ;;  %v4431_v49 = vsel %vm1390_vm4, %v4430_v44, %v4429_v36 }
 0x8e5   : > { %v6602_v18 = vpop.eup %6601  ;;  %v4409_v25 = vmul.f32 %v6600_v54, %v6594_v6 }
 0x8e6   : > { %v4410_v19 = vmul.f32 %v6602_v18, %v6596_v62  ;;  %v4432_v24 = vrot.slane %v4408_v59, 1 }
 0x8e8   : > { %v4433_v52 = vsel %vm1393_vm5, %v4432_v24, %v4431_v49  ;;  %v4435_v57 = vrot.slane %v4410_v19, 7 }
 0x8e9   : > { %v4434_v27 = vsel %vm1396_vm6, %v4409_v25, %v4433_v52 }
 0x8ea   : > { %v4436_v26 = vsel %vm1399_vm7, %v4435_v57, %v4434_v27 }
 0x8eb   : > { %v4438_v2 = vsel %vm4414_vm14, %v4436_v26, 0.0  ;;  %v8819_v28 = vsel %vm4414_vm14, %v4436_v26, %v8654_v46 }
 0x8ec   : > { %v4440_v41 = vcombine.high %v4438_v2, %v4438_v2  ;;  %v4447_v9 = vrot.slane %v4438_v2, %v7626_v8  ;;  %v4530_v32 = vpack.c.bf16 %v8819_v28, %v8819_v28 }
 0x8ee   : > { %v4454_v61 = vrot.slane %v4440_v41, %v7626_v8  ;;  %v4455_v0 = vcombine.high %v4447_v9, %v4447_v9  ;;  %v4463_v38 = vrot.slane %v4447_v9, %v7626_v8  ;;  %5460 = vst.sshfl [vmem:[%s7296_s16 + $0x6] sm:$0x1 pattern:$0x73625140] %v4447_v9  ;;  %4564 = vmatmul.mubr.bf16.vlgmr.msra.gmra.mrb[44].mxu0 %v4530_v32 }
 0x8ef   : > { %4605 = vmatmul.mubr.bf16.vlgmr.msra.gmra.mrb[44].mxu1 %v4530_v32 }
 0x8f0   : > { %v4456_v46 = vcombine.high %v4454_v61, %v4454_v61  ;;  %v4470_v53 = vrot.slane %v4454_v61, %v7626_v8  ;;  %v4477_v39 = vrot.slane %v4455_v0, %v7626_v8  ;;  %v4485_v50 = vcombine.high %v4463_v38, %v4463_v38  ;;  %5461 = vst.sshfl [vmem:[%s7296_s16 + $0xe] sm:$0x1 pattern:$0x73625140] %v4455_v0 }
 0x8f1   : > { %5462 = vst.sshfl [vmem:[%s7296_s16 + $0x26] sm:$0x1 pattern:$0x73625140] %v4454_v61 }
 0x8f2   : > { %v4484_v33 = vrot.slane %v4456_v46, %v7626_v8  ;;  %v4486_v34 = vcombine.high %v4470_v53, %v4470_v53  ;;  %v4487_v6 = vcombine.high %v4477_v39, %v4477_v39  ;;  %4499 = vst [vmem:[%s7296_s16 + $0x16] sm:$0x1] %v4485_v50  ;;  %5463 = vst.sshfl [vmem:[%s7296_s16 + $0x2e] sm:$0x1 pattern:$0x73625140] %v4456_v46 }
 0x8f4   : > { %v4488_v43 = vcombine.high %v4484_v33, %v4484_v33  ;;  %4500 = vst [vmem:[%s7296_s16 + $0x1e] sm:$0x1] %v4487_v6  ;;  %4503 = vst [vmem:[%s7296_s16 + $0x36] sm:$0x1] %v4486_v34 }
 0x8f6   : > { %4504 = vst [vmem:[%s7296_s16 + $0x3e] sm:$0x1] %v4488_v43 }
 0x9c1   : > { %v4565_v11 = vpop.f32.mrb[44].mxu0 }
 0x9c2   : > { %v8837_v62 = vpop.f32.mrb[44].mxu1  ;;  %v4617_v3 = vrot.slane %v4565_v11, 1  ;;  %v4621_v44 = vrot.slane %v4565_v11, 2  ;;  %v4625_v55 = vrot.slane %v4565_v11, 3  ;;  %v4629_v36 = vrot.slane %v4565_v11, 4  ;;  %v8839_v54 = vpop.f32.mrb[45].mxu0 }
 0x9c3   : > { %v8841_v59 = vpop.f32.mrb[45].mxu1  ;;  %v4633_v49 = vrot.slane %v4565_v11, 5  ;;  %v4637_v18 = vrot.slane %v4565_v11, 6  ;;  %v4641_v25 = vrot.slane %v4565_v11, 7  ;;  %v4705_v19 = vadd.f32 %v4565_v11, %v7499_v29  ;;  %v4569_v24 = vpop.f32.mrb[46].mxu0 }
 0x9c4   : > { %v4610_v52 = vpop.f32.mrb[46].mxu1  ;;  %v4677_v57 = vadd.f32 %v4617_v3, %v7425_v35  ;;  %v4681_v27 = vadd.f32 %v4621_v44, %v7433_v42  ;;  %v4685_v26 = vadd.f32 %v4625_v55, %v7447_v51  ;;  %v4689_v2 = vadd.f32 %v4629_v36, %v7455_v58  ;;  %v4570_v41 = vpop.f32.mrb[47].mxu0 }
 0x9c5   : > { %v4611_v9 = vpop.f32.mrb[47].mxu1  ;;  %v4693_v32 = vadd.f32 %v4633_v49, %v7469_v4  ;;  %v4697_v61 = vadd.f32 %v4637_v18, %v9410_v23  ;;  %v5471_v0 = vmul.f32 -1.442695, %v4705_v19  ;;  %v4701_v38 = vadd.f32 %v4641_v25, %v7491_v21 }
 0x9c6   : > { %v5464_v29 = vmul.f32 -1.442695, %v4677_v57  ;;  %v5465_v46 = vmul.f32 -1.442695, %v4681_v27  ;;  %v5466_v53 = vmul.f32 -1.442695, %v4685_v26 }
 0x9c7   : > { %v5467_v39 = vmul.f32 -1.442695, %v4689_v2  ;;  %6603 = vpow2.f32 %v5471_v0  ;;  %v5468_v35 = vmul.f32 -1.442695, %v4693_v32  ;;  %v4619_v42 = vrot.slane %v8837_v62, 1 }
 0x9c8   : > { %6605 = vpow2.f32 %v5464_v29  ;;  %v4623_v51 = vrot.slane %v8837_v62, 2  ;;  %v5469_v58 = vmul.f32 -1.442695, %v4697_v61  ;;  %v4627_v4 = vrot.slane %v8837_v62, 3 }
 0x9c9   : > { %6607 = vpow2.f32 %v5465_v46  ;;  %v5470_v23 = vmul.f32 -1.442695, %v4701_v38  ;;  %v4631_v50 = vrot.slane %v8837_v62, 4  ;;  %v4635_v21 = vrot.slane %v8837_v62, 5 }
 0x9ca   : > { %6609 = vpow2.f32 %v5466_v53  ;;  %v4679_v33 = vadd.f32 %v4619_v42, %v7431_v40  ;;  %v4683_v34 = vadd.f32 %v4623_v51, %v7442_v47  ;;  %v4687_v6 = vadd.f32 %v4627_v4, %v7453_v56 }
 0x9cb   : > { %6611 = vpow2.f32 %v5467_v39  ;;  %v4691_v43 = vadd.f32 %v4631_v50, %v7464_v63  ;;  %v4695_v11 = vadd.f32 %v4635_v21, %v7475_v10  ;;  %v4639_v44 = vrot.slane %v8837_v62, 6  ;;  %v9419_v50 = vld [vmem:[#allocation28_spill] sm:$0xff] }
 0x9cc   : > { %6613 = vpow2.f32 %v5468_v35  ;;  %v4643_v40 = vrot.slane %v8837_v62, 7  ;;  %v4618_v56 = vrot.slane %v8839_v54, 1  ;;  %v4622_v10 = vrot.slane %v8839_v54, 2 }
 0x9cd   : > { %6615 = vpow2.f32 %v5469_v58  ;;  %v4699_v24 = vadd.f32 %v4639_v44, %v7486_v17  ;;  %v4626_v52 = vrot.slane %v8839_v54, 3  ;;  %v4630_v2 = vrot.slane %v8839_v54, 4 }
 0x9ce   : > { %6617 = vpow2.f32 %v5470_v23  ;;  %v4703_v26 = vadd.f32 %v4643_v40, %v9411_v13  ;;  %v4634_v32 = vrot.slane %v8839_v54, 5  ;;  %v4678_v61 = vadd.f32 %v4618_v56, %v9290_v45 }
 0x9cf   : > { %6619 = vtanh.f32 %v4679_v33  ;;  %v4638_v17 = vrot.slane %v8839_v54, 6  ;;  %v4682_v29 = vadd.f32 %v4622_v10, %v9351_v30  ;;  %v4642_v13 = vrot.slane %v8839_v54, 7 }
 0x9d0   : > { %6621 = vtanh.f32 %v4683_v34  ;;  %v4686_v39 = vadd.f32 %v4626_v52, %v9412_v48  ;;  %v4707_v42 = vadd.f32 %v8837_v62, %v9413_v20  ;;  %v4690_v45 = vadd.f32 %v4630_v2, %v9414_v5 }
 0x9d1   : > { %v6604_v3 = vpop.eup %6603  ;;  %6623 = vtanh.f32 %v4687_v6  ;;  %v4694_v58 = vadd.f32 %v4634_v32, %v9415_v12  ;;  %v5472_v4 = vmul.f32 -1.442695, %v4678_v61  ;;  %v4620_v30 = vrot.slane %v8841_v59, 1  ;;  %v9420_v6 = vld [vmem:[#allocation30_spill] sm:$0xff]  ;;  %v9421_v12 = vld [vmem:[#allocation33_spill] sm:$0xff] }
 0x9d2   : > { %v6606_v55 = vpop.eup %6605  ;;  %v4740_v36 = vadd.f32 1.0, %v6604_v3  ;;  %6625 = vtanh.f32 %v4691_v43  ;;  %v4698_v21 = vadd.f32 %v4638_v17, %v9419_v50  ;;  %v5473_v33 = vmul.f32 -1.442695, %v4682_v29 }
 0x9d3   : > { %v6608_v47 = vpop.eup %6607  ;;  %v4733_v49 = vadd.f32 1.0, %v6606_v55  ;;  %6627 = vtanh.f32 %v4695_v11  ;;  %v4624_v48 = vrot.slane %v8841_v59, 2  ;;  %v4702_v20 = vadd.f32 %v4642_v13, %v9420_v6 }
 0x9d4   : > { %v6610_v18 = vpop.eup %6609  ;;  %v4734_v63 = vadd.f32 1.0, %v6608_v47  ;;  %6629 = vrcp.f32 %v4740_v36  ;;  %v5474_v62 = vmul.f32 -1.442695, %v4686_v39  ;;  %v4628_v5 = vrot.slane %v8841_v59, 3 }
 0x9d5   : > { %v6612_v25 = vpop.eup %6611  ;;  %v4735_v19 = vadd.f32 1.0, %v6610_v18  ;;  %6631 = vrcp.f32 %v4733_v49  ;;  %v4706_v11 = vadd.f32 %v8839_v54, %v9421_v12  ;;  %v5475_v3 = vmul.f32 -1.442695, %v4690_v45 }
 0x9d6   : > { %v6614_v57 = vpop.eup %6613  ;;  %v4736_v27 = vadd.f32 1.0, %v6612_v25  ;;  %6633 = vrcp.f32 %v4734_v63  ;;  %v4632_v44 = vrot.slane %v8841_v59, 4  ;;  %v5476_v36 = vmul.f32 -1.442695, %v4694_v58 }
 0x9d7   : > { %v6616_v41 = vpop.eup %6615  ;;  %v4737_v9 = vadd.f32 1.0, %v6614_v57  ;;  %6635 = vrcp.f32 %v4735_v19  ;;  %v4636_v40 = vrot.slane %v8841_v59, 5  ;;  %v4680_v47 = vadd.f32 %v4620_v30, %v9261_v31 }
 0x9d8   : > { %v6618_v0 = vpop.eup %6617  ;;  %v4738_v38 = vadd.f32 1.0, %v6616_v41  ;;  %6637 = vrcp.f32 %v4736_v27  ;;  %v5477_v18 = vmul.f32 -1.442695, %v4698_v21  ;;  %v4684_v63 = vadd.f32 %v4624_v48, %v9295_v22 }
 0x9d9   : > { %v6620_v46 = vpop.eup %6619  ;;  %v4739_v53 = vadd.f32 1.0, %v6618_v0  ;;  %6639 = vrcp.f32 %v4737_v9  ;;  %v5478_v54 = vmul.f32 -1.442695, %v4702_v20  ;;  %v4688_v19 = vadd.f32 %v4628_v5, %v7458_v60 }
 0x9da   : > { %v6622_v35 = vpop.eup %6621  ;;  %6641 = vrcp.f32 %v4738_v38  ;;  %v5479_v57 = vmul.f32 -1.442695, %v4706_v11  ;;  %v4692_v31 = vadd.f32 %v4632_v44, %v7467_v1  ;;  %v5480_v2 = vmul.f32 -1.442695, %v4680_v47 }
 0x9db   : > { %v6624_v51 = vpop.eup %6623  ;;  %6643 = vrcp.f32 %v4739_v53  ;;  %v5481_v9 = vmul.f32 -1.442695, %v4684_v63  ;;  %v5482_v61 = vmul.f32 -1.442695, %v4688_v19  ;;  %v4644_v39 = vrot.slane %v8841_v59, 7 }
 0x9dc   : > { %v6626_v23 = vpop.eup %6625  ;;  %6645 = vtanh.f32 %v4699_v24  ;;  %v5483_v38 = vmul.f32 -1.442695, %v4692_v31  ;;  %v4708_v6 = vadd.f32 %v8841_v59, %v9385_v37  ;;  %v4862_v47 = vrot.slane %v8807_v16, 1 }
 0x9dd   : > { %v6628_v34 = vpop.eup %6627  ;;  %6647 = vtanh.f32 %v4703_v26  ;;  %v4696_v26 = vadd.f32 %v4636_v40, %v7480_v14  ;;  %v4863_v63 = vrot.slane %v8807_v16, 2 }
 0x9de   : > { %v6630_v43 = vpop.eup %6629  ;;  %6649 = vtanh.f32 %v4707_v42 }
 0x9df   : > { %v6632_v55 = vpop.eup %6631  ;;  %6651 = vpow2.f32 %v5472_v4  ;;  %v5484_v1 = vmul.f32 -1.442695, %v4696_v26  ;;  %v4865_v26 = vrot.slane %v8807_v16, 4 }
 0x9e0   : > { %v6634_v49 = vpop.eup %6633  ;;  %v8889_v56 = vmul.f32 %v6632_v55, %v6620_v46  ;;  %6653 = vpow2.f32 %v5473_v33  ;;  %v4640_v46 = vrot.slane %v8841_v59, 6  ;;  %v4704_v33 = vadd.f32 %v4644_v39, %v9358_v15 }
 0x9e1   : > { %v6636_v10 = vpop.eup %6635  ;;  %v8892_v25 = vmul.f32 %v6634_v49, %v6622_v35  ;;  %6655 = vpow2.f32 %v5474_v62  ;;  %v5487_v15 = vmul.f32 -1.442695, %v4708_v6 }
 0x9e2   : > { %v6638_v24 = vpop.eup %6637  ;;  %v8895_v52 = vmul.f32 %v6636_v10, %v6624_v51  ;;  %6657 = vpow2.f32 %v5475_v3  ;;  %v5486_v3 = vmul.f32 -1.442695, %v4704_v33 }
 0x9e3   : > { %v6640_v27 = vpop.eup %6639  ;;  %6659 = vpow2.f32 %v5476_v36  ;;  %v8899_v22 = vmul.f32 %v6638_v24, %v6626_v23  ;;  %v4700_v23 = vadd.f32 %v4640_v46, %v9323_v7 }
 0x9e4   : > { %v6642_v41 = vpop.eup %6641  ;;  %6661 = vpow2.f32 %v5477_v18  ;;  %v8901_v32 = vmul.f32 %v6640_v27, %v6628_v34 }
 0x9e5   : > { %v6644_v60 = vpop.eup %6643  ;;  %6663 = vpow2.f32 %v5478_v54  ;;  %v5485_v12 = vmul.f32 -1.442695, %v4700_v23 }
 0x9e6   : > { %v6646_v0 = vpop.eup %6645  ;;  %6665 = vpow2.f32 %v5479_v57  ;;  %v4864_v57 = vrot.slane %v8807_v16, 3 }
 0x9e7   : > { %v6648_v17 = vpop.eup %6647  ;;  %6667 = vpow2.f32 %v5480_v2  ;;  %v8903_v29 = vmul.f32 %v6646_v0, %v6642_v41  ;;  %v4866_v2 = vrot.slane %v8807_v16, 5 }
 0x9e8   : > { %v6650_v14 = vpop.eup %6649  ;;  %6669 = vpow2.f32 %v5481_v9  ;;  %v8906_v53 = vmul.f32 %v6648_v17, %v6644_v60  ;;  %v4867_v9 = vrot.slane %v8807_v16, 6 }
 0x9e9   : > { %v6652_v13 = vpop.eup %6651  ;;  %6671 = vpow2.f32 %v5482_v61  ;;  %v8909_v35 = vmul.f32 %v6650_v14, %v6630_v43 }
 0x9ea   : > { %v6654_v42 = vpop.eup %6653  ;;  %v4781_v45 = vadd.f32 1.0, %v6652_v13  ;;  %6673 = vpow2.f32 %v5483_v38  ;;  %v4868_v38 = vrot.slane %v8807_v16, 7 }
 0x9eb   : > { %v6656_v51 = vpop.eup %6655  ;;  %v4782_v58 = vadd.f32 1.0, %v6654_v42  ;;  %6675 = vpow2.f32 %v5484_v1 }
 0x9ec   : > { %v6658_v4 = vpop.eup %6657  ;;  %v4783_v30 = vadd.f32 1.0, %v6656_v51  ;;  %6677 = vrcp.f32 %v4781_v45 }
 0x9ed   : > { %v6660_v50 = vpop.eup %6659  ;;  %v4784_v21 = vadd.f32 1.0, %v6658_v4  ;;  %6679 = vrcp.f32 %v4782_v58 }
 0x9ee   : > { %v6662_v48 = vpop.eup %6661  ;;  %v4785_v34 = vadd.f32 1.0, %v6660_v50  ;;  %6681 = vrcp.f32 %v4783_v30 }
 0x9ef   : > { %v6664_v20 = vpop.eup %6663  ;;  %v4786_v62 = vadd.f32 1.0, %v6662_v48  ;;  %6683 = vrcp.f32 %v4784_v21 }
 0x9f0   : > { %v6666_v5 = vpop.eup %6665  ;;  %v4787_v43 = vadd.f32 1.0, %v6664_v20  ;;  %6685 = vrcp.f32 %v4785_v34 }
 0x9f1   : > { %v6668_v11 = vpop.eup %6667  ;;  %v4788_v7 = vadd.f32 1.0, %v6666_v5  ;;  %6687 = vrcp.f32 %v4786_v62 }
 0x9f2   : > { %v6670_v44 = vpop.eup %6669  ;;  %6689 = vrcp.f32 %v4787_v43  ;;  %v4837_v36 = vadd.f32 1.0, %v6668_v11 }
 0x9f3   : > { %v6672_v55 = vpop.eup %6671  ;;  %6691 = vrcp.f32 %v4788_v7  ;;  %v4838_v37 = vadd.f32 1.0, %v6670_v44 }
 0x9f4   : > { %v6674_v40 = vpop.eup %6673  ;;  %6693 = vpow2.f32 %v5485_v12  ;;  %v4839_v49 = vadd.f32 1.0, %v6672_v55 }
 0x9f5   : > { %v6676_v59 = vpop.eup %6675  ;;  %6695 = vpow2.f32 %v5486_v3  ;;  %v4840_v10 = vadd.f32 1.0, %v6674_v40 }
 0x9f6   : > { %v6678_v18 = vpop.eup %6677  ;;  %6697 = vpow2.f32 %v5487_v15  ;;  %v4841_v24 = vadd.f32 1.0, %v6676_v59 }
 0x9f7   : > { %v6680_v54 = vpop.eup %6679  ;;  %v4877_v19 = vmul.f32 %v6678_v18, %v4862_v47  ;;  %6699 = vrcp.f32 %v4837_v36 }
 0x9f8   : > { %v6682_v31 = vpop.eup %6681  ;;  %v4878_v27 = vmul.f32 %v6680_v54, %v4863_v63  ;;  %6701 = vrcp.f32 %v4838_v37 }
 0x9f9   : > { %v6684_v41 = vpop.eup %6683  ;;  %6703 = vrcp.f32 %v4839_v49  ;;  %v4879_v60 = vmul.f32 %v6682_v31, %v4864_v57  ;;  %v4893_v61 = vadd.f32 %v8889_v56, %v4877_v19 }
 0x9fa   : > { %v6686_v0 = vpop.eup %6685  ;;  %6705 = vrcp.f32 %v4840_v10  ;;  %v4880_v17 = vmul.f32 %v6684_v41, %v4865_v26  ;;  %v4894_v1 = vadd.f32 %v8892_v25, %v4878_v27 }
 0x9fb   : > { %v6688_v14 = vpop.eup %6687  ;;  %6707 = vrcp.f32 %v4841_v24  ;;  %v4881_v46 = vmul.f32 %v6686_v0, %v4866_v2  ;;  %v4895_v13 = vadd.f32 %v8895_v52, %v4879_v60  ;;  %v5020_v39 = vrot.slane %v4893_v61, 7 }
 0x9fc   : > { %v6690_v42 = vpop.eup %6689  ;;  %v4882_v45 = vmul.f32 %v6688_v14, %v4867_v9  ;;  %v4896_v51 = vadd.f32 %v8899_v22, %v4880_v17  ;;  %6709 = vtanh.f32 %v4893_v61  ;;  %v5021_v58 = vrot.slane %v4894_v1, 6 }
 0x9fd   : > { %v6692_v56 = vpop.eup %6691  ;;  %v4883_v4 = vmul.f32 %v6690_v42, %v4868_v38  ;;  %v4897_v30 = vadd.f32 %v8901_v32, %v4881_v46  ;;  %6711 = vtanh.f32 %v4894_v1  ;;  %v5023_v23 = vrot.slane %v4895_v13, 5 }
 0x9fe   : > { %v6694_v50 = vpop.eup %6693  ;;  %v4884_v25 = vmul.f32 %v6692_v56, %v8807_v16  ;;  %v4898_v21 = vadd.f32 %v8903_v29, %v4882_v45  ;;  %6713 = vtanh.f32 %v4895_v13  ;;  %v5022_v52 = vsel %vm1381_vm1, %v5021_v58, %v5020_v39 }
 0x9ff   : > { %v6696_v33 = vpop.eup %6695  ;;  %v4842_v48 = vadd.f32 1.0, %v6694_v50  ;;  %v4899_v22 = vadd.f32 %v8906_v53, %v4883_v4  ;;  %6715 = vtanh.f32 %v4896_v51  ;;  %v5024_v34 = vsel %vm1384_vm2, %v5023_v23, %v5022_v52  ;;  %v4919_v53 = vpop.permute.xlu1 %4918 }
 0xa00   : > { %v6698_v6 = vpop.eup %6697  ;;  %v4843_v20 = vadd.f32 1.0, %v6696_v33  ;;  %v4900_v32 = vadd.f32 %v8909_v35, %v4884_v25  ;;  %6717 = vtanh.f32 %v4897_v30  ;;  %v5025_v62 = vrot.slane %v4896_v51, 4 }
 0xa01   : > { %v6700_v5 = vpop.eup %6699  ;;  %v4844_v43 = vadd.f32 1.0, %v6698_v6  ;;  %6719 = vrcp.f32 %v4842_v48  ;;  %v5027_v29 = vrot.slane %v4897_v30, 3  ;;  %v5029_v7 = vrot.slane %v4898_v21, 2 }
 0xa02   : > { %v6702_v12 = vpop.eup %6701  ;;  %6721 = vrcp.f32 %v4843_v20  ;;  %v5026_v11 = vsel %vm1387_vm3, %v5025_v62, %v5024_v34  ;;  %v5031_v15 = vrot.slane %v4899_v22, 1  ;;  %vm4920_vm15 = vcmp.eq.s32.totalorder %v4919_v53, 1 }
 0xa03   : > { %v6704_v3 = vpop.eup %6703  ;;  %6723 = vrcp.f32 %v4844_v43  ;;  %v5028_v44 = vsel %vm1390_vm4, %v5027_v29, %v5026_v11 }
 0xa04   : > { %v6706_v55 = vpop.eup %6705  ;;  %6725 = vtanh.f32 %v4898_v21  ;;  %v5030_v35 = vsel %vm1393_vm5, %v5029_v7, %v5028_v44 }
 0xa05   : > { %v6708_v36 = vpop.eup %6707  ;;  %6727 = vtanh.f32 %v4899_v22  ;;  %v5032_v40 = vsel %vm1396_vm6, %v5031_v15, %v5030_v35 }
 0xa06   : > { %v6710_v37 = vpop.eup %6709  ;;  %6729 = vtanh.f32 %v4900_v32  ;;  %v5033_v59 = vsel %vm1399_vm7, %v4900_v32, %v5032_v40 }
 0xa07   : > { %v6712_v47 = vpop.eup %6711  ;;  %v4909_v49 = vmul.f32 %v6710_v37, %v6700_v5  ;;  %v5035_v18 = vsel %vm4920_vm15, %v5033_v59, %v8807_v16 }
 0xa08   : > { %v6714_v63 = vpop.eup %6713  ;;  %v4910_v10 = vmul.f32 %v6712_v47, %v6702_v12  ;;  %5037 = vst [vmem:[#allocation11] sm:$0xff] %v5035_v18 }
 0xa09   : > { %v6716_v54 = vpop.eup %6715  ;;  %v4911_v19 = vmul.f32 %v6714_v63, %v6704_v3  ;;  %v4929_v24 = vrot.slane %v4909_v49, 7 }
 0xa0a   : > { %v6718_v57 = vpop.eup %6717  ;;  %v4912_v31 = vmul.f32 %v6716_v54, %v6706_v55  ;;  %v4930_v27 = vrot.slane %v4910_v10, 6 }
 0xa0b   : > { %v6720_v26 = vpop.eup %6719  ;;  %v4913_v2 = vmul.f32 %v6718_v57, %v6708_v36  ;;  %v4932_v41 = vrot.slane %v4911_v19, 5 }
 0xa0c   : > { %v6722_v9 = vpop.eup %6721  ;;  %v4931_v60 = vsel %vm1381_vm1, %v4930_v27, %v4929_v24  ;;  %v4934_v61 = vrot.slane %v4912_v31, 4 }
 0xa0d   : > { %v6724_v0 = vpop.eup %6723  ;;  %v4933_v38 = vsel %vm1384_vm2, %v4932_v41, %v4931_v60  ;;  %v4936_v16 = vrot.slane %v4913_v2, 3 }
 0xa0e   : > { %v6726_v17 = vpop.eup %6725  ;;  %v4935_v1 = vsel %vm1387_vm3, %v4934_v61, %v4933_v38 }
 0xa0f   : > { %v6728_v14 = vpop.eup %6727  ;;  %v4914_v46 = vmul.f32 %v6726_v17, %v6720_v26  ;;  %v4937_v13 = vsel %vm1390_vm4, %v4936_v16, %v4935_v1 }
 0xa10   : > { %v6730_v39 = vpop.eup %6729  ;;  %v4915_v42 = vmul.f32 %v6728_v14, %v6722_v9 }
 0xa11   : > { %v4916_v45 = vmul.f32 %v6730_v39, %v6724_v0  ;;  %v4938_v51 = vrot.slane %v4914_v46, 2 }
 0xa12   : > { %v4940_v58 = vrot.slane %v4915_v42, 1 }
 0xa13   : > { %v4939_v56 = vsel %vm1393_vm5, %v4938_v51, %v4937_v13 }
 0xa14   : > { %v4941_v4 = vsel %vm1396_vm6, %v4940_v58, %v4939_v56 }
 0xa15   : > { %v4942_v30 = vsel %vm1399_vm7, %v4916_v45, %v4941_v4 }
 0xa16   : > { %v4944_v23 = vsel %vm4920_vm15, %v4942_v30, 0.0  ;;  %v5011_v50 = vsel %vm4920_vm15, %v4942_v30, %v8819_v28 }
 0xa17   : > { %v4946_v25 = vcombine.high %v4944_v23, %v4944_v23  ;;  %v4953_v21 = vrot.slane %v4944_v23, %v7626_v8  ;;  %5036 = vst [vmem:[#allocation9] sm:$0xff] %v5011_v50 }
 0xa18   : > { %6926 = shalt.err (!%p6923_p11)
}
 0xa19   : > { %s6927_s30 = scalar_lea.hbm %s9070_s8, 128  ;;  %p9423_p4 = pmov %p9422_p9 }
 0xa1a   : > { %p6928_p12 = scmp.ne.s32.totalorder %s9070_s8, %s6927_s30  ;;  %p6933_p13 = scmp.lt.u32.totalorder %s6927_s30, %s9070_s8 }
 0xa1c   : > { %p6929_p6 = pnand %p6928_p12, %p9423_p4 }
 0xa1e   : > { %p6930_p10 = pneg %p6929_p6 }
 0xa20   : > { %p6935_p3 = pnand %p6933_p13, %p6930_p10 }
 0xa22   : > { %6938 = shalt.err (!%p6935_p3)
}
 0xa23   : > { %p9424_p8 = pmov %p9423_p4  ;;  %v4960_v28 = vrot.slane %v4946_v25, %v7626_v8  ;;  %v4961_v52 = vcombine.high %v4953_v21, %v4953_v21  ;;  %v4969_v33 = vrot.slane %v4953_v21, %v7626_v8  ;;  %5488 = vst.sshfl [vmem:[%s7296_s16 + $0x7] sm:$0x1 pattern:$0x73625140] %v4953_v21  ;;  %s6939_s18 = scalar_lea.vmem %s8950_s14, 128 }
 0xa24   : > { %p6940_p9 = scmp.ne.s32.totalorder %s8950_s14, %s6939_s18  ;;  %p9425_p2 = pmov %p9423_p4 }
 0xa25   : > { %5512 = dma.vmem_to_hbm [thread:$0]  (%p9424_p8), %s5066_s24, 128, %s9070_s8, [#allocation10]  }
 0xa26   : > { %p6941_p7 = pnand %p6940_p9, %p9425_p2  ;;  %p6946_p0 = scmp.lt.s32.totalorder %s8950_s14, %s8950_s14 }
 0xa27   : > { %p6947_p5 = scmp.lt.s32.totalorder %s6939_s18, %s6939_s18 }
 0xa28   : > { %p6942_p1 = pneg %p6941_p7 }
 0xa29   : > { %p6948_p11 = por %p6947_p5, %p6946_p0 }
 0xa2b   : > { %p6949_p12 = pnand %p6948_p11, %p6942_p1 }
 0xa2d   : > { %6952 = shalt.err (!%p6949_p12)
}
 0xa2e   : > { %s6953_s24 = scalar_lea.hbm %s9071_s9, 128  ;;  %p9426_p6 = pmov %p9425_p2 }
 0xa2f   : > { %p6954_p4 = scmp.ne.s32.totalorder %s9071_s9, %s6953_s24  ;;  %p6959_p3 = scmp.lt.u32.totalorder %s6953_s24, %s9071_s9 }
 0xa31   : > { %p6955_p10 = pnand %p6954_p4, %p9426_p6 }
 0xa33   : > { %p6956_p13 = pneg %p6955_p10 }
 0xa35   : > { %p6961_p8 = pnand %p6959_p3, %p6956_p13 }
 0xa37   : > { %6964 = shalt.err (!%p6961_p8)
}
 0xa38   : > { %p9427_p9 = pmov %p9425_p2  ;;  %s5493_s26 = sshll.u32 %s7135_s13, 7  ;;  %v4962_v48 = vcombine.high %v4960_v28, %v4960_v28  ;;  %v4976_v22 = vrot.slane %v4960_v28, %v7626_v8  ;;  %v4983_v34 = vrot.slane %v4961_v52, %v7626_v8  ;;  %v4991_v6 = vcombine.high %v4969_v33, %v4969_v33  ;;  %5489 = vst.sshfl [vmem:[%s7296_s16 + $0xf] sm:$0x1 pattern:$0x73625140] %v4961_v52 }
 0xa39   : > { %5490 = vst.sshfl [vmem:[%s7296_s16 + $0x27] sm:$0x1 pattern:$0x73625140] %v4960_v28  ;;  %s5051_s22 = sshll.u32 %s7296_s16, 4  ;;  %s9009_s18 = scalar_lea.hbm %s9069_s7, %s5493_s26  ;;  %s9011_s22 = int_to_ptr.vmem [resolvable:$true] %s5051_s22 }
 0xa3a   : > { %5514 = dma.vmem_to_hbm [thread:$0]  (%p9427_p9), %s8950_s14, 128, %s9071_s9, [#allocation10]   ;;  %v4990_v20 = vrot.slane %v4962_v48, %v7626_v8  ;;  %v4992_v32 = vcombine.high %v4976_v22, %v4976_v22  ;;  %v4993_v62 = vcombine.high %v4983_v34, %v4983_v34  ;;  %5005 = vst [vmem:[%s7296_s16 + $0x17] sm:$0x1] %v4991_v6 }
 0xa3b   : > { %5491 = vst.sshfl [vmem:[%s7296_s16 + $0x2f] sm:$0x1 pattern:$0x73625140] %v4962_v48  ;;  %s5039_s27 = scalar_lea.sflag [#allocation4], %s7281_s15  ;;  %s6965_s23 = scalar_lea.vmem %s9011_s22, 1024 }
 0xa3c   : > { %v4994_v5 = vcombine.high %v4990_v20, %v4990_v20  ;;  %5006 = vst [vmem:[%s7296_s16 + $0x1f] sm:$0x1] %v4993_v62  ;;  %5009 = vst [vmem:[%s7296_s16 + $0x37] sm:$0x1] %v4992_v32  ;;  %p6966_p2 = scmp.ne.s32.totalorder %s9011_s22, %s6965_s23  ;;  %p9428_p7 = scmp.ne.s32.totalorder %s9205_s21, 0 }
 0xa3d   : > { %s7060_s24 = smov [#allocation8]  }
 0xa3e   : > { %5010 = vst [vmem:[%s7296_s16 + $0x3f] sm:$0x1] %v4994_v5  ;;  %p6967_p1 = pnand %p6966_p2, %p9428_p7  ;;  %s6969_s19 = sshll.u32 %s7060_s24, 4  ;;  %s6970_s19 = int_to_ptr.vmem [resolvable:$false] %s6969_s19 }
 0xa3f   : > { %s6971_s29 = scalar_lea.vmem %s6970_s19, 2048  ;;  %p6972_p5 = scmp.lt.s32.totalorder %s9011_s22, %s6970_s19 }
 0xa40   : > { %p6968_p0 = pneg %p6967_p1  ;;  %p6973_p11 = scmp.lt.s32.totalorder %s6971_s29, %s6965_s23 }
 0xa42   : > { %p6974_p12 = por %p6973_p11, %p6972_p5 }
 0xa44   : > { %p6975_p4 = pnand %p6974_p12, %p6968_p0 }
 0xa46   : > { %6978 = shalt.err (!%p6975_p4)
}
 0xa47   : > { %s6979_s16 = scalar_lea.hbm %s9009_s18, 1024  ;;  %s6983_s17 = scalar_lea.hbm %s9069_s7, 2048 }
 0xa48   : > { %p6980_p6 = scmp.ne.s32.totalorder %s9009_s18, %s6979_s16  ;;  %p6984_p3 = scmp.lt.u32.totalorder %s9009_s18, %s9069_s7 }
 0xa49   : > { %p6985_p8 = scmp.lt.u32.totalorder %s6983_s17, %s6979_s16  ;;  %p6987_p2 = scmp.lt.u32.totalorder %s6979_s16, %s9009_s18 }
 0xa4a   : > { %p6981_p10 = pnand %p6980_p6, %p9428_p7 }
 0xa4b   : > { %p6986_p9 = por %p6985_p8, %p6984_p3 }
 0xa4c   : > { %p6982_p13 = pneg %p6981_p10 }
 0xa4d   : > { %p6988_p1 = por %p6987_p2, %p6986_p9 }
 0xa4f   : > { %p6989_p0 = pnand %p6988_p1, %p6982_p13 }
 0xa51   : > { %6992 = shalt.err (!%p6989_p0)
}
 0xa52   : > { %s7061_s14 = smov 128   ;;  %s7062_s28 = smov 256  }
 0xa53   : > { %s7063_s23 = smov 8   ;;  %p9429_p5 = scmp.eq.s32.totalorder %s7135_s13, 1 }
 0xa54   : > { %5510 = dma.vmem_to_hbm [thread:$0]  (%p9428_p7), %s9011_s22, 1024, %s9009_s18, %s5039_s27, %s7061_s14, %s7062_s28, %s7063_s23  }
 0xa55   : > { %7018 = dma.done.wait (%p9429_p5), [#allocation10], 256   ;;  %p9430_p11 = pmov %p9429_p5 }
 0xa57   : > { %7020 = vsyncadd (%p9430_p11), [#allocation10], 4294967040 }
 0xa58 PF: > { %s9431_s24 = sld [smem:[#allocation16_spill]]  ;;  %s9432_s19 = sld [smem:[#allocation19_spill]] }
 0xa59   : > { %p9434_p4 = scmp.ge.s32.totalorder %s7039_s12, 2 }
 0xa5e   : > { %s5096_s29 = sand.u32 1, %s9431_s24   ;;  %p9433_p12 = scmp.ne.s32.totalorder %s9432_s19, 0 }
 0xa5f   : > { %s5097_s16 = scalar_lea.sflag [#allocation4], %s5096_s29 }
 0xa60   : > { %p5532_p6 = pnand %p9434_p4, %p9433_p12 }
 0xa62   : > { %7022 = dma.done.wait (!%p5532_p6), %s5097_s16, 1024  }
 0xa63   : > { %7024 = vsyncadd (!%p5532_p6), %s5097_s16, 4294966272  ;;  %s9435_s12 = sld [smem:[#allocation17_spill]]  ;;  %s9436_s21 = sld [smem:[#allocation18_spill]] }
 0xa64   : > { %s9437_s30 = smov %s7031_s10  ;;  %s9438_s10 = smov %s7035_s11 }
 0xa69   : > { %p25_p7 = scmp.ge.s32.totalorder %s9435_s12, 4   ;;  %s9439_s11 = smov %s9436_s21 }
 0xa6b   :  { %27 = sbr.rel (!%p25_p7) target bundleno = 7 (0x7), region = 121 }
 0xa72   :  { %5102 = vsyncpa [#allocation3], 1 }
 0xa73   :  { %5104 = vsyncpa [#allocation3 + $0x1], 1 }
 0xa74   :  { %5105 = vsyncpa [#allocation6], 1 }
 0xa75   :  { %5106 = vsyncpa [#allocation4], 1 }
 0xa76   :  { %5108 = vsyncpa [#allocation4 + $0x1], 1 }
 0xa77   :  { %5109 = vsyncpa [#allocation10], 1 }

</bundles_post_ra>
